<compile_context>
chip_gen: v6e
topology: v6e:2x2x1
jax: 0.10.0
libtpu: 0.0.40
codegen_flags: <defaults>
</compile_context>

<pallas_src>
from functools import partial

import jax
import jax.numpy as jnp
from jax.experimental import pallas as pl
from jax.experimental.pallas import tpu as pltpu

IN_DIM = 3072     # 3 * 32 * 32
HID = 256
COL_CHUNK = 256   # column tile of the last (256 -> 3072) layer


def _mlp_kernel(x_ref, w1_ref, b1_ref, w2_ref, b2_ref, w3_ref, b3_ref,
                w4_ref, b4_ref, out_ref, proba_ref):
    bf16 = jnp.bfloat16

    # Hidden stack: bf16 x bf16 matmuls, f32 accumulation, f32 bias/activations.
    h = jnp.dot(x_ref[...].astype(bf16), w1_ref[...],
                preferred_element_type=jnp.float32) + b1_ref[...]
    h = jnp.maximum(h, 0.0)                                    # ReLU

    h = jnp.dot(h.astype(bf16), w2_ref[...],
                preferred_element_type=jnp.float32) + b2_ref[...]
    h = jnp.maximum(h, 0.0)                                    # ReLU

    h = jnp.dot(h.astype(bf16), w3_ref[...],
                preferred_element_type=jnp.float32) + b3_ref[...]
    h = jnp.tanh(h)                                            # Tanh
    hb = h.astype(bf16)

    # Last layer chunked over 256-wide column tiles: overlaps the output
    # stores with the remaining MXU work and keeps the live f32 intermediate
    # at (tile, 256) instead of (tile, 3072).
    for c in range(IN_DIM // COL_CHUNK):
        lo = c * COL_CHUNK
        hi = lo + COL_CHUNK
        p = jnp.dot(hb, w4_ref[:, lo:hi],
                    preferred_element_type=jnp.float32) + b4_ref[:, lo:hi]
        p = jnp.maximum(p, 0.0)                                # ReLU
        proba_ref[:, lo:hi] = p.astype(proba_ref.dtype)
        out_ref[:, lo:hi] = (x_ref[:, lo:hi] * p).astype(out_ref.dtype)


def _round_up(n, m):
    return ((n + m - 1) // m) * m


def _pick_tile_and_vmem():
    """Generation-aware max batch tile & scoped-VMEM choice."""
    try:
        cap = pltpu.get_tpu_info().vmem_capacity_bytes
    except Exception:  # hardware query only; fall back to conservative budget
        cap = None
    if cap is not None and cap >= (100 << 20):   # v5e / v6e: 128 MiB physical
        return 512, 100 << 20
    # v7x (64 MiB physical per TC) or unknown chip: leave compiler headroom.
    # Budget @ tile=256: 2x3 MiB x (2 bufs) + (3+1.5) MiB x2 out bufs
    #                    + ~6.6 MiB bf16 weights + ~3 MiB intermediates ~ 25 MiB.
    return 256, 52 << 20


def _tensorcores_per_chip():
    """2 for megacore / multi-TC parts (v4, v5p, v7x), else 1."""
    kind = getattr(jax.devices()[0], "device_kind", "").lower()
    if "v7" in kind or "v5p" in kind or ("v4" in kind and "lite" not in kind):
        return 2
    return 1


def _run(x_flat_pad, w1, b1, w2, b2, w3, b3, w4, b4, tile, vmem_limit,
         proba_dtype):
    B_pad = x_flat_pad.shape[0]

    const = lambda shape: pl.BlockSpec(shape, lambda i: (0,) * len(shape))
    in_specs = [pl.BlockSpec((tile, IN_DIM), lambda i: (i, 0))]       # x
    for arr in (w1, b1, w2, b2, w3, b3, w4, b4):
        in_specs.append(const(arr.shape))                             # weights

    return pl.pallas_call(
        _mlp_kernel,
        out_shape=(
            jax.ShapeDtypeStruct((B_pad, IN_DIM), jnp.float32),        # x*proba
            jax.ShapeDtypeStruct((B_pad, IN_DIM), proba_dtype),        # proba
        ),
        grid=(B_pad // tile,),
        in_specs=in_specs,
        out_specs=(
            pl.BlockSpec((tile, IN_DIM), lambda i: (i, 0)),
            pl.BlockSpec((tile, IN_DIM), lambda i: (i, 0)),
        ),
        compiler_params=pltpu.CompilerParams(
            dimension_semantics=("parallel",),
            vmem_limit_bytes=vmem_limit,
        ),
    )(x_flat_pad, w1, b1, w2, b2, w3, b3, w4, b4)


@partial(jax.jit, static_argnames=("proba_dtype",))
def dense_explainer_cifar(x_nchw, params, proba_dtype=jnp.bfloat16):
    """Forward pass of denseExplainerCifar.

    Args:
      x_nchw: (B, 3, 32, 32) float array.
      params: dict w1..w4 stored (in, out), b1..b4 stored (1, out).
      proba_dtype: output dtype of proba (bf16 default for HBM-bound epilogue;
        pass jnp.float32 for strict dtype parity with the PyTorch module).
    Returns:
      (masked_image (B, 3, 32, 32) f32, proba (B, 3072) proba_dtype).
    """
    B = x_nchw.shape[0]
    x_flat = x_nchw.reshape(B, IN_DIM).astype(jnp.float32)

    # Weights in bf16 (no-op cast if already bf16), biases in f32.
    bf16 = jnp.bfloat16
    w1, b1 = params["w1"].astype(bf16), params["b1"].astype(jnp.float32)
    w2, b2 = params["w2"].astype(bf16), params["b2"].astype(jnp.float32)
    w3, b3 = params["w3"].astype(bf16), params["b3"].astype(jnp.float32)
    w4, b4 = params["w4"].astype(bf16), params["b4"].astype(jnp.float32)

    max_tile, vmem_limit = _pick_tile_and_vmem()

    # Even-split tile selection: pad is bounded to a few sublane rows per step.
    b8 = _round_up(B, 8)
    n_steps = -(-b8 // max_tile)
    if n_steps == 1 and b8 >= 16 and _tensorcores_per_chip() >= 2:
        n_steps = 2                       # let "parallel" shard across 2 TCs
    tile = _round_up(-(-b8 // n_steps), 8)
    B_pad = n_steps * tile

    if B_pad != B:
        # Small zero pad; pad rows produce finite garbage that is sliced off.
        x_flat = jnp.pad(x_flat, ((0, B_pad - B), (0, 0)))

    out_flat, proba = _run(x_flat, w1, b1, w2, b2, w3, b3, w4, b4,
                           tile, vmem_limit, proba_dtype)

    return out_flat[:B].reshape(B, 3, 32, 32), proba[:B]


def init_params(key):
    """Deterministic synthetic parameters (shapes match the nn.Linear layers).

    Weights are stored (in, out) in bf16; biases (1, out) in f32.
    """
    ks = jax.random.split(key, 8)

    def lin(kw, kb, fan_in, fan_out):
        bound = 1.0 / jnp.sqrt(fan_in)
        w = jax.random.uniform(kw, (fan_in, fan_out), jnp.float32, -bound, bound)
        b = jax.random.uniform(kb, (1, fan_out), jnp.float32, -bound, bound)
        return w.astype(jnp.bfloat16), b

    w1, b1 = lin(ks[0], ks[1], IN_DIM, HID)
    w2, b2 = lin(ks[2], ks[3], HID, HID)
    w3, b3 = lin(ks[4], ks[5], HID, HID)
    w4, b4 = lin(ks[6], ks[7], HID, IN_DIM)
    return dict(w1=w1, b1=b1, w2=w2, b2=b2, w3=w3, b3=b3, w4=w4, b4=b4)


def _reference(x_nchw, p):
    """Pure-JAX reference using the same bf16-matmul / f32-accumulate math."""
    bf16 = jnp.bfloat16
    B = x_nchw.shape[0]
    x = x_nchw.reshape(B, -1).astype(jnp.float32)

    def dot(a, w):
        return jnp.dot(a.astype(bf16), w.astype(bf16),
                       preferred_element_type=jnp.float32)

    h = jnp.maximum(dot(x, p["w1"]) + p["b1"], 0.0)
    h = jnp.maximum(dot(h, p["w2"]) + p["b2"], 0.0)
    h = jnp.tanh(dot(h, p["w3"]) + p["b3"])
    proba = jnp.maximum(dot(h, p["w4"]) + p["b4"], 0.0)
    return (x * proba).reshape(B, 3, 32, 32), proba


if __name__ == "__main__":
    key = jax.random.PRNGKey(0)
    k_x, k_p = jax.random.split(key)
    # Fixed 3x32x32 CIFAR input; B=10 exercises the padding path.
    x = jax.random.normal(k_x, (10, 3, 32, 32), jnp.float32)
    params = init_params(k_p)

    img, proba = dense_explainer_cifar(x, params)
    jax.block_until_ready((img, proba))

    ref_img, ref_proba = _reference(x, params)
    assert img.shape == (10, 3, 32, 32) and proba.shape == (10, 3072)
    # Masked image is computed in f32 inside the kernel -> tight match.
    assert jnp.allclose(img, ref_img, atol=2e-3, rtol=2e-3)
    # proba is emitted in bf16 -> allow bf16 quantization error.
    assert jnp.allclose(proba.astype(jnp.float32), ref_proba,
                        atol=1e-2, rtol=1e-2)

    print("KERNEL_OK")
</pallas_src>

<mosaic_0001>
module attributes {stable_mosaic.version = 11 : i64} {
  func.func @_mlp_kernel(%arg0: i32, %arg1: memref<16x3072xf32, #tpu.memory_space<vmem>>, %arg2: memref<3072x256xbf16, #tpu.memory_space<vmem>>, %arg3: memref<1x256xf32, #tpu.memory_space<vmem>>, %arg4: memref<256x256xbf16, #tpu.memory_space<vmem>>, %arg5: memref<1x256xf32, #tpu.memory_space<vmem>>, %arg6: memref<256x256xbf16, #tpu.memory_space<vmem>>, %arg7: memref<1x256xf32, #tpu.memory_space<vmem>>, %arg8: memref<256x3072xbf16, #tpu.memory_space<vmem>>, %arg9: memref<1x3072xf32, #tpu.memory_space<vmem>>, %arg10: memref<16x3072xf32, #tpu.memory_space<vmem>>, %arg11: memref<16x3072xbf16, #tpu.memory_space<vmem>>) attributes {dimension_semantics = [#tpu.dimension_semantics<parallel>], iteration_bounds = array<i64: 1>, scalar_prefetch = 0 : i64, scratch_operands = 0 : i64, tpu.core_type = #tpu.core_type<tc>, window_params = [{transform_indices = @transform_0, window_bounds = array<i64: 16, 3072>}, {pipeline_mode = #tpu.pipeline_mode<synchronous>, transform_indices = @transform_1, window_bounds = array<i64: 3072, 256>}, {pipeline_mode = #tpu.pipeline_mode<synchronous>, transform_indices = @transform_2, window_bounds = array<i64: 1, 256>}, {pipeline_mode = #tpu.pipeline_mode<synchronous>, transform_indices = @transform_3, window_bounds = array<i64: 256, 256>}, {pipeline_mode = #tpu.pipeline_mode<synchronous>, transform_indices = @transform_4, window_bounds = array<i64: 1, 256>}, {pipeline_mode = #tpu.pipeline_mode<synchronous>, transform_indices = @transform_5, window_bounds = array<i64: 256, 256>}, {pipeline_mode = #tpu.pipeline_mode<synchronous>, transform_indices = @transform_6, window_bounds = array<i64: 1, 256>}, {pipeline_mode = #tpu.pipeline_mode<synchronous>, transform_indices = @transform_7, window_bounds = array<i64: 256, 3072>}, {pipeline_mode = #tpu.pipeline_mode<synchronous>, transform_indices = @transform_8, window_bounds = array<i64: 1, 3072>}, {transform_indices = @transform_9, window_bounds = array<i64: 16, 3072>}, {transform_indices = @transform_10, window_bounds = array<i64: 16, 3072>}]} {
    %c0 = arith.constant 0 : index
    %c0_0 = arith.constant 0 : index
    %0 = vector.load %arg1[%c0, %c0_0] : memref<16x3072xf32, #tpu.memory_space<vmem>>, vector<16x3072xf32>
    %1 = arith.truncf %0 : vector<16x3072xf32> to vector<16x3072xbf16>
    %c0_1 = arith.constant 0 : index
    %c0_2 = arith.constant 0 : index
    %2 = vector.load %arg2[%c0_1, %c0_2] : memref<3072x256xbf16, #tpu.memory_space<vmem>>, vector<3072x256xbf16>
    %cst = arith.constant dense<0.000000e+00> : vector<16x256xf32>
    %3 = tpu.matmul %1, %2, %cst {dimension_numbers = #tpu.dot_dimension_numbers<[1], [0], [0], [1], [0, 0, 1, 1], [], []>} : vector<16x3072xbf16>, vector<3072x256xbf16>, vector<16x256xf32> -> vector<16x256xf32>
    %c0_3 = arith.constant 0 : index
    %c0_4 = arith.constant 0 : index
    %4 = vector.load %arg3[%c0_3, %c0_4] : memref<1x256xf32, #tpu.memory_space<vmem>>, vector<1x256xf32>
    %5 = vector.broadcast %4 : vector<1x256xf32> to vector<16x256xf32>
    %6 = arith.addf %3, %5 : vector<16x256xf32>
    %cst_5 = arith.constant 0.000000e+00 : f32
    %7 = vector.broadcast %cst_5 : f32 to vector<16x256xf32>
    %8 = arith.maximumf %6, %7 : vector<16x256xf32>
    %9 = arith.truncf %8 : vector<16x256xf32> to vector<16x256xbf16>
    %c0_6 = arith.constant 0 : index
    %c0_7 = arith.constant 0 : index
    %10 = vector.load %arg4[%c0_6, %c0_7] : memref<256x256xbf16, #tpu.memory_space<vmem>>, vector<256x256xbf16>
    %cst_8 = arith.constant dense<0.000000e+00> : vector<16x256xf32>
    %11 = tpu.matmul %9, %10, %cst_8 {dimension_numbers = #tpu.dot_dimension_numbers<[1], [0], [0], [1], [0, 0, 1, 1], [], []>} : vector<16x256xbf16>, vector<256x256xbf16>, vector<16x256xf32> -> vector<16x256xf32>
    %c0_9 = arith.constant 0 : index
    %c0_10 = arith.constant 0 : index
    %12 = vector.load %arg5[%c0_9, %c0_10] : memref<1x256xf32, #tpu.memory_space<vmem>>, vector<1x256xf32>
    %13 = vector.broadcast %12 : vector<1x256xf32> to vector<16x256xf32>
    %14 = arith.addf %11, %13 : vector<16x256xf32>
    %cst_11 = arith.constant 0.000000e+00 : f32
    %15 = vector.broadcast %cst_11 : f32 to vector<16x256xf32>
    %16 = arith.maximumf %14, %15 : vector<16x256xf32>
    %17 = arith.truncf %16 : vector<16x256xf32> to vector<16x256xbf16>
    %c0_12 = arith.constant 0 : index
    %c0_13 = arith.constant 0 : index
    %18 = vector.load %arg6[%c0_12, %c0_13] : memref<256x256xbf16, #tpu.memory_space<vmem>>, vector<256x256xbf16>
    %cst_14 = arith.constant dense<0.000000e+00> : vector<16x256xf32>
    %19 = tpu.matmul %17, %18, %cst_14 {dimension_numbers = #tpu.dot_dimension_numbers<[1], [0], [0], [1], [0, 0, 1, 1], [], []>} : vector<16x256xbf16>, vector<256x256xbf16>, vector<16x256xf32> -> vector<16x256xf32>
    %c0_15 = arith.constant 0 : index
    %c0_16 = arith.constant 0 : index
    %20 = vector.load %arg7[%c0_15, %c0_16] : memref<1x256xf32, #tpu.memory_space<vmem>>, vector<1x256xf32>
    %21 = vector.broadcast %20 : vector<1x256xf32> to vector<16x256xf32>
    %22 = arith.addf %19, %21 : vector<16x256xf32>
    %23 = math.tanh %22 : vector<16x256xf32>
    %24 = arith.truncf %23 : vector<16x256xf32> to vector<16x256xbf16>
    %c0_17 = arith.constant 0 : index
    %c0_18 = arith.constant 0 : index
    %25 = vector.load %arg8[%c0_17, %c0_18] : memref<256x3072xbf16, #tpu.memory_space<vmem>>, vector<256x256xbf16>
    %cst_19 = arith.constant dense<0.000000e+00> : vector<16x256xf32>
    %26 = tpu.matmul %24, %25, %cst_19 {dimension_numbers = #tpu.dot_dimension_numbers<[1], [0], [0], [1], [0, 0, 1, 1], [], []>} : vector<16x256xbf16>, vector<256x256xbf16>, vector<16x256xf32> -> vector<16x256xf32>
    %c0_20 = arith.constant 0 : index
    %c0_21 = arith.constant 0 : index
    %27 = vector.load %arg9[%c0_20, %c0_21] : memref<1x3072xf32, #tpu.memory_space<vmem>>, vector<1x256xf32>
    %28 = vector.broadcast %27 : vector<1x256xf32> to vector<16x256xf32>
    %29 = arith.addf %26, %28 : vector<16x256xf32>
    %cst_22 = arith.constant 0.000000e+00 : f32
    %30 = vector.broadcast %cst_22 : f32 to vector<16x256xf32>
    %31 = arith.maximumf %29, %30 : vector<16x256xf32>
    %32 = arith.truncf %31 : vector<16x256xf32> to vector<16x256xbf16>
    %c0_23 = arith.constant 0 : index
    %c0_24 = arith.constant 0 : index
    %33 = vector.load %arg11[%c0_23, %c0_24] : memref<16x3072xbf16, #tpu.memory_space<vmem>>, vector<16x256xbf16>
    tpu.vector_store %arg11[%c0_23, %c0_24], %32 {strides = array<i32>} : memref<16x3072xbf16, #tpu.memory_space<vmem>>, vector<16x256xbf16>,
    %c0_25 = arith.constant 0 : index
    %c0_26 = arith.constant 0 : index
    %34 = vector.load %arg1[%c0_25, %c0_26] : memref<16x3072xf32, #tpu.memory_space<vmem>>, vector<16x256xf32>
    %35 = arith.mulf %34, %31 : vector<16x256xf32>
    %c0_27 = arith.constant 0 : index
    %c0_28 = arith.constant 0 : index
    %36 = vector.load %arg10[%c0_27, %c0_28] : memref<16x3072xf32, #tpu.memory_space<vmem>>, vector<16x256xf32>
    tpu.vector_store %arg10[%c0_27, %c0_28], %35 {strides = array<i32>} : memref<16x3072xf32, #tpu.memory_space<vmem>>, vector<16x256xf32>,
    %c0_29 = arith.constant 0 : index
    %c256 = arith.constant 256 : index
    %37 = vector.load %arg8[%c0_29, %c256] : memref<256x3072xbf16, #tpu.memory_space<vmem>>, vector<256x256xbf16>
    %cst_30 = arith.constant dense<0.000000e+00> : vector<16x256xf32>
    %38 = tpu.matmul %24, %37, %cst_30 {dimension_numbers = #tpu.dot_dimension_numbers<[1], [0], [0], [1], [0, 0, 1, 1], [], []>} : vector<16x256xbf16>, vector<256x256xbf16>, vector<16x256xf32> -> vector<16x256xf32>
    %c0_31 = arith.constant 0 : index
    %c256_32 = arith.constant 256 : index
    %39 = vector.load %arg9[%c0_31, %c256_32] : memref<1x3072xf32, #tpu.memory_space<vmem>>, vector<1x256xf32>
    %40 = vector.broadcast %39 : vector<1x256xf32> to vector<16x256xf32>
    %41 = arith.addf %38, %40 : vector<16x256xf32>
    %cst_33 = arith.constant 0.000000e+00 : f32
    %42 = vector.broadcast %cst_33 : f32 to vector<16x256xf32>
    %43 = arith.maximumf %41, %42 : vector<16x256xf32>
    %44 = arith.truncf %43 : vector<16x256xf32> to vector<16x256xbf16>
    %c0_34 = arith.constant 0 : index
    %c256_35 = arith.constant 256 : index
    %45 = vector.load %arg11[%c0_34, %c256_35] : memref<16x3072xbf16, #tpu.memory_space<vmem>>, vector<16x256xbf16>
    tpu.vector_store %arg11[%c0_34, %c256_35], %44 {strides = array<i32>} : memref<16x3072xbf16, #tpu.memory_space<vmem>>, vector<16x256xbf16>,
    %c0_36 = arith.constant 0 : index
    %c256_37 = arith.constant 256 : index
    %46 = vector.load %arg1[%c0_36, %c256_37] : memref<16x3072xf32, #tpu.memory_space<vmem>>, vector<16x256xf32>
    %47 = arith.mulf %46, %43 : vector<16x256xf32>
    %c0_38 = arith.constant 0 : index
    %c256_39 = arith.constant 256 : index
    %48 = vector.load %arg10[%c0_38, %c256_39] : memref<16x3072xf32, #tpu.memory_space<vmem>>, vector<16x256xf32>
    tpu.vector_store %arg10[%c0_38, %c256_39], %47 {strides = array<i32>} : memref<16x3072xf32, #tpu.memory_space<vmem>>, vector<16x256xf32>,
    %c0_40 = arith.constant 0 : index
    %c512 = arith.constant 512 : index
    %49 = vector.load %arg8[%c0_40, %c512] : memref<256x3072xbf16, #tpu.memory_space<vmem>>, vector<256x256xbf16>
    %cst_41 = arith.constant dense<0.000000e+00> : vector<16x256xf32>
    %50 = tpu.matmul %24, %49, %cst_41 {dimension_numbers = #tpu.dot_dimension_numbers<[1], [0], [0], [1], [0, 0, 1, 1], [], []>} : vector<16x256xbf16>, vector<256x256xbf16>, vector<16x256xf32> -> vector<16x256xf32>
    %c0_42 = arith.constant 0 : index
    %c512_43 = arith.constant 512 : index
    %51 = vector.load %arg9[%c0_42, %c512_43] : memref<1x3072xf32, #tpu.memory_space<vmem>>, vector<1x256xf32>
    %52 = vector.broadcast %51 : vector<1x256xf32> to vector<16x256xf32>
    %53 = arith.addf %50, %52 : vector<16x256xf32>
    %cst_44 = arith.constant 0.000000e+00 : f32
    %54 = vector.broadcast %cst_44 : f32 to vector<16x256xf32>
    %55 = arith.maximumf %53, %54 : vector<16x256xf32>
    %56 = arith.truncf %55 : vector<16x256xf32> to vector<16x256xbf16>
    %c0_45 = arith.constant 0 : index
    %c512_46 = arith.constant 512 : index
    %57 = vector.load %arg11[%c0_45, %c512_46] : memref<16x3072xbf16, #tpu.memory_space<vmem>>, vector<16x256xbf16>
    tpu.vector_store %arg11[%c0_45, %c512_46], %56 {strides = array<i32>} : memref<16x3072xbf16, #tpu.memory_space<vmem>>, vector<16x256xbf16>,
    %c0_47 = arith.constant 0 : index
    %c512_48 = arith.constant 512 : index
    %58 = vector.load %arg1[%c0_47, %c512_48] : memref<16x3072xf32, #tpu.memory_space<vmem>>, vector<16x256xf32>
    %59 = arith.mulf %58, %55 : vector<16x256xf32>
    %c0_49 = arith.constant 0 : index
    %c512_50 = arith.constant 512 : index
    %60 = vector.load %arg10[%c0_49, %c512_50] : memref<16x3072xf32, #tpu.memory_space<vmem>>, vector<16x256xf32>
    tpu.vector_store %arg10[%c0_49, %c512_50], %59 {strides = array<i32>} : memref<16x3072xf32, #tpu.memory_space<vmem>>, vector<16x256xf32>,
    %c0_51 = arith.constant 0 : index
    %c768 = arith.constant 768 : index
    %61 = vector.load %arg8[%c0_51, %c768] : memref<256x3072xbf16, #tpu.memory_space<vmem>>, vector<256x256xbf16>
    %cst_52 = arith.constant dense<0.000000e+00> : vector<16x256xf32>
    %62 = tpu.matmul %24, %61, %cst_52 {dimension_numbers = #tpu.dot_dimension_numbers<[1], [0], [0], [1], [0, 0, 1, 1], [], []>} : vector<16x256xbf16>, vector<256x256xbf16>, vector<16x256xf32> -> vector<16x256xf32>
    %c0_53 = arith.constant 0 : index
    %c768_54 = arith.constant 768 : index
    %63 = vector.load %arg9[%c0_53, %c768_54] : memref<1x3072xf32, #tpu.memory_space<vmem>>, vector<1x256xf32>
    %64 = vector.broadcast %63 : vector<1x256xf32> to vector<16x256xf32>
    %65 = arith.addf %62, %64 : vector<16x256xf32>
    %cst_55 = arith.constant 0.000000e+00 : f32
    %66 = vector.broadcast %cst_55 : f32 to vector<16x256xf32>
    %67 = arith.maximumf %65, %66 : vector<16x256xf32>
    %68 = arith.truncf %67 : vector<16x256xf32> to vector<16x256xbf16>
    %c0_56 = arith.constant 0 : index
    %c768_57 = arith.constant 768 : index
    %69 = vector.load %arg11[%c0_56, %c768_57] : memref<16x3072xbf16, #tpu.memory_space<vmem>>, vector<16x256xbf16>
    tpu.vector_store %arg11[%c0_56, %c768_57], %68 {strides = array<i32>} : memref<16x3072xbf16, #tpu.memory_space<vmem>>, vector<16x256xbf16>,
    %c0_58 = arith.constant 0 : index
    %c768_59 = arith.constant 768 : index
    %70 = vector.load %arg1[%c0_58, %c768_59] : memref<16x3072xf32, #tpu.memory_space<vmem>>, vector<16x256xf32>
    %71 = arith.mulf %70, %67 : vector<16x256xf32>
    %c0_60 = arith.constant 0 : index
    %c768_61 = arith.constant 768 : index
    %72 = vector.load %arg10[%c0_60, %c768_61] : memref<16x3072xf32, #tpu.memory_space<vmem>>, vector<16x256xf32>
    tpu.vector_store %arg10[%c0_60, %c768_61], %71 {strides = array<i32>} : memref<16x3072xf32, #tpu.memory_space<vmem>>, vector<16x256xf32>,
    %c0_62 = arith.constant 0 : index
    %c1024 = arith.constant 1024 : index
    %73 = vector.load %arg8[%c0_62, %c1024] : memref<256x3072xbf16, #tpu.memory_space<vmem>>, vector<256x256xbf16>
    %cst_63 = arith.constant dense<0.000000e+00> : vector<16x256xf32>
    %74 = tpu.matmul %24, %73, %cst_63 {dimension_numbers = #tpu.dot_dimension_numbers<[1], [0], [0], [1], [0, 0, 1, 1], [], []>} : vector<16x256xbf16>, vector<256x256xbf16>, vector<16x256xf32> -> vector<16x256xf32>
    %c0_64 = arith.constant 0 : index
    %c1024_65 = arith.constant 1024 : index
    %75 = vector.load %arg9[%c0_64, %c1024_65] : memref<1x3072xf32, #tpu.memory_space<vmem>>, vector<1x256xf32>
    %76 = vector.broadcast %75 : vector<1x256xf32> to vector<16x256xf32>
    %77 = arith.addf %74, %76 : vector<16x256xf32>
    %cst_66 = arith.constant 0.000000e+00 : f32
    %78 = vector.broadcast %cst_66 : f32 to vector<16x256xf32>
    %79 = arith.maximumf %77, %78 : vector<16x256xf32>
    %80 = arith.truncf %79 : vector<16x256xf32> to vector<16x256xbf16>
    %c0_67 = arith.constant 0 : index
    %c1024_68 = arith.constant 1024 : index
    %81 = vector.load %arg11[%c0_67, %c1024_68] : memref<16x3072xbf16, #tpu.memory_space<vmem>>, vector<16x256xbf16>
    tpu.vector_store %arg11[%c0_67, %c1024_68], %80 {strides = array<i32>} : memref<16x3072xbf16, #tpu.memory_space<vmem>>, vector<16x256xbf16>,
    %c0_69 = arith.constant 0 : index
    %c1024_70 = arith.constant 1024 : index
    %82 = vector.load %arg1[%c0_69, %c1024_70] : memref<16x3072xf32, #tpu.memory_space<vmem>>, vector<16x256xf32>
    %83 = arith.mulf %82, %79 : vector<16x256xf32>
    %c0_71 = arith.constant 0 : index
    %c1024_72 = arith.constant 1024 : index
    %84 = vector.load %arg10[%c0_71, %c1024_72] : memref<16x3072xf32, #tpu.memory_space<vmem>>, vector<16x256xf32>
    tpu.vector_store %arg10[%c0_71, %c1024_72], %83 {strides = array<i32>} : memref<16x3072xf32, #tpu.memory_space<vmem>>, vector<16x256xf32>,
    %c0_73 = arith.constant 0 : index
    %c1280 = arith.constant 1280 : index
    %85 = vector.load %arg8[%c0_73, %c1280] : memref<256x3072xbf16, #tpu.memory_space<vmem>>, vector<256x256xbf16>
    %cst_74 = arith.constant dense<0.000000e+00> : vector<16x256xf32>
    %86 = tpu.matmul %24, %85, %cst_74 {dimension_numbers = #tpu.dot_dimension_numbers<[1], [0], [0], [1], [0, 0, 1, 1], [], []>} : vector<16x256xbf16>, vector<256x256xbf16>, vector<16x256xf32> -> vector<16x256xf32>
    %c0_75 = arith.constant 0 : index
    %c1280_76 = arith.constant 1280 : index
    %87 = vector.load %arg9[%c0_75, %c1280_76] : memref<1x3072xf32, #tpu.memory_space<vmem>>, vector<1x256xf32>
    %88 = vector.broadcast %87 : vector<1x256xf32> to vector<16x256xf32>
    %89 = arith.addf %86, %88 : vector<16x256xf32>
    %cst_77 = arith.constant 0.000000e+00 : f32
    %90 = vector.broadcast %cst_77 : f32 to vector<16x256xf32>
    %91 = arith.maximumf %89, %90 : vector<16x256xf32>
    %92 = arith.truncf %91 : vector<16x256xf32> to vector<16x256xbf16>
    %c0_78 = arith.constant 0 : index
    %c1280_79 = arith.constant 1280 : index
    %93 = vector.load %arg11[%c0_78, %c1280_79] : memref<16x3072xbf16, #tpu.memory_space<vmem>>, vector<16x256xbf16>
    tpu.vector_store %arg11[%c0_78, %c1280_79], %92 {strides = array<i32>} : memref<16x3072xbf16, #tpu.memory_space<vmem>>, vector<16x256xbf16>,
    %c0_80 = arith.constant 0 : index
    %c1280_81 = arith.constant 1280 : index
    %94 = vector.load %arg1[%c0_80, %c1280_81] : memref<16x3072xf32, #tpu.memory_space<vmem>>, vector<16x256xf32>
    %95 = arith.mulf %94, %91 : vector<16x256xf32>
    %c0_82 = arith.constant 0 : index
    %c1280_83 = arith.constant 1280 : index
    %96 = vector.load %arg10[%c0_82, %c1280_83] : memref<16x3072xf32, #tpu.memory_space<vmem>>, vector<16x256xf32>
    tpu.vector_store %arg10[%c0_82, %c1280_83], %95 {strides = array<i32>} : memref<16x3072xf32, #tpu.memory_space<vmem>>, vector<16x256xf32>,
    %c0_84 = arith.constant 0 : index
    %c1536 = arith.constant 1536 : index
    %97 = vector.load %arg8[%c0_84, %c1536] : memref<256x3072xbf16, #tpu.memory_space<vmem>>, vector<256x256xbf16>
    %cst_85 = arith.constant dense<0.000000e+00> : vector<16x256xf32>
    %98 = tpu.matmul %24, %97, %cst_85 {dimension_numbers = #tpu.dot_dimension_numbers<[1], [0], [0], [1], [0, 0, 1, 1], [], []>} : vector<16x256xbf16>, vector<256x256xbf16>, vector<16x256xf32> -> vector<16x256xf32>
    %c0_86 = arith.constant 0 : index
    %c1536_87 = arith.constant 1536 : index
    %99 = vector.load %arg9[%c0_86, %c1536_87] : memref<1x3072xf32, #tpu.memory_space<vmem>>, vector<1x256xf32>
    %100 = vector.broadcast %99 : vector<1x256xf32> to vector<16x256xf32>
    %101 = arith.addf %98, %100 : vector<16x256xf32>
    %cst_88 = arith.constant 0.000000e+00 : f32
    %102 = vector.broadcast %cst_88 : f32 to vector<16x256xf32>
    %103 = arith.maximumf %101, %102 : vector<16x256xf32>
    %104 = arith.truncf %103 : vector<16x256xf32> to vector<16x256xbf16>
    %c0_89 = arith.constant 0 : index
    %c1536_90 = arith.constant 1536 : index
    %105 = vector.load %arg11[%c0_89, %c1536_90] : memref<16x3072xbf16, #tpu.memory_space<vmem>>, vector<16x256xbf16>
    tpu.vector_store %arg11[%c0_89, %c1536_90], %104 {strides = array<i32>} : memref<16x3072xbf16, #tpu.memory_space<vmem>>, vector<16x256xbf16>,
    %c0_91 = arith.constant 0 : index
    %c1536_92 = arith.constant 1536 : index
    %106 = vector.load %arg1[%c0_91, %c1536_92] : memref<16x3072xf32, #tpu.memory_space<vmem>>, vector<16x256xf32>
    %107 = arith.mulf %106, %103 : vector<16x256xf32>
    %c0_93 = arith.constant 0 : index
    %c1536_94 = arith.constant 1536 : index
    %108 = vector.load %arg10[%c0_93, %c1536_94] : memref<16x3072xf32, #tpu.memory_space<vmem>>, vector<16x256xf32>
    tpu.vector_store %arg10[%c0_93, %c1536_94], %107 {strides = array<i32>} : memref<16x3072xf32, #tpu.memory_space<vmem>>, vector<16x256xf32>,
    %c0_95 = arith.constant 0 : index
    %c1792 = arith.constant 1792 : index
    %109 = vector.load %arg8[%c0_95, %c1792] : memref<256x3072xbf16, #tpu.memory_space<vmem>>, vector<256x256xbf16>
    %cst_96 = arith.constant dense<0.000000e+00> : vector<16x256xf32>
    %110 = tpu.matmul %24, %109, %cst_96 {dimension_numbers = #tpu.dot_dimension_numbers<[1], [0], [0], [1], [0, 0, 1, 1], [], []>} : vector<16x256xbf16>, vector<256x256xbf16>, vector<16x256xf32> -> vector<16x256xf32>
    %c0_97 = arith.constant 0 : index
    %c1792_98 = arith.constant 1792 : index
    %111 = vector.load %arg9[%c0_97, %c1792_98] : memref<1x3072xf32, #tpu.memory_space<vmem>>, vector<1x256xf32>
    %112 = vector.broadcast %111 : vector<1x256xf32> to vector<16x256xf32>
    %113 = arith.addf %110, %112 : vector<16x256xf32>
    %cst_99 = arith.constant 0.000000e+00 : f32
    %114 = vector.broadcast %cst_99 : f32 to vector<16x256xf32>
    %115 = arith.maximumf %113, %114 : vector<16x256xf32>
    %116 = arith.truncf %115 : vector<16x256xf32> to vector<16x256xbf16>
    %c0_100 = arith.constant 0 : index
    %c1792_101 = arith.constant 1792 : index
    %117 = vector.load %arg11[%c0_100, %c1792_101] : memref<16x3072xbf16, #tpu.memory_space<vmem>>, vector<16x256xbf16>
    tpu.vector_store %arg11[%c0_100, %c1792_101], %116 {strides = array<i32>} : memref<16x3072xbf16, #tpu.memory_space<vmem>>, vector<16x256xbf16>,
    %c0_102 = arith.constant 0 : index
    %c1792_103 = arith.constant 1792 : index
    %118 = vector.load %arg1[%c0_102, %c1792_103] : memref<16x3072xf32, #tpu.memory_space<vmem>>, vector<16x256xf32>
    %119 = arith.mulf %118, %115 : vector<16x256xf32>
    %c0_104 = arith.constant 0 : index
    %c1792_105 = arith.constant 1792 : index
    %120 = vector.load %arg10[%c0_104, %c1792_105] : memref<16x3072xf32, #tpu.memory_space<vmem>>, vector<16x256xf32>
    tpu.vector_store %arg10[%c0_104, %c1792_105], %119 {strides = array<i32>} : memref<16x3072xf32, #tpu.memory_space<vmem>>, vector<16x256xf32>,
    %c0_106 = arith.constant 0 : index
    %c2048 = arith.constant 2048 : index
    %121 = vector.load %arg8[%c0_106, %c2048] : memref<256x3072xbf16, #tpu.memory_space<vmem>>, vector<256x256xbf16>
    %cst_107 = arith.constant dense<0.000000e+00> : vector<16x256xf32>
    %122 = tpu.matmul %24, %121, %cst_107 {dimension_numbers = #tpu.dot_dimension_numbers<[1], [0], [0], [1], [0, 0, 1, 1], [], []>} : vector<16x256xbf16>, vector<256x256xbf16>, vector<16x256xf32> -> vector<16x256xf32>
    %c0_108 = arith.constant 0 : index
    %c2048_109 = arith.constant 2048 : index
    %123 = vector.load %arg9[%c0_108, %c2048_109] : memref<1x3072xf32, #tpu.memory_space<vmem>>, vector<1x256xf32>
    %124 = vector.broadcast %123 : vector<1x256xf32> to vector<16x256xf32>
    %125 = arith.addf %122, %124 : vector<16x256xf32>
    %cst_110 = arith.constant 0.000000e+00 : f32
    %126 = vector.broadcast %cst_110 : f32 to vector<16x256xf32>
    %127 = arith.maximumf %125, %126 : vector<16x256xf32>
    %128 = arith.truncf %127 : vector<16x256xf32> to vector<16x256xbf16>
    %c0_111 = arith.constant 0 : index
    %c2048_112 = arith.constant 2048 : index
    %129 = vector.load %arg11[%c0_111, %c2048_112] : memref<16x3072xbf16, #tpu.memory_space<vmem>>, vector<16x256xbf16>
    tpu.vector_store %arg11[%c0_111, %c2048_112], %128 {strides = array<i32>} : memref<16x3072xbf16, #tpu.memory_space<vmem>>, vector<16x256xbf16>,
    %c0_113 = arith.constant 0 : index
    %c2048_114 = arith.constant 2048 : index
    %130 = vector.load %arg1[%c0_113, %c2048_114] : memref<16x3072xf32, #tpu.memory_space<vmem>>, vector<16x256xf32>
    %131 = arith.mulf %130, %127 : vector<16x256xf32>
    %c0_115 = arith.constant 0 : index
    %c2048_116 = arith.constant 2048 : index
    %132 = vector.load %arg10[%c0_115, %c2048_116] : memref<16x3072xf32, #tpu.memory_space<vmem>>, vector<16x256xf32>
    tpu.vector_store %arg10[%c0_115, %c2048_116], %131 {strides = array<i32>} : memref<16x3072xf32, #tpu.memory_space<vmem>>, vector<16x256xf32>,
    %c0_117 = arith.constant 0 : index
    %c2304 = arith.constant 2304 : index
    %133 = vector.load %arg8[%c0_117, %c2304] : memref<256x3072xbf16, #tpu.memory_space<vmem>>, vector<256x256xbf16>
    %cst_118 = arith.constant dense<0.000000e+00> : vector<16x256xf32>
    %134 = tpu.matmul %24, %133, %cst_118 {dimension_numbers = #tpu.dot_dimension_numbers<[1], [0], [0], [1], [0, 0, 1, 1], [], []>} : vector<16x256xbf16>, vector<256x256xbf16>, vector<16x256xf32> -> vector<16x256xf32>
    %c0_119 = arith.constant 0 : index
    %c2304_120 = arith.constant 2304 : index
    %135 = vector.load %arg9[%c0_119, %c2304_120] : memref<1x3072xf32, #tpu.memory_space<vmem>>, vector<1x256xf32>
    %136 = vector.broadcast %135 : vector<1x256xf32> to vector<16x256xf32>
    %137 = arith.addf %134, %136 : vector<16x256xf32>
    %cst_121 = arith.constant 0.000000e+00 : f32
    %138 = vector.broadcast %cst_121 : f32 to vector<16x256xf32>
    %139 = arith.maximumf %137, %138 : vector<16x256xf32>
    %140 = arith.truncf %139 : vector<16x256xf32> to vector<16x256xbf16>
    %c0_122 = arith.constant 0 : index
    %c2304_123 = arith.constant 2304 : index
    %141 = vector.load %arg11[%c0_122, %c2304_123] : memref<16x3072xbf16, #tpu.memory_space<vmem>>, vector<16x256xbf16>
    tpu.vector_store %arg11[%c0_122, %c2304_123], %140 {strides = array<i32>} : memref<16x3072xbf16, #tpu.memory_space<vmem>>, vector<16x256xbf16>,
    %c0_124 = arith.constant 0 : index
    %c2304_125 = arith.constant 2304 : index
    %142 = vector.load %arg1[%c0_124, %c2304_125] : memref<16x3072xf32, #tpu.memory_space<vmem>>, vector<16x256xf32>
    %143 = arith.mulf %142, %139 : vector<16x256xf32>
    %c0_126 = arith.constant 0 : index
    %c2304_127 = arith.constant 2304 : index
    %144 = vector.load %arg10[%c0_126, %c2304_127] : memref<16x3072xf32, #tpu.memory_space<vmem>>, vector<16x256xf32>
    tpu.vector_store %arg10[%c0_126, %c2304_127], %143 {strides = array<i32>} : memref<16x3072xf32, #tpu.memory_space<vmem>>, vector<16x256xf32>,
    %c0_128 = arith.constant 0 : index
    %c2560 = arith.constant 2560 : index
    %145 = vector.load %arg8[%c0_128, %c2560] : memref<256x3072xbf16, #tpu.memory_space<vmem>>, vector<256x256xbf16>
    %cst_129 = arith.constant dense<0.000000e+00> : vector<16x256xf32>
    %146 = tpu.matmul %24, %145, %cst_129 {dimension_numbers = #tpu.dot_dimension_numbers<[1], [0], [0], [1], [0, 0, 1, 1], [], []>} : vector<16x256xbf16>, vector<256x256xbf16>, vector<16x256xf32> -> vector<16x256xf32>
    %c0_130 = arith.constant 0 : index
    %c2560_131 = arith.constant 2560 : index
    %147 = vector.load %arg9[%c0_130, %c2560_131] : memref<1x3072xf32, #tpu.memory_space<vmem>>, vector<1x256xf32>
    %148 = vector.broadcast %147 : vector<1x256xf32> to vector<16x256xf32>
    %149 = arith.addf %146, %148 : vector<16x256xf32>
    %cst_132 = arith.constant 0.000000e+00 : f32
    %150 = vector.broadcast %cst_132 : f32 to vector<16x256xf32>
    %151 = arith.maximumf %149, %150 : vector<16x256xf32>
    %152 = arith.truncf %151 : vector<16x256xf32> to vector<16x256xbf16>
    %c0_133 = arith.constant 0 : index
    %c2560_134 = arith.constant 2560 : index
    %153 = vector.load %arg11[%c0_133, %c2560_134] : memref<16x3072xbf16, #tpu.memory_space<vmem>>, vector<16x256xbf16>
    tpu.vector_store %arg11[%c0_133, %c2560_134], %152 {strides = array<i32>} : memref<16x3072xbf16, #tpu.memory_space<vmem>>, vector<16x256xbf16>,
    %c0_135 = arith.constant 0 : index
    %c2560_136 = arith.constant 2560 : index
    %154 = vector.load %arg1[%c0_135, %c2560_136] : memref<16x3072xf32, #tpu.memory_space<vmem>>, vector<16x256xf32>
    %155 = arith.mulf %154, %151 : vector<16x256xf32>
    %c0_137 = arith.constant 0 : index
    %c2560_138 = arith.constant 2560 : index
    %156 = vector.load %arg10[%c0_137, %c2560_138] : memref<16x3072xf32, #tpu.memory_space<vmem>>, vector<16x256xf32>
    tpu.vector_store %arg10[%c0_137, %c2560_138], %155 {strides = array<i32>} : memref<16x3072xf32, #tpu.memory_space<vmem>>, vector<16x256xf32>,
    %c0_139 = arith.constant 0 : index
    %c2816 = arith.constant 2816 : index
    %157 = vector.load %arg8[%c0_139, %c2816] : memref<256x3072xbf16, #tpu.memory_space<vmem>>, vector<256x256xbf16>
    %cst_140 = arith.constant dense<0.000000e+00> : vector<16x256xf32>
    %158 = tpu.matmul %24, %157, %cst_140 {dimension_numbers = #tpu.dot_dimension_numbers<[1], [0], [0], [1], [0, 0, 1, 1], [], []>} : vector<16x256xbf16>, vector<256x256xbf16>, vector<16x256xf32> -> vector<16x256xf32>
    %c0_141 = arith.constant 0 : index
    %c2816_142 = arith.constant 2816 : index
    %159 = vector.load %arg9[%c0_141, %c2816_142] : memref<1x3072xf32, #tpu.memory_space<vmem>>, vector<1x256xf32>
    %160 = vector.broadcast %159 : vector<1x256xf32> to vector<16x256xf32>
    %161 = arith.addf %158, %160 : vector<16x256xf32>
    %cst_143 = arith.constant 0.000000e+00 : f32
    %162 = vector.broadcast %cst_143 : f32 to vector<16x256xf32>
    %163 = arith.maximumf %161, %162 : vector<16x256xf32>
    %164 = arith.truncf %163 : vector<16x256xf32> to vector<16x256xbf16>
    %c0_144 = arith.constant 0 : index
    %c2816_145 = arith.constant 2816 : index
    %165 = vector.load %arg11[%c0_144, %c2816_145] : memref<16x3072xbf16, #tpu.memory_space<vmem>>, vector<16x256xbf16>
    tpu.vector_store %arg11[%c0_144, %c2816_145], %164 {strides = array<i32>} : memref<16x3072xbf16, #tpu.memory_space<vmem>>, vector<16x256xbf16>,
    %c0_146 = arith.constant 0 : index
    %c2816_147 = arith.constant 2816 : index
    %166 = vector.load %arg1[%c0_146, %c2816_147] : memref<16x3072xf32, #tpu.memory_space<vmem>>, vector<16x256xf32>
    %167 = arith.mulf %166, %163 : vector<16x256xf32>
    %c0_148 = arith.constant 0 : index
    %c2816_149 = arith.constant 2816 : index
    %168 = vector.load %arg10[%c0_148, %c2816_149] : memref<16x3072xf32, #tpu.memory_space<vmem>>, vector<16x256xf32>
    tpu.vector_store %arg10[%c0_148, %c2816_149], %167 {strides = array<i32>} : memref<16x3072xf32, #tpu.memory_space<vmem>>, vector<16x256xf32>,
    return
  }
  func.func @transform_0(%arg0: i32) -> (i32, i32) {
    %c0_i32 = arith.constant 0 : i32
    %c0_i32_0 = arith.constant 0 : i32
    return %arg0, %c0_i32 : i32, i32
  }
  func.func @transform_1(%arg0: i32) -> (i32, i32) {
    %c0_i32 = arith.constant 0 : i32
    %c0_i32_0 = arith.constant 0 : i32
    %c0_i32_1 = arith.constant 0 : i32
    return %c0_i32, %c0_i32_0 : i32, i32
  }
  func.func @transform_2(%arg0: i32) -> (i32, i32) {
    %c0_i32 = arith.constant 0 : i32
    %c0_i32_0 = arith.constant 0 : i32
    %c0_i32_1 = arith.constant 0 : i32
    return %c0_i32, %c0_i32_0 : i32, i32
  }
  func.func @transform_3(%arg0: i32) -> (i32, i32) {
    %c0_i32 = arith.constant 0 : i32
    %c0_i32_0 = arith.constant 0 : i32
    %c0_i32_1 = arith.constant 0 : i32
    return %c0_i32, %c0_i32_0 : i32, i32
  }
  func.func @transform_4(%arg0: i32) -> (i32, i32) {
    %c0_i32 = arith.constant 0 : i32
    %c0_i32_0 = arith.constant 0 : i32
    %c0_i32_1 = arith.constant 0 : i32
    return %c0_i32, %c0_i32_0 : i32, i32
  }
  func.func @transform_5(%arg0: i32) -> (i32, i32) {
    %c0_i32 = arith.constant 0 : i32
    %c0_i32_0 = arith.constant 0 : i32
    %c0_i32_1 = arith.constant 0 : i32
    return %c0_i32, %c0_i32_0 : i32, i32
  }
  func.func @transform_6(%arg0: i32) -> (i32, i32) {
    %c0_i32 = arith.constant 0 : i32
    %c0_i32_0 = arith.constant 0 : i32
    %c0_i32_1 = arith.constant 0 : i32
    return %c0_i32, %c0_i32_0 : i32, i32
  }
  func.func @transform_7(%arg0: i32) -> (i32, i32) {
    %c0_i32 = arith.constant 0 : i32
    %c0_i32_0 = arith.constant 0 : i32
    %c0_i32_1 = arith.constant 0 : i32
    return %c0_i32, %c0_i32_0 : i32, i32
  }
  func.func @transform_8(%arg0: i32) -> (i32, i32) {
    %c0_i32 = arith.constant 0 : i32
    %c0_i32_0 = arith.constant 0 : i32
    %c0_i32_1 = arith.constant 0 : i32
    return %c0_i32, %c0_i32_0 : i32, i32
  }
  func.func @transform_9(%arg0: i32) -> (i32, i32) {
    %c0_i32 = arith.constant 0 : i32
    %c0_i32_0 = arith.constant 0 : i32
    return %arg0, %c0_i32 : i32, i32
  }
  func.func @transform_10(%arg0: i32) -> (i32, i32) {
    %c0_i32 = arith.constant 0 : i32
    %c0_i32_0 = arith.constant 0 : i32
    return %arg0, %c0_i32 : i32, i32
  }
}

</mosaic_0001>

<bundles_post_ra>
// kernel: dense_explainer_cifar.1
= control target key start
LH: loop header
LB: loop body
LE: loop exit
PB: predicated region body
PF: predicated region fallthrough
CT: control target
= control target key end

     0   :  { %16 = vsyncpa [#allocation3], 0  ;;  %s9352_s0 = inlined_call_operand.vmem [shape: f32[16,3072], index: 0, kind: input, shape index: {}]   ;;  %s9353_s1 = inlined_call_operand.hbm [shape: bf16[3072,256], index: 1, kind: input, shape index: {}]   ;;  %s9354_s2 = inlined_call_operand.hbm [shape: f32[1,256], index: 2, kind: input, shape index: {}]   ;;  %s9355_s3 = inlined_call_operand.hbm [shape: bf16[256,256], index: 3, kind: input, shape index: {}]   ;;  %s9356_s4 = inlined_call_operand.hbm [shape: f32[1,256], index: 4, kind: input, shape index: {}]   ;;  %s9357_s5 = inlined_call_operand.hbm [shape: bf16[256,256], index: 5, kind: input, shape index: {}]   ;;  %s9358_s6 = inlined_call_operand.hbm [shape: f32[1,256], index: 6, kind: input, shape index: {}]   ;;  %s9359_s7 = inlined_call_operand.hbm [shape: bf16[256,3072], index: 7, kind: input, shape index: {}]   ;;  %s9360_s8 = inlined_call_operand.hbm [shape: f32[1,3072], index: 8, kind: input, shape index: {}]   ;;  %s9361_s9 = inlined_call_operand.vmem [shape: f32[16,3072], index: 9, kind: output, shape index: {0}]   ;;  %s9362_s10 = inlined_call_operand.hbm [shape: bf16[16,3072], index: 10, kind: output, shape index: {1}]  }
   0x1   :  { %17 = vsyncpa [#allocation6], 0 }
   0x2   :  { %18 = vsyncpa [#allocation9], 0 }
   0x3   :  { %19 = vsyncpa [#allocation12], 0 }
   0x4   :  { %20 = vsyncpa [#allocation15], 0 }
   0x5   :  { %21 = vsyncpa [#allocation4], 0  ;;  %s8666_s13 = smov [#allocation5]   ;;  %s8667_s15 = smov [#allocation8]  }
   0x6   :  { %s42_s14 = sshll.u32 %s8666_s13, 4  ;;  %s64_s16 = sshll.u32 %s8667_s15, 4  ;;  %s43_s14 = int_to_ptr.vmem [resolvable:$true] %s42_s14  ;;  %s65_s16 = int_to_ptr.vmem [resolvable:$true] %s64_s16 }
   0x7   :  { %s8482_s17 = scalar_lea.vmem %s43_s14, 32  ;;  %p8487_p1 = scmp.lt.s32.totalorder %s43_s14, %s43_s14 }
   0x8   :  { %p8483_p0 = scmp.ne.s32.totalorder %s43_s14, %s8482_s17  ;;  %p8488_p2 = scmp.lt.s32.totalorder %s8482_s17, %s8482_s17 }
   0xa   :  { %p8489_p3 = por %p8488_p2, %p8487_p1 }
   0xc   :  { %p8490_p4 = pnand %p8489_p3, %p8483_p0 }
   0xe   :  { %8493 = shalt.err (!%p8490_p4)
}
   0xf   :  { %45 = dma.hbm_to_vmem [thread:$0]  %s9354_s2, 32, %s43_s14, [#allocation6]  }
  0x10   :  { %s8502_s20 = scalar_lea.vmem %s65_s16, 32  ;;  %p8507_p6 = scmp.lt.s32.totalorder %s65_s16, %s65_s16 }
  0x11   :  { %p8503_p5 = scmp.ne.s32.totalorder %s65_s16, %s8502_s20  ;;  %p8508_p7 = scmp.lt.s32.totalorder %s8502_s20, %s8502_s20 }
  0x13   :  { %p8509_p8 = por %p8508_p7, %p8507_p6 }
  0x15   :  { %p8510_p9 = pnand %p8509_p8, %p8503_p5 }
  0x17   :  { %8513 = shalt.err (!%p8510_p9)
}
  0x18   :  { %67 = dma.hbm_to_vmem [thread:$0]  %s9356_s4, 32, %s65_s16, [#allocation9]  }
  0x19   :  { %s8668_s23 = smov [#allocation11]   ;;  %s8669_s25 = smov [#allocation2]  }
  0x1a   :  { %s86_s24 = sshll.u32 %s8668_s23, 4  ;;  %s29_s26 = sshll.u32 %s8669_s25, 4  ;;  %s87_s24 = int_to_ptr.vmem [resolvable:$true] %s86_s24  ;;  %s30_s26 = int_to_ptr.vmem [resolvable:$true] %s29_s26 }
  0x1b   :  { %s8522_s27 = scalar_lea.vmem %s87_s24, 32  ;;  %p8527_p11 = scmp.lt.s32.totalorder %s87_s24, %s87_s24 }
  0x1c   :  { %p8523_p10 = scmp.ne.s32.totalorder %s87_s24, %s8522_s27  ;;  %p8528_p12 = scmp.lt.s32.totalorder %s8522_s27, %s8522_s27 }
  0x1e   :  { %p8529_p13 = por %p8528_p12, %p8527_p11 }
  0x20   :  { %p8530_p0 = pnand %p8529_p13, %p8523_p10 }
  0x22   :  { %8533 = shalt.err (!%p8530_p0)
}
  0x23   :  { %89 = dma.hbm_to_vmem [thread:$0]  %s9358_s6, 32, %s87_s24, [#allocation12]  }
  0x24   :  { %s8542_s29 = scalar_lea.vmem %s30_s26, 49152  ;;  %p8547_p2 = scmp.lt.s32.totalorder %s30_s26, %s30_s26 }
  0x25   :  { %p8543_p1 = scmp.ne.s32.totalorder %s30_s26, %s8542_s29  ;;  %p8548_p3 = scmp.lt.s32.totalorder %s8542_s29, %s8542_s29 }
  0x27   :  { %p8549_p4 = por %p8548_p3, %p8547_p2 }
  0x29   :  { %p8550_p5 = pnand %p8549_p4, %p8543_p1 }
  0x2b   :  { %8553 = shalt.err (!%p8550_p5)
}
  0x2c   :  { %s8670_s4 = smov 128   ;;  %s8671_s30 = smov 8  }
  0x2d   :  { %35 = dma.hbm_to_vmem [thread:$0]  %s9353_s1, 49152, %s30_s26, [#allocation3], %s8670_s4, %s8670_s4, %s8671_s30  }
  0x2e   :  { %s8672_s13 = smov [#allocation7]   ;;  %s8673_s15 = smov [#allocation10]  }
  0x2f   :  { %s51_s14 = sshll.u32 %s8672_s13, 4  ;;  %s73_s16 = sshll.u32 %s8673_s15, 4  ;;  %s52_s14 = int_to_ptr.vmem [resolvable:$true] %s51_s14  ;;  %s74_s16 = int_to_ptr.vmem [resolvable:$true] %s73_s16 }
  0x30   :  { %s8562_s6 = scalar_lea.vmem %s52_s14, 4096  ;;  %p8567_p7 = scmp.lt.s32.totalorder %s52_s14, %s52_s14 }
  0x31   :  { %p8563_p6 = scmp.ne.s32.totalorder %s52_s14, %s8562_s6  ;;  %p8568_p8 = scmp.lt.s32.totalorder %s8562_s6, %s8562_s6 }
  0x33   :  { %p8569_p9 = por %p8568_p8, %p8567_p7 }
  0x35   :  { %p8570_p10 = pnand %p8569_p9, %p8563_p6 }
  0x37   :  { %8573 = shalt.err (!%p8570_p10)
}
  0x38   :  { %57 = dma.hbm_to_vmem [thread:$0]  %s9355_s3, 4096, %s52_s14, [#allocation6], %s8670_s4, %s8670_s4, %s8671_s30  }
  0x39   :  { %s8582_s19 = scalar_lea.vmem %s74_s16, 4096  ;;  %p8587_p12 = scmp.lt.s32.totalorder %s74_s16, %s74_s16 }
  0x3a   :  { %p8583_p11 = scmp.ne.s32.totalorder %s74_s16, %s8582_s19  ;;  %p8588_p13 = scmp.lt.s32.totalorder %s8582_s19, %s8582_s19 }
  0x3c   :  { %p8589_p0 = por %p8588_p13, %p8587_p12 }
  0x3e   :  { %p8590_p1 = pnand %p8589_p0, %p8583_p11 }
  0x40   :  { %8593 = shalt.err (!%p8590_p1)
}
  0x41   :  { %79 = dma.hbm_to_vmem [thread:$0]  %s9357_s5, 4096, %s74_s16, [#allocation9], %s8670_s4, %s8670_s4, %s8671_s30  }
  0x42   :  { %s8674_s21 = smov [#allocation13]  }
  0x43   :  { %s95_s22 = sshll.u32 %s8674_s21, 4  ;;  %s96_s22 = int_to_ptr.vmem [resolvable:$true] %s95_s22 }
  0x44   :  { %s8602_s23 = scalar_lea.vmem %s96_s22, 49152  ;;  %p8607_p3 = scmp.lt.s32.totalorder %s96_s22, %s96_s22 }
  0x45   :  { %p8603_p2 = scmp.ne.s32.totalorder %s96_s22, %s8602_s23  ;;  %p8608_p4 = scmp.lt.s32.totalorder %s8602_s23, %s8602_s23 }
  0x47   :  { %p8609_p5 = por %p8608_p4, %p8607_p3 }
  0x49   :  { %p8610_p6 = pnand %p8609_p5, %p8603_p2 }
  0x4b   :  { %8613 = shalt.err (!%p8610_p6)
}
  0x4c   :  { %s8675_s3 = smov 1536   ;;  %s8676_s24 = smov 96  }
  0x4d   :  { %101 = dma.hbm_to_vmem [thread:$0]  %s9359_s7, 49152, %s96_s22, [#allocation12], %s8675_s3, %s8675_s3, %s8676_s24  }
  0x4e   :  { %s8677_s5 = smov [#allocation14]  }
  0x4f   :  { %s108_s27 = sshll.u32 %s8677_s5, 4  ;;  %s109_s27 = int_to_ptr.vmem [resolvable:$true] %s108_s27 }
  0x50   :  { %s8622_s2 = scalar_lea.vmem %s109_s27, 384  ;;  %p8627_p8 = scmp.lt.s32.totalorder %s109_s27, %s109_s27 }
  0x51   :  { %p8623_p7 = scmp.ne.s32.totalorder %s109_s27, %s8622_s2  ;;  %p8628_p9 = scmp.lt.s32.totalorder %s8622_s2, %s8622_s2 }
  0x53   :  { %p8629_p10 = por %p8628_p9, %p8627_p8 }
  0x55   :  { %p8630_p11 = pnand %p8629_p10, %p8623_p7 }
  0x57   :  { %8633 = shalt.err (!%p8630_p11)
}
  0x58   :  { %111 = dma.hbm_to_vmem [thread:$0]  %s9360_s8, 384, %s109_s27, [#allocation15]  }
  0x59   :  { %8654 = dma.done.wait [#allocation3], 49152  }
  0x5a   :  { %8655 = vsyncadd [#allocation3], 4294918144 }
  0x5b   :  { %8656 = dma.done.wait [#allocation6], 4128  }
  0x5c   :  { %8657 = vsyncadd [#allocation6], 4294963168 }
  0x5d   :  { %8658 = dma.done.wait [#allocation9], 4128  }
  0x5e   :  { %8659 = vsyncadd [#allocation9], 4294963168 }
  0x5f   :  { %8660 = dma.done.wait [#allocation12], 49184  }
  0x60   :  { %8661 = vsyncadd [#allocation12], 4294918112 }
  0x61   :  { %8662 = dma.done.wait [#allocation15], 384  }
  0x62   :  { %8663 = vsyncadd [#allocation15], 4294966912  ;;  %v7794_v0 = vld [vmem:[#allocation2 + $0x74] ss:$8 sps:$4 sm:$0xff]   ;;  %v7798_v2 = vld [vmem:[#allocation2 + $0x70] ss:$8 sps:$4 sm:$0xff]  }
  0x63   :  { %v7796_v1 = vld [vmem:[#allocation2 + $0x174] ss:$8 sps:$4 sm:$0xff]   ;;  %2524 = vmatprep.subr.bf16.mxu0 %v7794_v0  ;;  %v7799_v3 = vld [vmem:[#allocation2 + $0x170] ss:$8 sps:$4 sm:$0xff]   ;;  %v7800_v4 = vld [vmem:[#allocation2 + $0x64] ss:$8 sps:$4 sm:$0xff]  }
  0x64   :  { %2567 = vmatprep.subr.bf16.mxu1 %v7796_v1  ;;  %2525 = vmatpush1.bf16.msra.mxu0 %v7798_v2  ;;  %v7802_v5 = vld [vmem:[#allocation2 + $0x164] ss:$8 sps:$4 sm:$0xff]   ;;  %v7804_v6 = vld [vmem:[#allocation2 + $0x60] ss:$8 sps:$4 sm:$0xff]   ;;  %v7806_v8 = vld [vmem:[#allocation2 + $0x54] ss:$8 sps:$4 sm:$0xff]  }
  0x65   :  { %2568 = vmatpush1.bf16.msra.mxu1 %v7799_v3  ;;  %2526 = vmatprep.subr.bf16.mxu0 %v7800_v4  ;;  %v7805_v7 = vld [vmem:[#allocation2 + $0x160] ss:$8 sps:$4 sm:$0xff]   ;;  %v7808_v9 = vld [vmem:[#allocation2 + $0x154] ss:$8 sps:$4 sm:$0xff]   ;;  %v7810_v10 = vld [vmem:[#allocation2 + $0x50] ss:$8 sps:$4 sm:$0xff]  }
  0x66   :  { %2569 = vmatprep.subr.bf16.mxu1 %v7802_v5  ;;  %v7811_v11 = vld [vmem:[#allocation2 + $0x150] ss:$8 sps:$4 sm:$0xff]   ;;  %v7812_v12 = vld [vmem:[#allocation2 + $0x44] ss:$8 sps:$4 sm:$0xff]   ;;  %v7816_v14 = vld [vmem:[#allocation2 + $0x40] ss:$8 sps:$4 sm:$0xff]  }
  0x67   :  { %v7814_v13 = vld [vmem:[#allocation2 + $0x144] ss:$8 sps:$4 sm:$0xff]   ;;  %v7817_v15 = vld [vmem:[#allocation2 + $0x140] ss:$8 sps:$4 sm:$0xff]   ;;  %v7818_v16 = vld [vmem:[#allocation2 + $0x34] ss:$8 sps:$4 sm:$0xff]  }
  0x68   :  { %2527 = vmatpush1.bf16.msra.mxu0 %v7804_v6  ;;  %v7820_v17 = vld [vmem:[#allocation2 + $0x134] ss:$8 sps:$4 sm:$0xff]   ;;  %v7822_v18 = vld [vmem:[#allocation2 + $0x30] ss:$8 sps:$4 sm:$0xff]   ;;  %v7824_v20 = vld [vmem:[#allocation2 + $0x24] ss:$8 sps:$4 sm:$0xff]  }
  0x69   :  { %2570 = vmatpush1.bf16.msra.mxu1 %v7805_v7  ;;  %2528 = vmatprep.subr.bf16.mxu0 %v7806_v8  ;;  %v7823_v19 = vld [vmem:[#allocation2 + $0x130] ss:$8 sps:$4 sm:$0xff]   ;;  %v7826_v21 = vld [vmem:[#allocation2 + $0x124] ss:$8 sps:$4 sm:$0xff]   ;;  %v7828_v22 = vld [vmem:[#allocation2 + $0x20] ss:$8 sps:$4 sm:$0xff]  }
  0x6a   :  { %2571 = vmatprep.subr.bf16.mxu1 %v7808_v9  ;;  %v7829_v23 = vld [vmem:[#allocation2 + $0x120] ss:$8 sps:$4 sm:$0xff]   ;;  %v7830_v24 = vld [vmem:[#allocation2 + $0x14] ss:$8 sps:$4 sm:$0xff]   ;;  %v7834_v26 = vld [vmem:[#allocation2 + $0x10] ss:$8 sps:$4 sm:$0xff]  }
  0x6b   :  { %v7832_v25 = vld [vmem:[#allocation2 + $0x114] ss:$8 sps:$4 sm:$0xff]   ;;  %v7835_v27 = vld [vmem:[#allocation2 + $0x110] ss:$8 sps:$4 sm:$0xff]   ;;  %v7836_v28 = vld [vmem:[#allocation2 + $0x4] ss:$8 sps:$4 sm:$0xff]  }
  0x6c   :  { %2529 = vmatpush1.bf16.msra.mxu0 %v7810_v10  ;;  %v7838_v29 = vld [vmem:[#allocation2 + $0x104] ss:$8 sps:$4 sm:$0xff]   ;;  %v7840_v30 = vld [vmem:[#allocation2] ss:$8 sps:$4 sm:$0xff]   ;;  %v7842_v32 = vld [vmem:[#allocation2 + $0xf4] ss:$8 sps:$4 sm:$0xff]  }
  0x6d   :  { %2572 = vmatpush1.bf16.msra.mxu1 %v7811_v11  ;;  %2530 = vmatprep.subr.bf16.mxu0 %v7812_v12  ;;  %v7841_v31 = vld [vmem:[#allocation2 + $0x100] ss:$8 sps:$4 sm:$0xff]   ;;  %v7844_v33 = vld [vmem:[#allocation2 + $0x1f4] ss:$8 sps:$4 sm:$0xff]   ;;  %v7846_v34 = vld [vmem:[#allocation2 + $0xf0] ss:$8 sps:$4 sm:$0xff]  }
  0x6e   :  { %2573 = vmatprep.subr.bf16.mxu1 %v7814_v13  ;;  %v7847_v35 = vld [vmem:[#allocation2 + $0x1f0] ss:$8 sps:$4 sm:$0xff]   ;;  %v7848_v36 = vld [vmem:[#allocation2 + $0xe4] ss:$8 sps:$4 sm:$0xff]   ;;  %v7852_v38 = vld [vmem:[#allocation2 + $0xe0] ss:$8 sps:$4 sm:$0xff]  }
  0x6f   :  { %v7850_v37 = vld [vmem:[#allocation2 + $0x1e4] ss:$8 sps:$4 sm:$0xff]   ;;  %v7853_v39 = vld [vmem:[#allocation2 + $0x1e0] ss:$8 sps:$4 sm:$0xff]   ;;  %v7854_v40 = vld [vmem:[#allocation2 + $0xd4] ss:$8 sps:$4 sm:$0xff]  }
  0x70   :  { %2531 = vmatpush1.bf16.msra.mxu0 %v7816_v14  ;;  %v7856_v41 = vld [vmem:[#allocation2 + $0x1d4] ss:$8 sps:$4 sm:$0xff]   ;;  %v7858_v42 = vld [vmem:[#allocation2 + $0xd0] ss:$8 sps:$4 sm:$0xff]   ;;  %v7860_v44 = vld [vmem:[#allocation2 + $0xc4] ss:$8 sps:$4 sm:$0xff]  }
  0x71   :  { %2574 = vmatpush1.bf16.msra.mxu1 %v7817_v15  ;;  %2532 = vmatprep.subr.bf16.mxu0 %v7818_v16  ;;  %v7859_v43 = vld [vmem:[#allocation2 + $0x1d0] ss:$8 sps:$4 sm:$0xff]   ;;  %v7862_v45 = vld [vmem:[#allocation2 + $0x1c4] ss:$8 sps:$4 sm:$0xff]   ;;  %v7864_v50 = vld [vmem:[#allocation2 + $0xc0] ss:$8 sps:$4 sm:$0xff]  }
  0x72   :  { %2575 = vmatprep.subr.bf16.mxu1 %v7820_v17  ;;  %v137_v46 = vld [vmem:[%s9352_s0 + $0x8] sm:$0xff]  ;;  %v139_v48 = vld [vmem:[%s9352_s0 + $0x18] sm:$0xff]  ;;  %v136_v6 = vld [vmem:[%s9352_s0] sm:$0xff]  ;;  %s8678_s23 = smov [#allocation16]  }
  0x73   :  { %v161_v47 = vld [vmem:[%s9352_s0 + $0xc8] sm:$0xff]  ;;  %v163_v49 = vld [vmem:[%s9352_s0 + $0xd8] sm:$0xff]  ;;  %v160_v7 = vld [vmem:[%s9352_s0 + $0xc0] sm:$0xff]  ;;  %s6883_s25 = sshll.u32 %s8678_s23, 4  ;;  %s6884_s25 = int_to_ptr.vmem [resolvable:$true] %s6883_s25 }
  0x74   :  { %2533 = vmatpush1.bf16.msra.mxu0 %v7822_v18  ;;  %v7865_v51 = vld [vmem:[#allocation2 + $0x1c0] ss:$8 sps:$4 sm:$0xff]   ;;  %v7866_v52 = vld [vmem:[#allocation2 + $0xb4] ss:$8 sps:$4 sm:$0xff]   ;;  %v185_v53 = vpack.c.bf16 %v161_v47, %v137_v46  ;;  %v187_v54 = vpack.c.bf16 %v163_v49, %v139_v48  ;;  %v7870_v56 = vld [vmem:[#allocation2 + $0xb0] ss:$8 sps:$4 sm:$0xff]   ;;  %v184_v12 = vpack.c.bf16 %v160_v7, %v136_v6  ;;  %p8639_p13 = scmp.lt.s32.totalorder %s6884_s25, %s6884_s25 }
  0x75   :  { %2576 = vmatpush1.bf16.msra.mxu1 %v7823_v19  ;;  %2534 = vmatprep.subr.bf16.mxu0 %v7824_v20  ;;  %v7868_v55 = vld [vmem:[#allocation2 + $0x1b4] ss:$8 sps:$4 sm:$0xff]   ;;  %v7871_v57 = vld [vmem:[#allocation2 + $0x1b0] ss:$8 sps:$4 sm:$0xff]   ;;  %v7872_v58 = vld [vmem:[#allocation2 + $0xa4] ss:$8 sps:$4 sm:$0xff]  }
  0x76   :  { %2577 = vmatprep.subr.bf16.mxu1 %v7826_v21  ;;  %2556 = vmatprep.mubr.bf16.mxu0 %v185_v53  ;;  %v7874_v59 = vld [vmem:[#allocation2 + $0x1a4] ss:$8 sps:$4 sm:$0xff]   ;;  %v7876_v60 = vld [vmem:[#allocation2 + $0xa0] ss:$8 sps:$4 sm:$0xff]   ;;  %v7878_v62 = vld [vmem:[#allocation2 + $0x94] ss:$8 sps:$4 sm:$0xff]  }
  0x77   :  { %2599 = vmatprep.mubr.bf16.mxu1 %v187_v54  ;;  %v7877_v61 = vld [vmem:[#allocation2 + $0x1a0] ss:$8 sps:$4 sm:$0xff]   ;;  %v7880_v63 = vld [vmem:[#allocation2 + $0x194] ss:$8 sps:$4 sm:$0xff]   ;;  %v7882_v0 = vld [vmem:[#allocation2 + $0x90] ss:$8 sps:$4 sm:$0xff]  }
  0x78   :  { %2535 = vmatpush1.bf16.msra.mxu0 %v7828_v22  ;;  %v7883_v1 = vld [vmem:[#allocation2 + $0x190] ss:$8 sps:$4 sm:$0xff]   ;;  %v7884_v2 = vld [vmem:[#allocation2 + $0x84] ss:$8 sps:$4 sm:$0xff]   ;;  %v7888_v4 = vld [vmem:[#allocation2 + $0x80] ss:$8 sps:$4 sm:$0xff]  }
  0x79   :  { %2578 = vmatpush1.bf16.msra.mxu1 %v7829_v23  ;;  %2536 = vmatprep.subr.bf16.mxu0 %v7830_v24  ;;  %v7886_v3 = vld [vmem:[#allocation2 + $0x184] ss:$8 sps:$4 sm:$0xff]   ;;  %v7889_v5 = vld [vmem:[#allocation2 + $0x180] ss:$8 sps:$4 sm:$0xff]   ;;  %v138_v8 = vld [vmem:[%s9352_s0 + $0x10] sm:$0xff]  ;;  %s8634_s30 = scalar_lea.vmem %s6884_s25, 3072 }
  0x7a   :  { %2579 = vmatprep.subr.bf16.mxu1 %v7832_v25  ;;  %v162_v9 = vld [vmem:[%s9352_s0 + $0xd0] sm:$0xff]  ;;  %v7898_v16 = vld [vmem:[#allocation2 + $0x264] ss:$8 sps:$4 sm:$0xff]   ;;  %v7896_v18 = vld [vmem:[#allocation2 + $0x260] ss:$8 sps:$4 sm:$0xff]   ;;  %p8635_p12 = scmp.ne.s32.totalorder %s6884_s25, %s8634_s30  ;;  %p8640_p0 = scmp.lt.s32.totalorder %s8634_s30, %s8634_s30 }
  0x7b   :  { %v7892_v10 = vld [vmem:[#allocation2 + $0x274] ss:$8 sps:$4 sm:$0xff]   ;;  %v186_v13 = vpack.c.bf16 %v162_v9, %v138_v8  ;;  %v7890_v14 = vld [vmem:[#allocation2 + $0x270] ss:$8 sps:$4 sm:$0xff]   ;;  %v7901_v17 = vld [vmem:[#allocation2 + $0x364] ss:$8 sps:$4 sm:$0xff]  }
  0x7c   :  { %2537 = vmatpush1.bf16.msra.mxu0 %v7834_v26  ;;  %v7895_v11 = vld [vmem:[#allocation2 + $0x374] ss:$8 sps:$4 sm:$0xff]   ;;  %v7893_v15 = vld [vmem:[#allocation2 + $0x370] ss:$8 sps:$4 sm:$0xff]   ;;  %v7899_v19 = vld [vmem:[#allocation2 + $0x360] ss:$8 sps:$4 sm:$0xff]   ;;  %p8641_p1 = por %p8640_p0, %p8639_p13 }
  0x7d   :  { %2580 = vmatpush1.bf16.msra.mxu1 %v7835_v27  ;;  %2538 = vmatprep.subr.bf16.mxu0 %v7836_v28  ;;  %v7904_v20 = vld [vmem:[#allocation2 + $0x254] ss:$8 sps:$4 sm:$0xff]   ;;  %v7902_v22 = vld [vmem:[#allocation2 + $0x250] ss:$8 sps:$4 sm:$0xff]   ;;  %v7910_v24 = vld [vmem:[#allocation2 + $0x244] ss:$8 sps:$4 sm:$0xff]  }
  0x7e   :  { %2581 = vmatprep.subr.bf16.mxu1 %v7838_v29  ;;  %v7907_v21 = vld [vmem:[#allocation2 + $0x354] ss:$8 sps:$4 sm:$0xff]   ;;  %v7905_v23 = vld [vmem:[#allocation2 + $0x350] ss:$8 sps:$4 sm:$0xff]   ;;  %v7913_v25 = vld [vmem:[#allocation2 + $0x344] ss:$8 sps:$4 sm:$0xff]   ;;  %p8642_p2 = pnand %p8641_p1, %p8635_p12 }
  0x7f   :  { %v7908_v26 = vld [vmem:[#allocation2 + $0x240] ss:$8 sps:$4 sm:$0xff]   ;;  %v7916_v28 = vld [vmem:[#allocation2 + $0x234] ss:$8 sps:$4 sm:$0xff]   ;;  %v7941_v53 = vld [vmem:[#allocation2 + $0x3f0] ss:$8 sps:$4 sm:$0xff]  }
  0x80   :  { %2539 = vmatpush1.bf16.msra.mxu0 %v7840_v30  ;;  %v7911_v27 = vld [vmem:[#allocation2 + $0x340] ss:$8 sps:$4 sm:$0xff]   ;;  %v7919_v29 = vld [vmem:[#allocation2 + $0x334] ss:$8 sps:$4 sm:$0xff]   ;;  %v7914_v30 = vld [vmem:[#allocation2 + $0x230] ss:$8 sps:$4 sm:$0xff]  }
  0x81   :  { %2582 = vmatpush1.bf16.msra.mxu1 %v7841_v31  ;;  %2540 = vmatprep.subr.bf16.mxu0 %v7842_v32  ;;  %v7917_v31 = vld [vmem:[#allocation2 + $0x330] ss:$8 sps:$4 sm:$0xff]   ;;  %v7922_v32 = vld [vmem:[#allocation2 + $0x224] ss:$8 sps:$4 sm:$0xff]   ;;  %v7932_v48 = vld [vmem:[#allocation2 + $0x200] ss:$8 sps:$4 sm:$0xff]  }
  0x82   :  { %2583 = vmatprep.subr.bf16.mxu1 %v7844_v33  ;;  %v7925_v33 = vld [vmem:[#allocation2 + $0x324] ss:$8 sps:$4 sm:$0xff]   ;;  %v167_v46 = vld [vmem:[%s9352_s0 + $0xf8] sm:$0xff]  ;;  %v7935_v49 = vld [vmem:[#allocation2 + $0x300] ss:$8 sps:$4 sm:$0xff]  }
  0x83   :  { %v7946_v54 = vld [vmem:[#allocation2 + $0x2e4] ss:$8 sps:$4 sm:$0xff]   ;;  %v7968_v8 = vld [vmem:[#allocation2 + $0x2a0] ss:$8 sps:$4 sm:$0xff]  }
  0x84   :  { %2541 = vmatpush2.bf16.msra.mxu0 %v7846_v34  ;;  %v7920_v34 = vld [vmem:[#allocation2 + $0x220] ss:$8 sps:$4 sm:$0xff]   ;;  %v7970_v6 = vld [vmem:[#allocation2 + $0x2a4] ss:$8 sps:$4 sm:$0xff]  }
  0x85   :  { %2584 = vmatpush2.bf16.msra.mxu1 %v7847_v35  ;;  %2542 = vmatprep.subr.bf16.mxu0 %v7848_v36  ;;  %v7923_v35 = vld [vmem:[#allocation2 + $0x320] ss:$8 sps:$4 sm:$0xff]   ;;  %v7928_v36 = vld [vmem:[#allocation2 + $0x214] ss:$8 sps:$4 sm:$0xff]   ;;  %v7973_v7 = vld [vmem:[#allocation2 + $0x3a4] ss:$8 sps:$4 sm:$0xff]  }
  0x86   :  { %2585 = vmatprep.subr.bf16.mxu1 %v7850_v37  ;;  %v7931_v37 = vld [vmem:[#allocation2 + $0x314] ss:$8 sps:$4 sm:$0xff]   ;;  %v7971_v9 = vld [vmem:[#allocation2 + $0x3a0] ss:$8 sps:$4 sm:$0xff]  }
  0x88   :  { %2543 = vmatpush2.bf16.msra.mxu0 %v7852_v38  ;;  %v7926_v38 = vld [vmem:[#allocation2 + $0x210] ss:$8 sps:$4 sm:$0xff]  }
  0x89   :  { %2586 = vmatpush2.bf16.msra.mxu1 %v7853_v39  ;;  %2544 = vmatprep.subr.bf16.mxu0 %v7854_v40  ;;  %v7929_v39 = vld [vmem:[#allocation2 + $0x310] ss:$8 sps:$4 sm:$0xff]   ;;  %v141_v40 = vld [vmem:[%s9352_s0 + $0x28] sm:$0xff] }
  0x8a   :  { %2587 = vmatprep.subr.bf16.mxu1 %v7856_v41  ;;  %v165_v41 = vld [vmem:[%s9352_s0 + $0xe8] sm:$0xff] }
  0x8c   :  { %2545 = vmatpush2.bf16.msra.mxu0 %v7858_v42  ;;  %v143_v42 = vld [vmem:[%s9352_s0 + $0x38] sm:$0xff] }
  0x8d   :  { %2588 = vmatpush2.bf16.msra.mxu1 %v7859_v43  ;;  %2546 = vmatprep.subr.bf16.mxu0 %v7860_v44  ;;  %v7934_v43 = vld [vmem:[#allocation2 + $0x204] ss:$8 sps:$4 sm:$0xff]   ;;  %v191_v47 = vpack.c.bf16 %v167_v46, %v143_v42  ;;  %v8012_v46 = vld [vmem:[#allocation2 + $0x434] ss:$8 sps:$4 sm:$0xff]  }
  0x8e   :  { %2589 = vmatprep.subr.bf16.mxu1 %v7862_v45  ;;  %v7937_v44 = vld [vmem:[#allocation2 + $0x304] ss:$8 sps:$4 sm:$0xff]   ;;  %v189_v45 = vpack.c.bf16 %v165_v41, %v141_v40  ;;  %v8001_v40 = vld [vmem:[#allocation2 + $0x550] ss:$8 sps:$4 sm:$0xff]  }
  0x8f   :  { %v8006_v42 = vld [vmem:[#allocation2 + $0x444] ss:$8 sps:$4 sm:$0xff]  }
  0x90   :  { %2547 = vmatpush2.bf16.msra.mxu0 %v7864_v50  ;;  %v7940_v50 = vld [vmem:[#allocation2 + $0x2f4] ss:$8 sps:$4 sm:$0xff]  }
  0x91   :  { %2590 = vmatpush2.bf16.msra.mxu1 %v7865_v51  ;;  %2548 = vmatprep.subr.bf16.mxu0 %v7866_v52  ;;  %v7943_v51 = vld [vmem:[#allocation2 + $0x3f4] ss:$8 sps:$4 sm:$0xff]   ;;  %v7938_v52 = vld [vmem:[#allocation2 + $0x2f0] ss:$8 sps:$4 sm:$0xff]  }
  0x92   :  { %2591 = vmatprep.subr.bf16.mxu1 %v7868_v55  ;;  %v7949_v55 = vld [vmem:[#allocation2 + $0x3e4] ss:$8 sps:$4 sm:$0xff]  }
  0x94   :  { %2549 = vmatpush2.bf16.msra.mxu0 %v7870_v56  ;;  %v7944_v56 = vld [vmem:[#allocation2 + $0x2e0] ss:$8 sps:$4 sm:$0xff]  }
  0x95   :  { %2592 = vmatpush2.bf16.msra.mxu1 %v7871_v57  ;;  %2550 = vmatprep.subr.bf16.mxu0 %v7872_v58  ;;  %v7947_v57 = vld [vmem:[#allocation2 + $0x3e0] ss:$8 sps:$4 sm:$0xff]   ;;  %v7952_v58 = vld [vmem:[#allocation2 + $0x2d4] ss:$8 sps:$4 sm:$0xff]  }
  0x96   :  { %2593 = vmatprep.subr.bf16.mxu1 %v7874_v59  ;;  %v7955_v59 = vld [vmem:[#allocation2 + $0x3d4] ss:$8 sps:$4 sm:$0xff]  }
  0x98   :  { %2551 = vmatpush2.bf16.msra.mxu0 %v7876_v60  ;;  %v7950_v60 = vld [vmem:[#allocation2 + $0x2d0] ss:$8 sps:$4 sm:$0xff]  }
  0x99   :  { %2594 = vmatpush2.bf16.msra.mxu1 %v7877_v61  ;;  %2552 = vmatprep.subr.bf16.mxu0 %v7878_v62  ;;  %v7953_v61 = vld [vmem:[#allocation2 + $0x3d0] ss:$8 sps:$4 sm:$0xff]   ;;  %v7958_v62 = vld [vmem:[#allocation2 + $0x2c4] ss:$8 sps:$4 sm:$0xff]  }
  0x9a   :  { %2595 = vmatprep.subr.bf16.mxu1 %v7880_v63  ;;  %v7961_v63 = vld [vmem:[#allocation2 + $0x3c4] ss:$8 sps:$4 sm:$0xff]  }
  0x9c   :  { %2553 = vmatpush2.bf16.msra.mxu0 %v7882_v0  ;;  %v7956_v0 = vld [vmem:[#allocation2 + $0x2c0] ss:$8 sps:$4 sm:$0xff]  }
  0x9d   :  { %2596 = vmatpush2.bf16.msra.mxu1 %v7883_v1  ;;  %2554 = vmatprep.subr.bf16.mxu0 %v7884_v2  ;;  %v7959_v1 = vld [vmem:[#allocation2 + $0x3c0] ss:$8 sps:$4 sm:$0xff]   ;;  %v7964_v2 = vld [vmem:[#allocation2 + $0x2b4] ss:$8 sps:$4 sm:$0xff]  }
  0x9e   :  { %2597 = vmatprep.subr.bf16.mxu1 %v7886_v3  ;;  %v7967_v3 = vld [vmem:[#allocation2 + $0x3b4] ss:$8 sps:$4 sm:$0xff]  }
  0xa0   :  { %2555 = vmatpush2.bf16.msra.mxu0 %v7888_v4  ;;  %v7962_v4 = vld [vmem:[#allocation2 + $0x2b0] ss:$8 sps:$4 sm:$0xff]  }
  0xa1   :  { %2598 = vmatpush2.bf16.msra.mxu1 %v7889_v5  ;;  %2610 = vmatprep.subr.bf16.mxu0 %v7892_v10  ;;  %v7965_v5 = vld [vmem:[#allocation2 + $0x3b0] ss:$8 sps:$4 sm:$0xff]   ;;  %v7976_v10 = vld [vmem:[#allocation2 + $0x294] ss:$8 sps:$4 sm:$0xff]  }
  0xa2   :  { %2653 = vmatprep.subr.bf16.mxu1 %v7895_v11  ;;  %v7979_v11 = vld [vmem:[#allocation2 + $0x394] ss:$8 sps:$4 sm:$0xff]  }
  0xa3   :  { %2557 = vmatmul.mubr.bf16.vlgmr.msra.gmra.mxu0 %v184_v12  ;;  %v7974_v12 = vld [vmem:[#allocation2 + $0x290] ss:$8 sps:$4 sm:$0xff]  }
  0xa4   :  { %2600 = vmatmul.mubr.bf16.vlgmr.msra.gmra.mxu1 %v186_v13  ;;  %2611 = vmatpush1.bf16.msra.mxu0 %v7890_v14  ;;  %v7977_v13 = vld [vmem:[#allocation2 + $0x390] ss:$8 sps:$4 sm:$0xff]   ;;  %v7982_v14 = vld [vmem:[#allocation2 + $0x284] ss:$8 sps:$4 sm:$0xff]  }
  0xa5   :  { %2654 = vmatpush1.bf16.msra.mxu1 %v7893_v15  ;;  %2612 = vmatprep.subr.bf16.mxu0 %v7898_v16  ;;  %v7985_v15 = vld [vmem:[#allocation2 + $0x384] ss:$8 sps:$4 sm:$0xff]   ;;  %v7980_v16 = vld [vmem:[#allocation2 + $0x280] ss:$8 sps:$4 sm:$0xff]  }
  0xa6   :  { %2655 = vmatprep.subr.bf16.mxu1 %v7901_v17  ;;  %2642 = vmatprep.mubr.bf16.mxu0 %v189_v45  ;;  %v7983_v17 = vld [vmem:[#allocation2 + $0x380] ss:$8 sps:$4 sm:$0xff]  }
  0xa7   :  { %2685 = vmatprep.mubr.bf16.mxu1 %v191_v47  ;;  %v8007_v45 = vld [vmem:[#allocation2 + $0x540] ss:$8 sps:$4 sm:$0xff]   ;;  %v8015_v47 = vld [vmem:[#allocation2 + $0x534] ss:$8 sps:$4 sm:$0xff]  }
  0xa8   :  { %2613 = vmatpush1.bf16.msra.mxu0 %v7896_v18  ;;  %v140_v18 = vld [vmem:[%s9352_s0 + $0x20] sm:$0xff] }
  0xa9   :  { %2656 = vmatpush1.bf16.msra.mxu1 %v7899_v19  ;;  %2614 = vmatprep.subr.bf16.mxu0 %v7904_v20  ;;  %v164_v19 = vld [vmem:[%s9352_s0 + $0xe0] sm:$0xff]  ;;  %v142_v20 = vld [vmem:[%s9352_s0 + $0x30] sm:$0xff] }
  0xaa   :  { %2657 = vmatprep.subr.bf16.mxu1 %v7907_v21  ;;  %v166_v21 = vld [vmem:[%s9352_s0 + $0xf0] sm:$0xff] }
  0xac   :  { %2615 = vmatpush1.bf16.msra.mxu0 %v7902_v22  ;;  %v7988_v22 = vld [vmem:[#allocation2 + $0x474] ss:$8 sps:$4 sm:$0xff]  }
  0xad   :  { %2658 = vmatpush1.bf16.msra.mxu1 %v7905_v23  ;;  %2616 = vmatprep.subr.bf16.mxu0 %v7910_v24  ;;  %v7991_v23 = vld [vmem:[#allocation2 + $0x574] ss:$8 sps:$4 sm:$0xff]   ;;  %v188_v24 = vpack.c.bf16 %v164_v19, %v140_v18  ;;  %v8066_v18 = vld [vmem:[#allocation2 + $0x4a4] ss:$8 sps:$4 sm:$0xff]  }
  0xae   :  { %2659 = vmatprep.subr.bf16.mxu1 %v7913_v25  ;;  %v190_v25 = vpack.c.bf16 %v166_v21, %v142_v20  ;;  %v8069_v19 = vld [vmem:[#allocation2 + $0x5a4] ss:$8 sps:$4 sm:$0xff]   ;;  %v8064_v20 = vld [vmem:[#allocation2 + $0x4a0] ss:$8 sps:$4 sm:$0xff]  }
  0xaf   :  { %v8067_v21 = vld [vmem:[#allocation2 + $0x5a0] ss:$8 sps:$4 sm:$0xff]  }
  0xb0   :  { %2617 = vmatpush1.bf16.msra.mxu0 %v7908_v26  ;;  %v7986_v26 = vld [vmem:[#allocation2 + $0x470] ss:$8 sps:$4 sm:$0xff]  }
  0xb1   :  { %2660 = vmatpush1.bf16.msra.mxu1 %v7911_v27  ;;  %2618 = vmatprep.subr.bf16.mxu0 %v7916_v28  ;;  %v7989_v27 = vld [vmem:[#allocation2 + $0x570] ss:$8 sps:$4 sm:$0xff]   ;;  %v7994_v28 = vld [vmem:[#allocation2 + $0x464] ss:$8 sps:$4 sm:$0xff]  }
  0xb2   :  { %2661 = vmatprep.subr.bf16.mxu1 %v7919_v29  ;;  %v7997_v29 = vld [vmem:[#allocation2 + $0x564] ss:$8 sps:$4 sm:$0xff]  }
  0xb4   :  { %2619 = vmatpush1.bf16.msra.mxu0 %v7914_v30  ;;  %v7992_v30 = vld [vmem:[#allocation2 + $0x460] ss:$8 sps:$4 sm:$0xff]  }
  0xb5   :  { %2662 = vmatpush1.bf16.msra.mxu1 %v7917_v31  ;;  %2620 = vmatprep.subr.bf16.mxu0 %v7922_v32  ;;  %v7995_v31 = vld [vmem:[#allocation2 + $0x560] ss:$8 sps:$4 sm:$0xff]   ;;  %v8000_v32 = vld [vmem:[#allocation2 + $0x454] ss:$8 sps:$4 sm:$0xff]  }
  0xb6   :  { %2663 = vmatprep.subr.bf16.mxu1 %v7925_v33  ;;  %v8003_v33 = vld [vmem:[#allocation2 + $0x554] ss:$8 sps:$4 sm:$0xff]  }
  0xb8   :  { %2621 = vmatpush1.bf16.msra.mxu0 %v7920_v34  ;;  %v145_v34 = vld [vmem:[%s9352_s0 + $0x48] sm:$0xff] }
  0xb9   :  { %2664 = vmatpush1.bf16.msra.mxu1 %v7923_v35  ;;  %2622 = vmatprep.subr.bf16.mxu0 %v7928_v36  ;;  %v169_v35 = vld [vmem:[%s9352_s0 + $0x108] sm:$0xff] }
  0xba   :  { %2665 = vmatprep.subr.bf16.mxu1 %v7931_v37  ;;  %v193_v36 = vpack.c.bf16 %v169_v35, %v145_v34  ;;  %v147_v37 = vld [vmem:[%s9352_s0 + $0x58] sm:$0xff] }
  0xbb   :  { %v8084_v34 = vld [vmem:[#allocation2 + $0x674] ss:$8 sps:$4 sm:$0xff]  }
  0xbc   :  { %2623 = vmatpush1.bf16.msra.mxu0 %v7926_v38  ;;  %v171_v38 = vld [vmem:[%s9352_s0 + $0x118] sm:$0xff] }
  0xbd   :  { %2666 = vmatpush1.bf16.msra.mxu1 %v7929_v39  ;;  %2624 = vmatprep.subr.bf16.mxu0 %v7934_v43  ;;  %v7998_v39 = vld [vmem:[#allocation2 + $0x450] ss:$8 sps:$4 sm:$0xff]   ;;  %v195_v41 = vpack.c.bf16 %v171_v38, %v147_v37  ;;  %v8009_v43 = vld [vmem:[#allocation2 + $0x544] ss:$8 sps:$4 sm:$0xff]   ;;  %v8087_v35 = vld [vmem:[#allocation2 + $0x774] ss:$8 sps:$4 sm:$0xff]  }
  0xbe   :  { %2667 = vmatprep.subr.bf16.mxu1 %v7937_v44  ;;  %v8004_v44 = vld [vmem:[#allocation2 + $0x440] ss:$8 sps:$4 sm:$0xff]   ;;  %v8082_v37 = vld [vmem:[#allocation2 + $0x670] ss:$8 sps:$4 sm:$0xff]  }
  0xbf   :  { %v173_v38 = vld [vmem:[%s9352_s0 + $0x128] sm:$0xff] }
  0xc0   :  { %2625 = vmatpush1.bf16.msra.mxu0 %v7932_v48  ;;  %v8010_v48 = vld [vmem:[#allocation2 + $0x430] ss:$8 sps:$4 sm:$0xff]  }
  0xc1   :  { %2668 = vmatpush1.bf16.msra.mxu1 %v7935_v49  ;;  %2626 = vmatprep.subr.bf16.mxu0 %v7940_v50  ;;  %v8013_v49 = vld [vmem:[#allocation2 + $0x530] ss:$8 sps:$4 sm:$0xff]   ;;  %v8018_v50 = vld [vmem:[#allocation2 + $0x424] ss:$8 sps:$4 sm:$0xff]  }
  0xc2   :  { %2669 = vmatprep.subr.bf16.mxu1 %v7943_v51  ;;  %v8021_v51 = vld [vmem:[#allocation2 + $0x524] ss:$8 sps:$4 sm:$0xff]  }
  0xc4   :  { %2627 = vmatpush2.bf16.msra.mxu0 %v7938_v52  ;;  %v8016_v52 = vld [vmem:[#allocation2 + $0x420] ss:$8 sps:$4 sm:$0xff]  }
  0xc5   :  { %2670 = vmatpush2.bf16.msra.mxu1 %v7941_v53  ;;  %2628 = vmatprep.subr.bf16.mxu0 %v7946_v54  ;;  %v8019_v53 = vld [vmem:[#allocation2 + $0x520] ss:$8 sps:$4 sm:$0xff]   ;;  %v8024_v54 = vld [vmem:[#allocation2 + $0x414] ss:$8 sps:$4 sm:$0xff]  }
  0xc6   :  { %2671 = vmatprep.subr.bf16.mxu1 %v7949_v55  ;;  %v8027_v55 = vld [vmem:[#allocation2 + $0x514] ss:$8 sps:$4 sm:$0xff]  }
  0xc8   :  { %2629 = vmatpush2.bf16.msra.mxu0 %v7944_v56  ;;  %v8022_v56 = vld [vmem:[#allocation2 + $0x410] ss:$8 sps:$4 sm:$0xff]  }
  0xc9   :  { %2672 = vmatpush2.bf16.msra.mxu1 %v7947_v57  ;;  %2630 = vmatprep.subr.bf16.mxu0 %v7952_v58  ;;  %v8025_v57 = vld [vmem:[#allocation2 + $0x510] ss:$8 sps:$4 sm:$0xff]   ;;  %v8030_v58 = vld [vmem:[#allocation2 + $0x404] ss:$8 sps:$4 sm:$0xff]  }
  0xca   :  { %2673 = vmatprep.subr.bf16.mxu1 %v7955_v59  ;;  %v8033_v59 = vld [vmem:[#allocation2 + $0x504] ss:$8 sps:$4 sm:$0xff]  }
  0xcc   :  { %2631 = vmatpush2.bf16.msra.mxu0 %v7950_v60  ;;  %v8028_v60 = vld [vmem:[#allocation2 + $0x400] ss:$8 sps:$4 sm:$0xff]  }
  0xcd   :  { %2674 = vmatpush2.bf16.msra.mxu1 %v7953_v61  ;;  %2632 = vmatprep.subr.bf16.mxu0 %v7958_v62  ;;  %v8031_v61 = vld [vmem:[#allocation2 + $0x500] ss:$8 sps:$4 sm:$0xff]   ;;  %v8036_v62 = vld [vmem:[#allocation2 + $0x4f4] ss:$8 sps:$4 sm:$0xff]  }
  0xce   :  { %2675 = vmatprep.subr.bf16.mxu1 %v7961_v63  ;;  %v8039_v63 = vld [vmem:[#allocation2 + $0x5f4] ss:$8 sps:$4 sm:$0xff]  }
  0xd0   :  { %2633 = vmatpush2.bf16.msra.mxu0 %v7956_v0  ;;  %v8034_v0 = vld [vmem:[#allocation2 + $0x4f0] ss:$8 sps:$4 sm:$0xff]  }
  0xd1   :  { %2676 = vmatpush2.bf16.msra.mxu1 %v7959_v1  ;;  %2634 = vmatprep.subr.bf16.mxu0 %v7964_v2  ;;  %v8037_v1 = vld [vmem:[#allocation2 + $0x5f0] ss:$8 sps:$4 sm:$0xff]   ;;  %v8042_v2 = vld [vmem:[#allocation2 + $0x4e4] ss:$8 sps:$4 sm:$0xff]  }
  0xd2   :  { %2677 = vmatprep.subr.bf16.mxu1 %v7967_v3  ;;  %v8045_v3 = vld [vmem:[#allocation2 + $0x5e4] ss:$8 sps:$4 sm:$0xff]  }
  0xd4   :  { %2635 = vmatpush2.bf16.msra.mxu0 %v7962_v4  ;;  %v8040_v4 = vld [vmem:[#allocation2 + $0x4e0] ss:$8 sps:$4 sm:$0xff]  }
  0xd5   :  { %2678 = vmatpush2.bf16.msra.mxu1 %v7965_v5  ;;  %2636 = vmatprep.subr.bf16.mxu0 %v7970_v6  ;;  %v8043_v5 = vld [vmem:[#allocation2 + $0x5e0] ss:$8 sps:$4 sm:$0xff]   ;;  %v8048_v6 = vld [vmem:[#allocation2 + $0x4d4] ss:$8 sps:$4 sm:$0xff]  }
  0xd6   :  { %2679 = vmatprep.subr.bf16.mxu1 %v7973_v7  ;;  %v8051_v7 = vld [vmem:[#allocation2 + $0x5d4] ss:$8 sps:$4 sm:$0xff]  }
  0xd8   :  { %2637 = vmatpush2.bf16.msra.mxu0 %v7968_v8  ;;  %v8046_v8 = vld [vmem:[#allocation2 + $0x4d0] ss:$8 sps:$4 sm:$0xff]  }
  0xd9   :  { %2680 = vmatpush2.bf16.msra.mxu1 %v7971_v9  ;;  %2638 = vmatprep.subr.bf16.mxu0 %v7976_v10  ;;  %v8049_v9 = vld [vmem:[#allocation2 + $0x5d0] ss:$8 sps:$4 sm:$0xff]   ;;  %v8054_v10 = vld [vmem:[#allocation2 + $0x4c4] ss:$8 sps:$4 sm:$0xff]  }
  0xda   :  { %2681 = vmatprep.subr.bf16.mxu1 %v7979_v11  ;;  %v8057_v11 = vld [vmem:[#allocation2 + $0x5c4] ss:$8 sps:$4 sm:$0xff]  }
  0xdc   :  { %2639 = vmatpush2.bf16.msra.mxu0 %v7974_v12  ;;  %v8052_v12 = vld [vmem:[#allocation2 + $0x4c0] ss:$8 sps:$4 sm:$0xff]  }
  0xdd   :  { %2682 = vmatpush2.bf16.msra.mxu1 %v7977_v13  ;;  %2640 = vmatprep.subr.bf16.mxu0 %v7982_v14  ;;  %v8055_v13 = vld [vmem:[#allocation2 + $0x5c0] ss:$8 sps:$4 sm:$0xff]   ;;  %v8060_v14 = vld [vmem:[#allocation2 + $0x4b4] ss:$8 sps:$4 sm:$0xff]  }
  0xde   :  { %2683 = vmatprep.subr.bf16.mxu1 %v7985_v15  ;;  %v8063_v15 = vld [vmem:[#allocation2 + $0x5b4] ss:$8 sps:$4 sm:$0xff]  }
  0xe0   :  { %2641 = vmatpush2.bf16.msra.mxu0 %v7980_v16  ;;  %v8058_v16 = vld [vmem:[#allocation2 + $0x4b0] ss:$8 sps:$4 sm:$0xff]  }
  0xe1   :  { %2684 = vmatpush2.bf16.msra.mxu1 %v7983_v17  ;;  %2696 = vmatprep.subr.bf16.mxu0 %v7988_v22  ;;  %v8061_v17 = vld [vmem:[#allocation2 + $0x5b0] ss:$8 sps:$4 sm:$0xff]   ;;  %v8072_v22 = vld [vmem:[#allocation2 + $0x494] ss:$8 sps:$4 sm:$0xff]  }
  0xe2   :  { %2739 = vmatprep.subr.bf16.mxu1 %v7991_v23  ;;  %v8075_v23 = vld [vmem:[#allocation2 + $0x594] ss:$8 sps:$4 sm:$0xff]  }
  0xe3   :  { %2643 = vmatmul.mubr.bf16.vlgmr.msra.gmra.mxu0 %v188_v24  ;;  %v8070_v24 = vld [vmem:[#allocation2 + $0x490] ss:$8 sps:$4 sm:$0xff]  }
  0xe4   :  { %2686 = vmatmul.mubr.bf16.vlgmr.msra.gmra.mxu1 %v190_v25  ;;  %2697 = vmatpush1.bf16.msra.mxu0 %v7986_v26  ;;  %v8073_v25 = vld [vmem:[#allocation2 + $0x590] ss:$8 sps:$4 sm:$0xff]   ;;  %v8078_v26 = vld [vmem:[#allocation2 + $0x484] ss:$8 sps:$4 sm:$0xff]  }
  0xe5   :  { %2740 = vmatpush1.bf16.msra.mxu1 %v7989_v27  ;;  %2698 = vmatprep.subr.bf16.mxu0 %v7994_v28  ;;  %v8081_v27 = vld [vmem:[#allocation2 + $0x584] ss:$8 sps:$4 sm:$0xff]   ;;  %v8076_v28 = vld [vmem:[#allocation2 + $0x480] ss:$8 sps:$4 sm:$0xff]  }
  0xe6   :  { %2741 = vmatprep.subr.bf16.mxu1 %v7997_v29  ;;  %2728 = vmatprep.mubr.bf16.mxu0 %v193_v36  ;;  %v8079_v29 = vld [vmem:[#allocation2 + $0x580] ss:$8 sps:$4 sm:$0xff]  }
  0xe7   :  { %2771 = vmatprep.mubr.bf16.mxu1 %v195_v41  ;;  %v149_v36 = vld [vmem:[%s9352_s0 + $0x68] sm:$0xff] }
  0xe8   :  { %2699 = vmatpush1.bf16.msra.mxu0 %v7992_v30  ;;  %v144_v30 = vld [vmem:[%s9352_s0 + $0x40] sm:$0xff] }
  0xe9   :  { %2742 = vmatpush1.bf16.msra.mxu1 %v7995_v31  ;;  %2700 = vmatprep.subr.bf16.mxu0 %v8000_v32  ;;  %v168_v31 = vld [vmem:[%s9352_s0 + $0x100] sm:$0xff]  ;;  %v146_v32 = vld [vmem:[%s9352_s0 + $0x50] sm:$0xff] }
  0xea   :  { %2743 = vmatprep.subr.bf16.mxu1 %v8003_v33  ;;  %v170_v33 = vld [vmem:[%s9352_s0 + $0x110] sm:$0xff] }
  0xeb   :  { %v194_v41 = vpack.c.bf16 %v170_v33, %v146_v32  ;;  %v8160_v32 = vld [vmem:[#allocation2 + $0x6a0] ss:$8 sps:$4 sm:$0xff]  }
  0xec   :  { %2701 = vmatpush1.bf16.msra.mxu0 %v7998_v39  ;;  %v151_v39 = vld [vmem:[%s9352_s0 + $0x78] sm:$0xff]  ;;  %v8163_v33 = vld [vmem:[#allocation2 + $0x7a0] ss:$8 sps:$4 sm:$0xff]  }
  0xed   :  { %2744 = vmatpush1.bf16.msra.mxu1 %v8001_v40  ;;  %2702 = vmatprep.subr.bf16.mxu0 %v8006_v42  ;;  %v192_v40 = vpack.c.bf16 %v168_v31, %v144_v30  ;;  %v175_v42 = vld [vmem:[%s9352_s0 + $0x138] sm:$0xff]  ;;  %v8162_v30 = vld [vmem:[#allocation2 + $0x6a4] ss:$8 sps:$4 sm:$0xff]  }
  0xee   :  { %2745 = vmatprep.subr.bf16.mxu1 %v8009_v43  ;;  %v8085_v43 = vld [vmem:[#allocation2 + $0x770] ss:$8 sps:$4 sm:$0xff]   ;;  %v8165_v31 = vld [vmem:[#allocation2 + $0x7a4] ss:$8 sps:$4 sm:$0xff]  }
  0xf0   :  { %2703 = vmatpush1.bf16.msra.mxu0 %v8004_v44  ;;  %v8090_v44 = vld [vmem:[#allocation2 + $0x664] ss:$8 sps:$4 sm:$0xff]  }
  0xf1   :  { %2746 = vmatpush1.bf16.msra.mxu1 %v8007_v45  ;;  %2704 = vmatprep.subr.bf16.mxu0 %v8012_v46  ;;  %v8093_v45 = vld [vmem:[#allocation2 + $0x764] ss:$8 sps:$4 sm:$0xff]   ;;  %v197_v46 = vpack.c.bf16 %v173_v38, %v149_v36  ;;  %v8166_v36 = vld [vmem:[#allocation2 + $0x690] ss:$8 sps:$4 sm:$0xff]  }
  0xf2   :  { %2747 = vmatprep.subr.bf16.mxu1 %v8015_v47  ;;  %v199_v47 = vpack.c.bf16 %v175_v42, %v151_v39  ;;  %v8174_v38 = vld [vmem:[#allocation2 + $0x684] ss:$8 sps:$4 sm:$0xff]  }
  0xf3   :  { %v8177_v39 = vld [vmem:[#allocation2 + $0x784] ss:$8 sps:$4 sm:$0xff]  }
  0xf4   :  { %2705 = vmatpush1.bf16.msra.mxu0 %v8010_v48  ;;  %v8088_v48 = vld [vmem:[#allocation2 + $0x660] ss:$8 sps:$4 sm:$0xff]  }
  0xf5   :  { %2748 = vmatpush1.bf16.msra.mxu1 %v8013_v49  ;;  %2706 = vmatprep.subr.bf16.mxu0 %v8018_v50  ;;  %v8091_v49 = vld [vmem:[#allocation2 + $0x760] ss:$8 sps:$4 sm:$0xff]   ;;  %v8096_v50 = vld [vmem:[#allocation2 + $0x654] ss:$8 sps:$4 sm:$0xff]  }
  0xf6   :  { %2749 = vmatprep.subr.bf16.mxu1 %v8021_v51  ;;  %v8099_v51 = vld [vmem:[#allocation2 + $0x754] ss:$8 sps:$4 sm:$0xff]   ;;  %v148_v42 = vld [vmem:[%s9352_s0 + $0x60] sm:$0xff] }
  0xf8   :  { %2707 = vmatpush1.bf16.msra.mxu0 %v8016_v52  ;;  %v8094_v52 = vld [vmem:[#allocation2 + $0x650] ss:$8 sps:$4 sm:$0xff]  }
  0xf9   :  { %2750 = vmatpush1.bf16.msra.mxu1 %v8019_v53  ;;  %2708 = vmatprep.subr.bf16.mxu0 %v8024_v54  ;;  %v8097_v53 = vld [vmem:[#allocation2 + $0x750] ss:$8 sps:$4 sm:$0xff]   ;;  %v8102_v54 = vld [vmem:[#allocation2 + $0x644] ss:$8 sps:$4 sm:$0xff]  }
  0xfa   :  { %2751 = vmatprep.subr.bf16.mxu1 %v8027_v55  ;;  %v8105_v55 = vld [vmem:[#allocation2 + $0x744] ss:$8 sps:$4 sm:$0xff]  }
  0xfc   :  { %2709 = vmatpush1.bf16.msra.mxu0 %v8022_v56  ;;  %v8100_v56 = vld [vmem:[#allocation2 + $0x640] ss:$8 sps:$4 sm:$0xff]  }
  0xfd   :  { %2752 = vmatpush1.bf16.msra.mxu1 %v8025_v57  ;;  %2710 = vmatprep.subr.bf16.mxu0 %v8030_v58  ;;  %v8103_v57 = vld [vmem:[#allocation2 + $0x740] ss:$8 sps:$4 sm:$0xff]   ;;  %v8108_v58 = vld [vmem:[#allocation2 + $0x634] ss:$8 sps:$4 sm:$0xff]  }
  0xfe   :  { %2753 = vmatprep.subr.bf16.mxu1 %v8033_v59  ;;  %v8111_v59 = vld [vmem:[#allocation2 + $0x734] ss:$8 sps:$4 sm:$0xff]  }
 0x100   :  { %2711 = vmatpush1.bf16.msra.mxu0 %v8028_v60  ;;  %v8106_v60 = vld [vmem:[#allocation2 + $0x630] ss:$8 sps:$4 sm:$0xff]  }
 0x101   :  { %2754 = vmatpush1.bf16.msra.mxu1 %v8031_v61  ;;  %2712 = vmatprep.subr.bf16.mxu0 %v8036_v62  ;;  %v8109_v61 = vld [vmem:[#allocation2 + $0x730] ss:$8 sps:$4 sm:$0xff]   ;;  %v8114_v62 = vld [vmem:[#allocation2 + $0x624] ss:$8 sps:$4 sm:$0xff]  }
 0x102   :  { %2755 = vmatprep.subr.bf16.mxu1 %v8039_v63  ;;  %v8117_v63 = vld [vmem:[#allocation2 + $0x724] ss:$8 sps:$4 sm:$0xff]  }
 0x104   :  { %2713 = vmatpush2.bf16.msra.mxu0 %v8034_v0  ;;  %v8112_v0 = vld [vmem:[#allocation2 + $0x620] ss:$8 sps:$4 sm:$0xff]  }
 0x105   :  { %2756 = vmatpush2.bf16.msra.mxu1 %v8037_v1  ;;  %2714 = vmatprep.subr.bf16.mxu0 %v8042_v2  ;;  %v8115_v1 = vld [vmem:[#allocation2 + $0x720] ss:$8 sps:$4 sm:$0xff]   ;;  %v8120_v2 = vld [vmem:[#allocation2 + $0x614] ss:$8 sps:$4 sm:$0xff]  }
 0x106   :  { %2757 = vmatprep.subr.bf16.mxu1 %v8045_v3  ;;  %v8123_v3 = vld [vmem:[#allocation2 + $0x714] ss:$8 sps:$4 sm:$0xff]  }
 0x108   :  { %2715 = vmatpush2.bf16.msra.mxu0 %v8040_v4  ;;  %v8118_v4 = vld [vmem:[#allocation2 + $0x610] ss:$8 sps:$4 sm:$0xff]  }
 0x109   :  { %2758 = vmatpush2.bf16.msra.mxu1 %v8043_v5  ;;  %2716 = vmatprep.subr.bf16.mxu0 %v8048_v6  ;;  %v8121_v5 = vld [vmem:[#allocation2 + $0x710] ss:$8 sps:$4 sm:$0xff]   ;;  %v8126_v6 = vld [vmem:[#allocation2 + $0x604] ss:$8 sps:$4 sm:$0xff]  }
 0x10a   :  { %2759 = vmatprep.subr.bf16.mxu1 %v8051_v7  ;;  %v8129_v7 = vld [vmem:[#allocation2 + $0x704] ss:$8 sps:$4 sm:$0xff]  }
 0x10c   :  { %2717 = vmatpush2.bf16.msra.mxu0 %v8046_v8  ;;  %v8124_v8 = vld [vmem:[#allocation2 + $0x600] ss:$8 sps:$4 sm:$0xff]  }
 0x10d   :  { %2760 = vmatpush2.bf16.msra.mxu1 %v8049_v9  ;;  %2718 = vmatprep.subr.bf16.mxu0 %v8054_v10  ;;  %v8127_v9 = vld [vmem:[#allocation2 + $0x700] ss:$8 sps:$4 sm:$0xff]   ;;  %v8132_v10 = vld [vmem:[#allocation2 + $0x6f4] ss:$8 sps:$4 sm:$0xff]  }
 0x10e   :  { %2761 = vmatprep.subr.bf16.mxu1 %v8057_v11  ;;  %v8135_v11 = vld [vmem:[#allocation2 + $0x7f4] ss:$8 sps:$4 sm:$0xff]  }
 0x110   :  { %2719 = vmatpush2.bf16.msra.mxu0 %v8052_v12  ;;  %v8130_v12 = vld [vmem:[#allocation2 + $0x6f0] ss:$8 sps:$4 sm:$0xff]  }
 0x111   :  { %2762 = vmatpush2.bf16.msra.mxu1 %v8055_v13  ;;  %2720 = vmatprep.subr.bf16.mxu0 %v8060_v14  ;;  %v8133_v13 = vld [vmem:[#allocation2 + $0x7f0] ss:$8 sps:$4 sm:$0xff]   ;;  %v8138_v14 = vld [vmem:[#allocation2 + $0x6e4] ss:$8 sps:$4 sm:$0xff]  }
 0x112   :  { %2763 = vmatprep.subr.bf16.mxu1 %v8063_v15  ;;  %v8141_v15 = vld [vmem:[#allocation2 + $0x7e4] ss:$8 sps:$4 sm:$0xff]  }
 0x114   :  { %2721 = vmatpush2.bf16.msra.mxu0 %v8058_v16  ;;  %v8136_v16 = vld [vmem:[#allocation2 + $0x6e0] ss:$8 sps:$4 sm:$0xff]  }
 0x115   :  { %2764 = vmatpush2.bf16.msra.mxu1 %v8061_v17  ;;  %2722 = vmatprep.subr.bf16.mxu0 %v8066_v18  ;;  %v8139_v17 = vld [vmem:[#allocation2 + $0x7e0] ss:$8 sps:$4 sm:$0xff]   ;;  %v8144_v18 = vld [vmem:[#allocation2 + $0x6d4] ss:$8 sps:$4 sm:$0xff]  }
 0x116   :  { %2765 = vmatprep.subr.bf16.mxu1 %v8069_v19  ;;  %v8147_v19 = vld [vmem:[#allocation2 + $0x7d4] ss:$8 sps:$4 sm:$0xff]  }
 0x118   :  { %2723 = vmatpush2.bf16.msra.mxu0 %v8064_v20  ;;  %v8142_v20 = vld [vmem:[#allocation2 + $0x6d0] ss:$8 sps:$4 sm:$0xff]  }
 0x119   :  { %2766 = vmatpush2.bf16.msra.mxu1 %v8067_v21  ;;  %2724 = vmatprep.subr.bf16.mxu0 %v8072_v22  ;;  %v8145_v21 = vld [vmem:[#allocation2 + $0x7d0] ss:$8 sps:$4 sm:$0xff]   ;;  %v8150_v22 = vld [vmem:[#allocation2 + $0x6c4] ss:$8 sps:$4 sm:$0xff]  }
 0x11a   :  { %2767 = vmatprep.subr.bf16.mxu1 %v8075_v23  ;;  %v8153_v23 = vld [vmem:[#allocation2 + $0x7c4] ss:$8 sps:$4 sm:$0xff]  }
 0x11c   :  { %2725 = vmatpush2.bf16.msra.mxu0 %v8070_v24  ;;  %v8148_v24 = vld [vmem:[#allocation2 + $0x6c0] ss:$8 sps:$4 sm:$0xff]  }
 0x11d   :  { %2768 = vmatpush2.bf16.msra.mxu1 %v8073_v25  ;;  %2726 = vmatprep.subr.bf16.mxu0 %v8078_v26  ;;  %v8151_v25 = vld [vmem:[#allocation2 + $0x7c0] ss:$8 sps:$4 sm:$0xff]   ;;  %v8156_v26 = vld [vmem:[#allocation2 + $0x6b4] ss:$8 sps:$4 sm:$0xff]  }
 0x11e   :  { %2769 = vmatprep.subr.bf16.mxu1 %v8081_v27  ;;  %v8159_v27 = vld [vmem:[#allocation2 + $0x7b4] ss:$8 sps:$4 sm:$0xff]  }
 0x120   :  { %2727 = vmatpush2.bf16.msra.mxu0 %v8076_v28  ;;  %v8154_v28 = vld [vmem:[#allocation2 + $0x6b0] ss:$8 sps:$4 sm:$0xff]  }
 0x121   :  { %2770 = vmatpush2.bf16.msra.mxu1 %v8079_v29  ;;  %2782 = vmatprep.subr.bf16.mxu0 %v8084_v34  ;;  %v8157_v29 = vld [vmem:[#allocation2 + $0x7b0] ss:$8 sps:$4 sm:$0xff]   ;;  %v8168_v34 = vld [vmem:[#allocation2 + $0x694] ss:$8 sps:$4 sm:$0xff]  }
 0x122   :  { %2825 = vmatprep.subr.bf16.mxu1 %v8087_v35  ;;  %v8171_v35 = vld [vmem:[#allocation2 + $0x794] ss:$8 sps:$4 sm:$0xff]  }
 0x123   :  { %2729 = vmatmul.mubr.bf16.vlgmr.msra.gmra.mxu0 %v192_v40  ;;  %v8172_v40 = vld [vmem:[#allocation2 + $0x680] ss:$8 sps:$4 sm:$0xff]  }
 0x124   :  { %2772 = vmatmul.mubr.bf16.vlgmr.msra.gmra.mxu1 %v194_v41  ;;  %2783 = vmatpush1.bf16.msra.mxu0 %v8082_v37  ;;  %v8169_v37 = vld [vmem:[#allocation2 + $0x790] ss:$8 sps:$4 sm:$0xff]   ;;  %v8175_v41 = vld [vmem:[#allocation2 + $0x780] ss:$8 sps:$4 sm:$0xff]  }
 0x125   :  { %2826 = vmatpush1.bf16.msra.mxu1 %v8085_v43  ;;  %2784 = vmatprep.subr.bf16.mxu0 %v8090_v44  ;;  %v172_v43 = vld [vmem:[%s9352_s0 + $0x120] sm:$0xff]  ;;  %v150_v44 = vld [vmem:[%s9352_s0 + $0x70] sm:$0xff] }
 0x126   :  { %2827 = vmatprep.subr.bf16.mxu1 %v8093_v45  ;;  %2814 = vmatprep.mubr.bf16.mxu0 %v197_v46  ;;  %v174_v45 = vld [vmem:[%s9352_s0 + $0x130] sm:$0xff] }
 0x127   :  { %2857 = vmatprep.mubr.bf16.mxu1 %v199_v47  ;;  %v8180_v46 = vld [vmem:[#allocation2 + $0x874] ss:$8 sps:$4 sm:$0xff]  }
 0x128   :  { %2785 = vmatpush1.bf16.msra.mxu0 %v8088_v48  ;;  %v8183_v47 = vld [vmem:[#allocation2 + $0x974] ss:$8 sps:$4 sm:$0xff]   ;;  %v153_v48 = vld [vmem:[%s9352_s0 + $0x88] sm:$0xff] }
 0x129   :  { %2828 = vmatpush1.bf16.msra.mxu1 %v8091_v49  ;;  %2786 = vmatprep.subr.bf16.mxu0 %v8096_v50  ;;  %v8178_v49 = vld [vmem:[#allocation2 + $0x870] ss:$8 sps:$4 sm:$0xff]   ;;  %v177_v50 = vld [vmem:[%s9352_s0 + $0x148] sm:$0xff] }
 0x12a   :  { %2829 = vmatprep.subr.bf16.mxu1 %v8099_v51  ;;  %v155_v51 = vld [vmem:[%s9352_s0 + $0x98] sm:$0xff] }
 0x12c   :  { %2787 = vmatpush1.bf16.msra.mxu0 %v8094_v52  ;;  %v196_v52 = vpack.c.bf16 %v172_v43, %v148_v42  ;;  %v8258_v42 = vld [vmem:[#allocation2 + $0x8a4] ss:$8 sps:$4 sm:$0xff]  }
 0x12d   :  { %2830 = vmatpush1.bf16.msra.mxu1 %v8097_v53  ;;  %2788 = vmatprep.subr.bf16.mxu0 %v8102_v54  ;;  %v198_v53 = vpack.c.bf16 %v174_v45, %v150_v44  ;;  %v179_v54 = vld [vmem:[%s9352_s0 + $0x158] sm:$0xff]  ;;  %v8261_v43 = vld [vmem:[#allocation2 + $0x9a4] ss:$8 sps:$4 sm:$0xff]   ;;  %v8256_v44 = vld [vmem:[#allocation2 + $0x8a0] ss:$8 sps:$4 sm:$0xff]  }
 0x12e   :  { %2831 = vmatprep.subr.bf16.mxu1 %v8105_v55  ;;  %v8181_v55 = vld [vmem:[#allocation2 + $0x970] ss:$8 sps:$4 sm:$0xff]   ;;  %v8259_v45 = vld [vmem:[#allocation2 + $0x9a0] ss:$8 sps:$4 sm:$0xff]  }
 0x130   :  { %2789 = vmatpush1.bf16.msra.mxu0 %v8100_v56  ;;  %v8186_v56 = vld [vmem:[#allocation2 + $0x864] ss:$8 sps:$4 sm:$0xff]  }
 0x131   :  { %2832 = vmatpush1.bf16.msra.mxu1 %v8103_v57  ;;  %2790 = vmatprep.subr.bf16.mxu0 %v8108_v58  ;;  %v8189_v57 = vld [vmem:[#allocation2 + $0x964] ss:$8 sps:$4 sm:$0xff]   ;;  %v201_v58 = vpack.c.bf16 %v177_v50, %v153_v48  ;;  %v8262_v48 = vld [vmem:[#allocation2 + $0x890] ss:$8 sps:$4 sm:$0xff]  }
 0x132   :  { %2833 = vmatprep.subr.bf16.mxu1 %v8111_v59  ;;  %v203_v59 = vpack.c.bf16 %v179_v54, %v155_v51  ;;  %v8270_v50 = vld [vmem:[#allocation2 + $0x884] ss:$8 sps:$4 sm:$0xff]  }
 0x133   :  { %v8273_v51 = vld [vmem:[#allocation2 + $0x984] ss:$8 sps:$4 sm:$0xff]  }
 0x134   :  { %2791 = vmatpush1.bf16.msra.mxu0 %v8106_v60  ;;  %v8184_v60 = vld [vmem:[#allocation2 + $0x860] ss:$8 sps:$4 sm:$0xff]  }
 0x135   :  { %2834 = vmatpush1.bf16.msra.mxu1 %v8109_v61  ;;  %2792 = vmatprep.subr.bf16.mxu0 %v8114_v62  ;;  %v8187_v61 = vld [vmem:[#allocation2 + $0x960] ss:$8 sps:$4 sm:$0xff]   ;;  %v8192_v62 = vld [vmem:[#allocation2 + $0x854] ss:$8 sps:$4 sm:$0xff]  }
 0x136   :  { %2835 = vmatprep.subr.bf16.mxu1 %v8117_v63  ;;  %v8195_v63 = vld [vmem:[#allocation2 + $0x954] ss:$8 sps:$4 sm:$0xff]   ;;  %v152_v54 = vld [vmem:[%s9352_s0 + $0x80] sm:$0xff] }
 0x138   :  { %2793 = vmatpush1.bf16.msra.mxu0 %v8112_v0  ;;  %v8190_v0 = vld [vmem:[#allocation2 + $0x850] ss:$8 sps:$4 sm:$0xff]  }
 0x139   :  { %2836 = vmatpush1.bf16.msra.mxu1 %v8115_v1  ;;  %2794 = vmatprep.subr.bf16.mxu0 %v8120_v2  ;;  %v8193_v1 = vld [vmem:[#allocation2 + $0x950] ss:$8 sps:$4 sm:$0xff]   ;;  %v8198_v2 = vld [vmem:[#allocation2 + $0x844] ss:$8 sps:$4 sm:$0xff]  }
 0x13a   :  { %2837 = vmatprep.subr.bf16.mxu1 %v8123_v3  ;;  %v8201_v3 = vld [vmem:[#allocation2 + $0x944] ss:$8 sps:$4 sm:$0xff]  }
 0x13c   :  { %2795 = vmatpush1.bf16.msra.mxu0 %v8118_v4  ;;  %v8196_v4 = vld [vmem:[#allocation2 + $0x840] ss:$8 sps:$4 sm:$0xff]  }
 0x13d   :  { %2838 = vmatpush1.bf16.msra.mxu1 %v8121_v5  ;;  %2796 = vmatprep.subr.bf16.mxu0 %v8126_v6  ;;  %v8199_v5 = vld [vmem:[#allocation2 + $0x940] ss:$8 sps:$4 sm:$0xff]   ;;  %v8204_v6 = vld [vmem:[#allocation2 + $0x834] ss:$8 sps:$4 sm:$0xff]  }
 0x13e   :  { %2839 = vmatprep.subr.bf16.mxu1 %v8129_v7  ;;  %v8207_v7 = vld [vmem:[#allocation2 + $0x934] ss:$8 sps:$4 sm:$0xff]  }
 0x140   :  { %2797 = vmatpush1.bf16.msra.mxu0 %v8124_v8  ;;  %v8202_v8 = vld [vmem:[#allocation2 + $0x830] ss:$8 sps:$4 sm:$0xff]  }
 0x141   :  { %2840 = vmatpush1.bf16.msra.mxu1 %v8127_v9  ;;  %2798 = vmatprep.subr.bf16.mxu0 %v8132_v10  ;;  %v8205_v9 = vld [vmem:[#allocation2 + $0x930] ss:$8 sps:$4 sm:$0xff]   ;;  %v8210_v10 = vld [vmem:[#allocation2 + $0x824] ss:$8 sps:$4 sm:$0xff]  }
 0x142   :  { %2841 = vmatprep.subr.bf16.mxu1 %v8135_v11  ;;  %v8213_v11 = vld [vmem:[#allocation2 + $0x924] ss:$8 sps:$4 sm:$0xff]  }
 0x144   :  { %2799 = vmatpush2.bf16.msra.mxu0 %v8130_v12  ;;  %v8208_v12 = vld [vmem:[#allocation2 + $0x820] ss:$8 sps:$4 sm:$0xff]  }
 0x145   :  { %2842 = vmatpush2.bf16.msra.mxu1 %v8133_v13  ;;  %2800 = vmatprep.subr.bf16.mxu0 %v8138_v14  ;;  %v8211_v13 = vld [vmem:[#allocation2 + $0x920] ss:$8 sps:$4 sm:$0xff]   ;;  %v8216_v14 = vld [vmem:[#allocation2 + $0x814] ss:$8 sps:$4 sm:$0xff]  }
 0x146   :  { %2843 = vmatprep.subr.bf16.mxu1 %v8141_v15  ;;  %v8219_v15 = vld [vmem:[#allocation2 + $0x914] ss:$8 sps:$4 sm:$0xff]  }
 0x148   :  { %2801 = vmatpush2.bf16.msra.mxu0 %v8136_v16  ;;  %v8214_v16 = vld [vmem:[#allocation2 + $0x810] ss:$8 sps:$4 sm:$0xff]  }
 0x149   :  { %2844 = vmatpush2.bf16.msra.mxu1 %v8139_v17  ;;  %2802 = vmatprep.subr.bf16.mxu0 %v8144_v18  ;;  %v8217_v17 = vld [vmem:[#allocation2 + $0x910] ss:$8 sps:$4 sm:$0xff]   ;;  %v8222_v18 = vld [vmem:[#allocation2 + $0x804] ss:$8 sps:$4 sm:$0xff]  }
 0x14a   :  { %2845 = vmatprep.subr.bf16.mxu1 %v8147_v19  ;;  %v8225_v19 = vld [vmem:[#allocation2 + $0x904] ss:$8 sps:$4 sm:$0xff]  }
 0x14c   :  { %2803 = vmatpush2.bf16.msra.mxu0 %v8142_v20  ;;  %v8220_v20 = vld [vmem:[#allocation2 + $0x800] ss:$8 sps:$4 sm:$0xff]  }
 0x14d   :  { %2846 = vmatpush2.bf16.msra.mxu1 %v8145_v21  ;;  %2804 = vmatprep.subr.bf16.mxu0 %v8150_v22  ;;  %v8223_v21 = vld [vmem:[#allocation2 + $0x900] ss:$8 sps:$4 sm:$0xff]   ;;  %v8228_v22 = vld [vmem:[#allocation2 + $0x8f4] ss:$8 sps:$4 sm:$0xff]  }
 0x14e   :  { %2847 = vmatprep.subr.bf16.mxu1 %v8153_v23  ;;  %v8231_v23 = vld [vmem:[#allocation2 + $0x9f4] ss:$8 sps:$4 sm:$0xff]  }
 0x150   :  { %2805 = vmatpush2.bf16.msra.mxu0 %v8148_v24  ;;  %v8226_v24 = vld [vmem:[#allocation2 + $0x8f0] ss:$8 sps:$4 sm:$0xff]  }
 0x151   :  { %2848 = vmatpush2.bf16.msra.mxu1 %v8151_v25  ;;  %2806 = vmatprep.subr.bf16.mxu0 %v8156_v26  ;;  %v8229_v25 = vld [vmem:[#allocation2 + $0x9f0] ss:$8 sps:$4 sm:$0xff]   ;;  %v8234_v26 = vld [vmem:[#allocation2 + $0x8e4] ss:$8 sps:$4 sm:$0xff]  }
 0x152   :  { %2849 = vmatprep.subr.bf16.mxu1 %v8159_v27  ;;  %v8237_v27 = vld [vmem:[#allocation2 + $0x9e4] ss:$8 sps:$4 sm:$0xff]  }
 0x154   :  { %2807 = vmatpush2.bf16.msra.mxu0 %v8154_v28  ;;  %v8232_v28 = vld [vmem:[#allocation2 + $0x8e0] ss:$8 sps:$4 sm:$0xff]  }
 0x155   :  { %2850 = vmatpush2.bf16.msra.mxu1 %v8157_v29  ;;  %2808 = vmatprep.subr.bf16.mxu0 %v8162_v30  ;;  %v8235_v29 = vld [vmem:[#allocation2 + $0x9e0] ss:$8 sps:$4 sm:$0xff]   ;;  %v8240_v30 = vld [vmem:[#allocation2 + $0x8d4] ss:$8 sps:$4 sm:$0xff]  }
 0x156   :  { %2851 = vmatprep.subr.bf16.mxu1 %v8165_v31  ;;  %v8243_v31 = vld [vmem:[#allocation2 + $0x9d4] ss:$8 sps:$4 sm:$0xff]  }
 0x158   :  { %2809 = vmatpush2.bf16.msra.mxu0 %v8160_v32  ;;  %v8238_v32 = vld [vmem:[#allocation2 + $0x8d0] ss:$8 sps:$4 sm:$0xff]  }
 0x159   :  { %2852 = vmatpush2.bf16.msra.mxu1 %v8163_v33  ;;  %2810 = vmatprep.subr.bf16.mxu0 %v8168_v34  ;;  %v8241_v33 = vld [vmem:[#allocation2 + $0x9d0] ss:$8 sps:$4 sm:$0xff]   ;;  %v8246_v34 = vld [vmem:[#allocation2 + $0x8c4] ss:$8 sps:$4 sm:$0xff]  }
 0x15a   :  { %2853 = vmatprep.subr.bf16.mxu1 %v8171_v35  ;;  %v8249_v35 = vld [vmem:[#allocation2 + $0x9c4] ss:$8 sps:$4 sm:$0xff]  }
 0x15c   :  { %2811 = vmatpush2.bf16.msra.mxu0 %v8166_v36  ;;  %v8244_v36 = vld [vmem:[#allocation2 + $0x8c0] ss:$8 sps:$4 sm:$0xff]  }
 0x15d   :  { %2854 = vmatpush2.bf16.msra.mxu1 %v8169_v37  ;;  %2812 = vmatprep.subr.bf16.mxu0 %v8174_v38  ;;  %v8247_v37 = vld [vmem:[#allocation2 + $0x9c0] ss:$8 sps:$4 sm:$0xff]   ;;  %v8252_v38 = vld [vmem:[#allocation2 + $0x8b4] ss:$8 sps:$4 sm:$0xff]  }
 0x15e   :  { %2855 = vmatprep.subr.bf16.mxu1 %v8177_v39  ;;  %v8255_v39 = vld [vmem:[#allocation2 + $0x9b4] ss:$8 sps:$4 sm:$0xff]  }
 0x160   :  { %2813 = vmatpush2.bf16.msra.mxu0 %v8172_v40  ;;  %v8250_v40 = vld [vmem:[#allocation2 + $0x8b0] ss:$8 sps:$4 sm:$0xff]  }
 0x161   :  { %2856 = vmatpush2.bf16.msra.mxu1 %v8175_v41  ;;  %2868 = vmatprep.subr.bf16.mxu0 %v8180_v46  ;;  %v8253_v41 = vld [vmem:[#allocation2 + $0x9b0] ss:$8 sps:$4 sm:$0xff]   ;;  %v8264_v46 = vld [vmem:[#allocation2 + $0x894] ss:$8 sps:$4 sm:$0xff]  }
 0x162   :  { %2911 = vmatprep.subr.bf16.mxu1 %v8183_v47  ;;  %v8267_v47 = vld [vmem:[#allocation2 + $0x994] ss:$8 sps:$4 sm:$0xff]  }
 0x163   :  { %2815 = vmatmul.mubr.bf16.vlgmr.msra.gmra.mxu0 %v196_v52  ;;  %v8268_v52 = vld [vmem:[#allocation2 + $0x880] ss:$8 sps:$4 sm:$0xff]  }
 0x164   :  { %2858 = vmatmul.mubr.bf16.vlgmr.msra.gmra.mxu1 %v198_v53  ;;  %2869 = vmatpush1.bf16.msra.mxu0 %v8178_v49  ;;  %v8265_v49 = vld [vmem:[#allocation2 + $0x990] ss:$8 sps:$4 sm:$0xff]   ;;  %v8271_v53 = vld [vmem:[#allocation2 + $0x980] ss:$8 sps:$4 sm:$0xff]  }
 0x165   :  { %2912 = vmatpush1.bf16.msra.mxu1 %v8181_v55  ;;  %2870 = vmatprep.subr.bf16.mxu0 %v8186_v56  ;;  %v176_v55 = vld [vmem:[%s9352_s0 + $0x140] sm:$0xff]  ;;  %v154_v56 = vld [vmem:[%s9352_s0 + $0x90] sm:$0xff] }
 0x166   :  { %2913 = vmatprep.subr.bf16.mxu1 %v8189_v57  ;;  %2900 = vmatprep.mubr.bf16.mxu0 %v201_v58  ;;  %v178_v57 = vld [vmem:[%s9352_s0 + $0x150] sm:$0xff] }
 0x167   :  { %2943 = vmatprep.mubr.bf16.mxu1 %v203_v59  ;;  %v8276_v58 = vld [vmem:[#allocation2 + $0xa74] ss:$8 sps:$4 sm:$0xff]  }
 0x168   :  { %2871 = vmatpush1.bf16.msra.mxu0 %v8184_v60  ;;  %v8279_v59 = vld [vmem:[#allocation2 + $0xb74] ss:$8 sps:$4 sm:$0xff]   ;;  %v157_v60 = vld [vmem:[%s9352_s0 + $0xa8] sm:$0xff] }
 0x169   :  { %2914 = vmatpush1.bf16.msra.mxu1 %v8187_v61  ;;  %2872 = vmatprep.subr.bf16.mxu0 %v8192_v62  ;;  %v200_v61 = vpack.c.bf16 %v176_v55, %v152_v54  ;;  %v202_v62 = vpack.c.bf16 %v178_v57, %v154_v56  ;;  %v8354_v54 = vld [vmem:[#allocation2 + $0xaa4] ss:$8 sps:$4 sm:$0xff]   ;;  %v8352_v56 = vld [vmem:[#allocation2 + $0xaa0] ss:$8 sps:$4 sm:$0xff]  }
 0x16a   :  { %2915 = vmatprep.subr.bf16.mxu1 %v8195_v63  ;;  %v181_v63 = vld [vmem:[%s9352_s0 + $0x168] sm:$0xff] }
 0x16b   :  { %v8357_v55 = vld [vmem:[#allocation2 + $0xba4] ss:$8 sps:$4 sm:$0xff]   ;;  %v8355_v57 = vld [vmem:[#allocation2 + $0xba0] ss:$8 sps:$4 sm:$0xff]  }
 0x16c   :  { %2873 = vmatpush1.bf16.msra.mxu0 %v8190_v0  ;;  %v159_v0 = vld [vmem:[%s9352_s0 + $0xb8] sm:$0xff] }
 0x16d   :  { %2916 = vmatpush1.bf16.msra.mxu1 %v8193_v1  ;;  %2874 = vmatprep.subr.bf16.mxu0 %v8198_v2  ;;  %v183_v1 = vld [vmem:[%s9352_s0 + $0x178] sm:$0xff] }
 0x16e   :  { %2917 = vmatprep.subr.bf16.mxu1 %v8201_v3  ;;  %v8274_v2 = vld [vmem:[#allocation2 + $0xa70] ss:$8 sps:$4 sm:$0xff]  }
 0x16f   :  { %v8277_v3 = vld [vmem:[#allocation2 + $0xb70] ss:$8 sps:$4 sm:$0xff]  }
 0x170   :  { %2875 = vmatpush1.bf16.msra.mxu0 %v8196_v4  ;;  %v8282_v4 = vld [vmem:[#allocation2 + $0xa64] ss:$8 sps:$4 sm:$0xff]  }
 0x171   :  { %2918 = vmatpush1.bf16.msra.mxu1 %v8199_v5  ;;  %2876 = vmatprep.subr.bf16.mxu0 %v8204_v6  ;;  %v8285_v5 = vld [vmem:[#allocation2 + $0xb64] ss:$8 sps:$4 sm:$0xff]   ;;  %v205_v6 = vpack.c.bf16 %v181_v63, %v157_v60  ;;  %v8358_v60 = vld [vmem:[#allocation2 + $0xa90] ss:$8 sps:$4 sm:$0xff]  }
 0x172   :  { %2919 = vmatprep.subr.bf16.mxu1 %v8207_v7  ;;  %v207_v7 = vpack.c.bf16 %v183_v1, %v159_v0  ;;  %v8369_v63 = vld [vmem:[#allocation2 + $0xb84] ss:$8 sps:$4 sm:$0xff]   ;;  %v8364_v0 = vld [vmem:[#allocation2 + $0xa80] ss:$8 sps:$4 sm:$0xff]  }
 0x173   :  { %v8367_v1 = vld [vmem:[#allocation2 + $0xb80] ss:$8 sps:$4 sm:$0xff]  }
 0x174   :  { %2877 = vmatpush1.bf16.msra.mxu0 %v8202_v8  ;;  %v8280_v8 = vld [vmem:[#allocation2 + $0xa60] ss:$8 sps:$4 sm:$0xff]  }
 0x175   :  { %2920 = vmatpush1.bf16.msra.mxu1 %v8205_v9  ;;  %2878 = vmatprep.subr.bf16.mxu0 %v8210_v10  ;;  %v8283_v9 = vld [vmem:[#allocation2 + $0xb60] ss:$8 sps:$4 sm:$0xff]   ;;  %v8288_v10 = vld [vmem:[#allocation2 + $0xa54] ss:$8 sps:$4 sm:$0xff]  }
 0x176   :  { %2921 = vmatprep.subr.bf16.mxu1 %v8213_v11  ;;  %v8291_v11 = vld [vmem:[#allocation2 + $0xb54] ss:$8 sps:$4 sm:$0xff]  }
 0x178   :  { %2879 = vmatpush1.bf16.msra.mxu0 %v8208_v12  ;;  %v8286_v12 = vld [vmem:[#allocation2 + $0xa50] ss:$8 sps:$4 sm:$0xff]  }
 0x179   :  { %2922 = vmatpush1.bf16.msra.mxu1 %v8211_v13  ;;  %2880 = vmatprep.subr.bf16.mxu0 %v8216_v14  ;;  %v8289_v13 = vld [vmem:[#allocation2 + $0xb50] ss:$8 sps:$4 sm:$0xff]   ;;  %v8294_v14 = vld [vmem:[#allocation2 + $0xa44] ss:$8 sps:$4 sm:$0xff]  }
 0x17a   :  { %2923 = vmatprep.subr.bf16.mxu1 %v8219_v15  ;;  %v8297_v15 = vld [vmem:[#allocation2 + $0xb44] ss:$8 sps:$4 sm:$0xff]  }
 0x17c   :  { %2881 = vmatpush1.bf16.msra.mxu0 %v8214_v16  ;;  %v8292_v16 = vld [vmem:[#allocation2 + $0xa40] ss:$8 sps:$4 sm:$0xff]  }
 0x17d   :  { %2924 = vmatpush1.bf16.msra.mxu1 %v8217_v17  ;;  %2882 = vmatprep.subr.bf16.mxu0 %v8222_v18  ;;  %v8295_v17 = vld [vmem:[#allocation2 + $0xb40] ss:$8 sps:$4 sm:$0xff]   ;;  %v8300_v18 = vld [vmem:[#allocation2 + $0xa34] ss:$8 sps:$4 sm:$0xff]  }
 0x17e   :  { %2925 = vmatprep.subr.bf16.mxu1 %v8225_v19  ;;  %v8303_v19 = vld [vmem:[#allocation2 + $0xb34] ss:$8 sps:$4 sm:$0xff]  }
 0x180   :  { %2883 = vmatpush1.bf16.msra.mxu0 %v8220_v20  ;;  %v8298_v20 = vld [vmem:[#allocation2 + $0xa30] ss:$8 sps:$4 sm:$0xff]  }
 0x181   :  { %2926 = vmatpush1.bf16.msra.mxu1 %v8223_v21  ;;  %2884 = vmatprep.subr.bf16.mxu0 %v8228_v22  ;;  %v8301_v21 = vld [vmem:[#allocation2 + $0xb30] ss:$8 sps:$4 sm:$0xff]   ;;  %v8306_v22 = vld [vmem:[#allocation2 + $0xa24] ss:$8 sps:$4 sm:$0xff]  }
 0x182   :  { %2927 = vmatprep.subr.bf16.mxu1 %v8231_v23  ;;  %v8309_v23 = vld [vmem:[#allocation2 + $0xb24] ss:$8 sps:$4 sm:$0xff]  }
 0x184   :  { %2885 = vmatpush2.bf16.msra.mxu0 %v8226_v24  ;;  %v8304_v24 = vld [vmem:[#allocation2 + $0xa20] ss:$8 sps:$4 sm:$0xff]  }
 0x185   :  { %2928 = vmatpush2.bf16.msra.mxu1 %v8229_v25  ;;  %2886 = vmatprep.subr.bf16.mxu0 %v8234_v26  ;;  %v8307_v25 = vld [vmem:[#allocation2 + $0xb20] ss:$8 sps:$4 sm:$0xff]   ;;  %v8312_v26 = vld [vmem:[#allocation2 + $0xa14] ss:$8 sps:$4 sm:$0xff]  }
 0x186   :  { %2929 = vmatprep.subr.bf16.mxu1 %v8237_v27  ;;  %v8315_v27 = vld [vmem:[#allocation2 + $0xb14] ss:$8 sps:$4 sm:$0xff]  }
 0x188   :  { %2887 = vmatpush2.bf16.msra.mxu0 %v8232_v28  ;;  %v8310_v28 = vld [vmem:[#allocation2 + $0xa10] ss:$8 sps:$4 sm:$0xff]  }
 0x189   :  { %2930 = vmatpush2.bf16.msra.mxu1 %v8235_v29  ;;  %2888 = vmatprep.subr.bf16.mxu0 %v8240_v30  ;;  %v8313_v29 = vld [vmem:[#allocation2 + $0xb10] ss:$8 sps:$4 sm:$0xff]   ;;  %v8318_v30 = vld [vmem:[#allocation2 + $0xa04] ss:$8 sps:$4 sm:$0xff]  }
 0x18a   :  { %2931 = vmatprep.subr.bf16.mxu1 %v8243_v31  ;;  %v8321_v31 = vld [vmem:[#allocation2 + $0xb04] ss:$8 sps:$4 sm:$0xff]  }
 0x18c   :  { %2889 = vmatpush2.bf16.msra.mxu0 %v8238_v32  ;;  %v8316_v32 = vld [vmem:[#allocation2 + $0xa00] ss:$8 sps:$4 sm:$0xff]  }
 0x18d   :  { %2932 = vmatpush2.bf16.msra.mxu1 %v8241_v33  ;;  %2890 = vmatprep.subr.bf16.mxu0 %v8246_v34  ;;  %v8319_v33 = vld [vmem:[#allocation2 + $0xb00] ss:$8 sps:$4 sm:$0xff]   ;;  %v8324_v34 = vld [vmem:[#allocation2 + $0xaf4] ss:$8 sps:$4 sm:$0xff]  }
 0x18e   :  { %2933 = vmatprep.subr.bf16.mxu1 %v8249_v35  ;;  %v8327_v35 = vld [vmem:[#allocation2 + $0xbf4] ss:$8 sps:$4 sm:$0xff]  }
 0x190   :  { %2891 = vmatpush2.bf16.msra.mxu0 %v8244_v36  ;;  %v8322_v36 = vld [vmem:[#allocation2 + $0xaf0] ss:$8 sps:$4 sm:$0xff]  }
 0x191   :  { %2934 = vmatpush2.bf16.msra.mxu1 %v8247_v37  ;;  %2892 = vmatprep.subr.bf16.mxu0 %v8252_v38  ;;  %v8325_v37 = vld [vmem:[#allocation2 + $0xbf0] ss:$8 sps:$4 sm:$0xff]   ;;  %v8330_v38 = vld [vmem:[#allocation2 + $0xae4] ss:$8 sps:$4 sm:$0xff]  }
 0x192   :  { %2935 = vmatprep.subr.bf16.mxu1 %v8255_v39  ;;  %v8333_v39 = vld [vmem:[#allocation2 + $0xbe4] ss:$8 sps:$4 sm:$0xff]  }
 0x194   :  { %2893 = vmatpush2.bf16.msra.mxu0 %v8250_v40  ;;  %v8328_v40 = vld [vmem:[#allocation2 + $0xae0] ss:$8 sps:$4 sm:$0xff]  }
 0x195   :  { %2936 = vmatpush2.bf16.msra.mxu1 %v8253_v41  ;;  %2894 = vmatprep.subr.bf16.mxu0 %v8258_v42  ;;  %v8331_v41 = vld [vmem:[#allocation2 + $0xbe0] ss:$8 sps:$4 sm:$0xff]   ;;  %v8336_v42 = vld [vmem:[#allocation2 + $0xad4] ss:$8 sps:$4 sm:$0xff]  }
 0x196   :  { %2937 = vmatprep.subr.bf16.mxu1 %v8261_v43  ;;  %v8339_v43 = vld [vmem:[#allocation2 + $0xbd4] ss:$8 sps:$4 sm:$0xff]  }
 0x198   :  { %2895 = vmatpush2.bf16.msra.mxu0 %v8256_v44  ;;  %v8334_v44 = vld [vmem:[#allocation2 + $0xad0] ss:$8 sps:$4 sm:$0xff]  }
 0x199   :  { %2938 = vmatpush2.bf16.msra.mxu1 %v8259_v45  ;;  %2896 = vmatprep.subr.bf16.mxu0 %v8264_v46  ;;  %v8337_v45 = vld [vmem:[#allocation2 + $0xbd0] ss:$8 sps:$4 sm:$0xff]   ;;  %v8342_v46 = vld [vmem:[#allocation2 + $0xac4] ss:$8 sps:$4 sm:$0xff]  }
 0x19a   :  { %2939 = vmatprep.subr.bf16.mxu1 %v8267_v47  ;;  %v8345_v47 = vld [vmem:[#allocation2 + $0xbc4] ss:$8 sps:$4 sm:$0xff]  }
 0x19c   :  { %2897 = vmatpush2.bf16.msra.mxu0 %v8262_v48  ;;  %v8340_v48 = vld [vmem:[#allocation2 + $0xac0] ss:$8 sps:$4 sm:$0xff]  }
 0x19d   :  { %2940 = vmatpush2.bf16.msra.mxu1 %v8265_v49  ;;  %2898 = vmatprep.subr.bf16.mxu0 %v8270_v50  ;;  %v8343_v49 = vld [vmem:[#allocation2 + $0xbc0] ss:$8 sps:$4 sm:$0xff]   ;;  %v8348_v50 = vld [vmem:[#allocation2 + $0xab4] ss:$8 sps:$4 sm:$0xff]  }
 0x19e   :  { %2941 = vmatprep.subr.bf16.mxu1 %v8273_v51  ;;  %v8351_v51 = vld [vmem:[#allocation2 + $0xbb4] ss:$8 sps:$4 sm:$0xff]  }
 0x1a0   :  { %2899 = vmatpush2.bf16.msra.mxu0 %v8268_v52  ;;  %v8346_v52 = vld [vmem:[#allocation2 + $0xab0] ss:$8 sps:$4 sm:$0xff]  }
 0x1a1   :  { %2942 = vmatpush2.bf16.msra.mxu1 %v8271_v53  ;;  %2954 = vmatprep.subr.bf16.mxu0 %v8276_v58  ;;  %v8349_v53 = vld [vmem:[#allocation2 + $0xbb0] ss:$8 sps:$4 sm:$0xff]   ;;  %v8360_v58 = vld [vmem:[#allocation2 + $0xa94] ss:$8 sps:$4 sm:$0xff]  }
 0x1a2   :  { %2997 = vmatprep.subr.bf16.mxu1 %v8279_v59  ;;  %v8363_v59 = vld [vmem:[#allocation2 + $0xb94] ss:$8 sps:$4 sm:$0xff]  }
 0x1a3   :  { %2901 = vmatmul.mubr.bf16.vlgmr.msra.gmra.mxu0 %v200_v61  ;;  %v8361_v61 = vld [vmem:[#allocation2 + $0xb90] ss:$8 sps:$4 sm:$0xff]  }
 0x1a4   :  { %2944 = vmatmul.mubr.bf16.vlgmr.msra.gmra.mxu1 %v202_v62  ;;  %2955 = vmatpush1.bf16.msra.mxu0 %v8274_v2  ;;  %v8366_v62 = vld [vmem:[#allocation2 + $0xa84] ss:$8 sps:$4 sm:$0xff]  }
 0x1a5   :  { %2998 = vmatpush1.bf16.msra.mxu1 %v8277_v3  ;;  %2956 = vmatprep.subr.bf16.mxu0 %v8282_v4  ;;  %v156_v2 = vld [vmem:[%s9352_s0 + $0xa0] sm:$0xff]  ;;  %v158_v4 = vld [vmem:[%s9352_s0 + $0xb0] sm:$0xff] }
 0x1a6   :  { %2999 = vmatprep.subr.bf16.mxu1 %v8285_v5  ;;  %2986 = vmatprep.mubr.bf16.mxu0 %v205_v6  ;;  %v180_v3 = vld [vmem:[%s9352_s0 + $0x160] sm:$0xff]  ;;  %v182_v5 = vld [vmem:[%s9352_s0 + $0x170] sm:$0xff] }
 0x1a7   :  { %3029 = vmatprep.mubr.bf16.mxu1 %v207_v7  ;;  %v204_v6 = vpack.c.bf16 %v180_v3, %v156_v2  ;;  %v206_v7 = vpack.c.bf16 %v182_v5, %v158_v4  ;;  %v8456_v2 = vld [vmem:[#allocation10 + $0xb4] ss:$8 sps:$4 sm:$0xff]   ;;  %v8454_v5 = vld [vmem:[#allocation10 + $0xb0] ss:$8 sps:$4 sm:$0xff]  }
 0x1a8   :  { %2957 = vmatpush1.bf16.msra.mxu0 %v8280_v8  ;;  %v8370_v8 = vld [vmem:[#allocation7 + $0x70] ss:$8 sps:$4 sm:$0xff]  }
 0x1a9   :  { %3000 = vmatpush1.bf16.msra.mxu1 %v8283_v9  ;;  %2958 = vmatprep.subr.bf16.mxu0 %v8288_v10  ;;  %v8372_v9 = vld [vmem:[#allocation7 + $0x74] ss:$8 sps:$4 sm:$0xff]   ;;  %v8375_v10 = vld [vmem:[#allocation7 + $0x64] ss:$8 sps:$4 sm:$0xff]  }
 0x1aa   :  { %3001 = vmatprep.subr.bf16.mxu1 %v8291_v11  ;;  %v8373_v11 = vld [vmem:[#allocation7 + $0x60] ss:$8 sps:$4 sm:$0xff]  }
 0x1ac   :  { %2959 = vmatpush1.bf16.msra.mxu0 %v8286_v12  ;;  %v8378_v12 = vld [vmem:[#allocation7 + $0x54] ss:$8 sps:$4 sm:$0xff]  }
 0x1ad   :  { %3002 = vmatpush1.bf16.msra.mxu1 %v8289_v13  ;;  %2960 = vmatprep.subr.bf16.mxu0 %v8294_v14  ;;  %v8376_v13 = vld [vmem:[#allocation7 + $0x50] ss:$8 sps:$4 sm:$0xff]   ;;  %v8381_v14 = vld [vmem:[#allocation7 + $0x44] ss:$8 sps:$4 sm:$0xff]  }
 0x1ae   :  { %3003 = vmatprep.subr.bf16.mxu1 %v8297_v15  ;;  %v8379_v15 = vld [vmem:[#allocation7 + $0x40] ss:$8 sps:$4 sm:$0xff]  }
 0x1b0   :  { %2961 = vmatpush1.bf16.msra.mxu0 %v8292_v16  ;;  %v8384_v16 = vld [vmem:[#allocation7 + $0x34] ss:$8 sps:$4 sm:$0xff]  }
 0x1b1   :  { %3004 = vmatpush1.bf16.msra.mxu1 %v8295_v17  ;;  %2962 = vmatprep.subr.bf16.mxu0 %v8300_v18  ;;  %v8382_v17 = vld [vmem:[#allocation7 + $0x30] ss:$8 sps:$4 sm:$0xff]   ;;  %v8387_v18 = vld [vmem:[#allocation7 + $0x24] ss:$8 sps:$4 sm:$0xff]  }
 0x1b2   :  { %3005 = vmatprep.subr.bf16.mxu1 %v8303_v19  ;;  %v8385_v19 = vld [vmem:[#allocation7 + $0x20] ss:$8 sps:$4 sm:$0xff]  }
 0x1b4   :  { %2963 = vmatpush1.bf16.msra.mxu0 %v8298_v20  ;;  %v8390_v20 = vld [vmem:[#allocation7 + $0x14] ss:$8 sps:$4 sm:$0xff]  }
 0x1b5   :  { %3006 = vmatpush1.bf16.msra.mxu1 %v8301_v21  ;;  %2964 = vmatprep.subr.bf16.mxu0 %v8306_v22  ;;  %v8388_v21 = vld [vmem:[#allocation7 + $0x10] ss:$8 sps:$4 sm:$0xff]   ;;  %v8393_v22 = vld [vmem:[#allocation7 + $0x4] ss:$8 sps:$4 sm:$0xff]  }
 0x1b6   :  { %3007 = vmatprep.subr.bf16.mxu1 %v8309_v23  ;;  %v8391_v23 = vld [vmem:[#allocation7] ss:$8 sps:$4 sm:$0xff]  }
 0x1b8   :  { %2965 = vmatpush1.bf16.msra.mxu0 %v8304_v24  ;;  %v8396_v24 = vld [vmem:[#allocation7 + $0xf4] ss:$8 sps:$4 sm:$0xff]  }
 0x1b9   :  { %3008 = vmatpush1.bf16.msra.mxu1 %v8307_v25  ;;  %2966 = vmatprep.subr.bf16.mxu0 %v8312_v26  ;;  %v8394_v25 = vld [vmem:[#allocation7 + $0xf0] ss:$8 sps:$4 sm:$0xff]   ;;  %v8399_v26 = vld [vmem:[#allocation7 + $0xe4] ss:$8 sps:$4 sm:$0xff]  }
 0x1ba   :  { %3009 = vmatprep.subr.bf16.mxu1 %v8315_v27  ;;  %v8397_v27 = vld [vmem:[#allocation7 + $0xe0] ss:$8 sps:$4 sm:$0xff]  }
 0x1bc   :  { %2967 = vmatpush1.bf16.msra.mxu0 %v8310_v28  ;;  %v8402_v28 = vld [vmem:[#allocation7 + $0xd4] ss:$8 sps:$4 sm:$0xff]  }
 0x1bd   :  { %3010 = vmatpush1.bf16.msra.mxu1 %v8313_v29  ;;  %2968 = vmatprep.subr.bf16.mxu0 %v8318_v30  ;;  %v8400_v29 = vld [vmem:[#allocation7 + $0xd0] ss:$8 sps:$4 sm:$0xff]   ;;  %v8405_v30 = vld [vmem:[#allocation7 + $0xc4] ss:$8 sps:$4 sm:$0xff]  }
 0x1be   :  { %3011 = vmatprep.subr.bf16.mxu1 %v8321_v31  ;;  %v8403_v31 = vld [vmem:[#allocation7 + $0xc0] ss:$8 sps:$4 sm:$0xff]  }
 0x1c0   :  { %2969 = vmatpush1.bf16.msra.mxu0 %v8316_v32  ;;  %v8408_v32 = vld [vmem:[#allocation7 + $0xb4] ss:$8 sps:$4 sm:$0xff]  }
 0x1c1   :  { %3012 = vmatpush1.bf16.msra.mxu1 %v8319_v33  ;;  %2970 = vmatprep.subr.bf16.mxu0 %v8324_v34  ;;  %v8406_v33 = vld [vmem:[#allocation7 + $0xb0] ss:$8 sps:$4 sm:$0xff]   ;;  %v8411_v34 = vld [vmem:[#allocation7 + $0xa4] ss:$8 sps:$4 sm:$0xff]  }
 0x1c2   :  { %3013 = vmatprep.subr.bf16.mxu1 %v8327_v35  ;;  %v8409_v35 = vld [vmem:[#allocation7 + $0xa0] ss:$8 sps:$4 sm:$0xff]  }
 0x1c4   :  { %2971 = vmatpush2.bf16.msra.mxu0 %v8322_v36  ;;  %v8414_v36 = vld [vmem:[#allocation7 + $0x94] ss:$8 sps:$4 sm:$0xff]  }
 0x1c5   :  { %3014 = vmatpush2.bf16.msra.mxu1 %v8325_v37  ;;  %2972 = vmatprep.subr.bf16.mxu0 %v8330_v38  ;;  %v8412_v37 = vld [vmem:[#allocation7 + $0x90] ss:$8 sps:$4 sm:$0xff]   ;;  %v8417_v38 = vld [vmem:[#allocation7 + $0x84] ss:$8 sps:$4 sm:$0xff]  }
 0x1c6   :  { %3015 = vmatprep.subr.bf16.mxu1 %v8333_v39  ;;  %v8415_v39 = vld [vmem:[#allocation7 + $0x80] ss:$8 sps:$4 sm:$0xff]  }
 0x1c8   :  { %2973 = vmatpush2.bf16.msra.mxu0 %v8328_v40  ;;  %v8418_v40 = vld [vmem:[#allocation10 + $0x70] ss:$8 sps:$4 sm:$0xff]  }
 0x1c9   :  { %3016 = vmatpush2.bf16.msra.mxu1 %v8331_v41  ;;  %2974 = vmatprep.subr.bf16.mxu0 %v8336_v42  ;;  %v8420_v41 = vld [vmem:[#allocation10 + $0x74] ss:$8 sps:$4 sm:$0xff]   ;;  %v8423_v42 = vld [vmem:[#allocation10 + $0x64] ss:$8 sps:$4 sm:$0xff]  }
 0x1ca   :  { %3017 = vmatprep.subr.bf16.mxu1 %v8339_v43  ;;  %v8421_v43 = vld [vmem:[#allocation10 + $0x60] ss:$8 sps:$4 sm:$0xff]  }
 0x1cc   :  { %2975 = vmatpush2.bf16.msra.mxu0 %v8334_v44  ;;  %v8426_v44 = vld [vmem:[#allocation10 + $0x54] ss:$8 sps:$4 sm:$0xff]  }
 0x1cd   :  { %3018 = vmatpush2.bf16.msra.mxu1 %v8337_v45  ;;  %2976 = vmatprep.subr.bf16.mxu0 %v8342_v46  ;;  %v8424_v45 = vld [vmem:[#allocation10 + $0x50] ss:$8 sps:$4 sm:$0xff]   ;;  %v8429_v46 = vld [vmem:[#allocation10 + $0x44] ss:$8 sps:$4 sm:$0xff]  }
 0x1ce   :  { %3019 = vmatprep.subr.bf16.mxu1 %v8345_v47  ;;  %v8427_v47 = vld [vmem:[#allocation10 + $0x40] ss:$8 sps:$4 sm:$0xff]  }
 0x1d0   :  { %2977 = vmatpush2.bf16.msra.mxu0 %v8340_v48  ;;  %v8432_v48 = vld [vmem:[#allocation10 + $0x34] ss:$8 sps:$4 sm:$0xff]  }
 0x1d1   :  { %3020 = vmatpush2.bf16.msra.mxu1 %v8343_v49  ;;  %2978 = vmatprep.subr.bf16.mxu0 %v8348_v50  ;;  %v8430_v49 = vld [vmem:[#allocation10 + $0x30] ss:$8 sps:$4 sm:$0xff]   ;;  %v8435_v50 = vld [vmem:[#allocation10 + $0x24] ss:$8 sps:$4 sm:$0xff]  }
 0x1d2   :  { %3021 = vmatprep.subr.bf16.mxu1 %v8351_v51  ;;  %v8433_v51 = vld [vmem:[#allocation10 + $0x20] ss:$8 sps:$4 sm:$0xff]  }
 0x1d4   :  { %2979 = vmatpush2.bf16.msra.mxu0 %v8346_v52  ;;  %v8438_v52 = vld [vmem:[#allocation10 + $0x14] ss:$8 sps:$4 sm:$0xff]  }
 0x1d5   :  { %3022 = vmatpush2.bf16.msra.mxu1 %v8349_v53  ;;  %2980 = vmatprep.subr.bf16.mxu0 %v8354_v54  ;;  %v8436_v53 = vld [vmem:[#allocation10 + $0x10] ss:$8 sps:$4 sm:$0xff]   ;;  %v8441_v54 = vld [vmem:[#allocation10 + $0x4] ss:$8 sps:$4 sm:$0xff]  }
 0x1d6   :  { %3023 = vmatprep.subr.bf16.mxu1 %v8357_v55  ;;  %v8439_v55 = vld [vmem:[#allocation10] ss:$8 sps:$4 sm:$0xff]  }
 0x1d8   :  { %2981 = vmatpush2.bf16.msra.mxu0 %v8352_v56  ;;  %v8444_v56 = vld [vmem:[#allocation10 + $0xf4] ss:$8 sps:$4 sm:$0xff]  }
 0x1d9   :  { %3024 = vmatpush2.bf16.msra.mxu1 %v8355_v57  ;;  %2982 = vmatprep.subr.bf16.mxu0 %v8360_v58  ;;  %v8442_v57 = vld [vmem:[#allocation10 + $0xf0] ss:$8 sps:$4 sm:$0xff]   ;;  %v8447_v58 = vld [vmem:[#allocation10 + $0xe4] ss:$8 sps:$4 sm:$0xff]  }
 0x1da   :  { %3025 = vmatprep.subr.bf16.mxu1 %v8363_v59  ;;  %v8445_v59 = vld [vmem:[#allocation10 + $0xe0] ss:$8 sps:$4 sm:$0xff]  }
 0x1dc   :  { %2983 = vmatpush2.bf16.msra.mxu0 %v8358_v60  ;;  %v8450_v60 = vld [vmem:[#allocation10 + $0xd4] ss:$8 sps:$4 sm:$0xff]  }
 0x1dd   :  { %3026 = vmatpush2.bf16.msra.mxu1 %v8361_v61  ;;  %2984 = vmatprep.subr.bf16.mxu0 %v8366_v62  ;;  %v8448_v61 = vld [vmem:[#allocation10 + $0xd0] ss:$8 sps:$4 sm:$0xff]   ;;  %v8453_v62 = vld [vmem:[#allocation10 + $0xc4] ss:$8 sps:$4 sm:$0xff]  }
 0x1de   :  { %3027 = vmatprep.subr.bf16.mxu1 %v8369_v63  ;;  %v2558_v63 = vpop.f32.mrf.mxu0 }
 0x1e0   :  { %2985 = vmatpush2.bf16.msra.mxu0 %v8364_v0  ;;  %v2601_v0 = vpop.f32.mrf.mxu1  ;;  %v2560_v3 = vpop.f32.mrf.mxu0 }
 0x1e1   :  { %3028 = vmatpush2.bf16.msra.mxu1 %v8367_v1  ;;  %3250 = vmatprep.subr.bf16.mxu0 %v8372_v9  ;;  %v8451_v1 = vld [vmem:[#allocation10 + $0xc0] ss:$8 sps:$4 sm:$0xff]  }
 0x1e2   :  { %3503 = vmatprep.subr.bf16.mxu1 %v8420_v41  ;;  %v2603_v4 = vpop.f32.mrf.mxu1 }
 0x1e3   :  { %2987 = vmatmul.mubr.bf16.vlgmr.msra.gmra.mxu0 %v204_v6  ;;  %v2562_v6 = vpop.f32.mrf.mxu0 }
 0x1e4   :  { %3030 = vmatmul.mubr.bf16.vlgmr.msra.gmra.mxu1 %v206_v7  ;;  %3251 = vmatpush1.bf16.msra.mxu0 %v8370_v8  ;;  %v2605_v7 = vpop.f32.mrf.mxu1 }
 0x1e5   :  { %3252 = vmatprep.subr.bf16.mxu0 %v8375_v10  ;;  %3504 = vmatpush1.bf16.msra.mxu1 %v8418_v40  ;;  %v2564_v8 = vpop.f32.mrf.mxu0 }
 0x1e6   :  { %3505 = vmatprep.subr.bf16.mxu1 %v8423_v42  ;;  %v2607_v9 = vpop.f32.mrf.mxu1 }
 0x1e7   :  { %v2644_v10 = vpop.f32.mrf.mxu0 }
 0x1e8   :  { %3253 = vmatpush1.bf16.msra.mxu0 %v8373_v11  ;;  %v2687_v11 = vpop.f32.mrf.mxu1 }
 0x1e9   :  { %3254 = vmatprep.subr.bf16.mxu0 %v8378_v12  ;;  %3506 = vmatpush1.bf16.msra.mxu1 %v8421_v43  ;;  %v2646_v12 = vpop.f32.mrf.mxu0 }
 0x1ea   :  { %3507 = vmatprep.subr.bf16.mxu1 %v8426_v44 }
 0x1ec   :  { %3255 = vmatpush1.bf16.msra.mxu0 %v8376_v13  ;;  %v2689_v13 = vpop.f32.mrf.mxu1 }
 0x1ed   :  { %3256 = vmatprep.subr.bf16.mxu0 %v8381_v14  ;;  %3508 = vmatpush1.bf16.msra.mxu1 %v8424_v45  ;;  %v2648_v14 = vpop.f32.mrf.mxu0 }
 0x1ee   :  { %3509 = vmatprep.subr.bf16.mxu1 %v8429_v46 }
 0x1f0   :  { %3257 = vmatpush1.bf16.msra.mxu0 %v8379_v15  ;;  %v2691_v15 = vpop.f32.mrf.mxu1 }
 0x1f1   :  { %3258 = vmatprep.subr.bf16.mxu0 %v8384_v16  ;;  %3510 = vmatpush1.bf16.msra.mxu1 %v8427_v47  ;;  %v2650_v16 = vpop.f32.mrf.mxu0 }
 0x1f2   :  { %3511 = vmatprep.subr.bf16.mxu1 %v8432_v48 }
 0x1f4   :  { %3259 = vmatpush1.bf16.msra.mxu0 %v8382_v17  ;;  %v2693_v17 = vpop.f32.mrf.mxu1 }
 0x1f5   :  { %3260 = vmatprep.subr.bf16.mxu0 %v8387_v18  ;;  %3512 = vmatpush1.bf16.msra.mxu1 %v8430_v49  ;;  %v594_v18 = vlaneseq }
 0x1f6   :  { %3513 = vmatprep.subr.bf16.mxu1 %v8435_v50 }
 0x1f8   :  { %3261 = vmatpush1.bf16.msra.mxu0 %v8385_v19  ;;  %v2730_v19 = vpop.f32.mrf.mxu0 }
 0x1f9   :  { %3262 = vmatprep.subr.bf16.mxu0 %v8390_v20  ;;  %3514 = vmatpush1.bf16.msra.mxu1 %v8433_v51  ;;  %v2773_v20 = vpop.f32.mrf.mxu1 }
 0x1fa   :  { %3515 = vmatprep.subr.bf16.mxu1 %v8438_v52 }
 0x1fc   :  { %3263 = vmatpush1.bf16.msra.mxu0 %v8388_v21  ;;  %v595_v21 = vshrl.u32 %v594_v18, 7 }
 0x1fd   :  { %3264 = vmatprep.subr.bf16.mxu0 %v8393_v22  ;;  %3516 = vmatpush1.bf16.msra.mxu1 %v8436_v53  ;;  %v2732_v22 = vpop.f32.mrf.mxu0 }
 0x1fe   :  { %3517 = vmatprep.subr.bf16.mxu1 %v8441_v54 }
 0x200   :  { %3265 = vmatpush1.bf16.msra.mxu0 %v8391_v23  ;;  %v2775_v23 = vpop.f32.mrf.mxu1 }
 0x201   :  { %3266 = vmatprep.subr.bf16.mxu0 %v8396_v24  ;;  %3518 = vmatpush1.bf16.msra.mxu1 %v8439_v55  ;;  %v8905_v24 = vsub.s32 1, %v595_v21 }
 0x202   :  { %3519 = vmatprep.subr.bf16.mxu1 %v8444_v56 }
 0x204   :  { %3267 = vmatpush2.bf16.msra.mxu0 %v8394_v25  ;;  %v592_v25 = vld [vmem:[#allocation5] sm:$0x3] }
 0x205   :  { %3268 = vmatprep.subr.bf16.mxu0 %v8399_v26  ;;  %3520 = vmatpush2.bf16.msra.mxu1 %v8442_v57  ;;  %v8907_v26 = vsub.s32 0, %v595_v21 }
 0x206   :  { %3521 = vmatprep.subr.bf16.mxu1 %v8447_v58 }
 0x208   :  { %3269 = vmatpush2.bf16.msra.mxu0 %v8397_v27  ;;  %v2734_v27 = vpop.f32.mrf.mxu0 }
 0x209   :  { %3270 = vmatprep.subr.bf16.mxu0 %v8402_v28  ;;  %3522 = vmatpush2.bf16.msra.mxu1 %v8445_v59  ;;  %v2777_v28 = vpop.f32.mrf.mxu1 }
 0x20a   :  { %3523 = vmatprep.subr.bf16.mxu1 %v8450_v60 }
 0x20c   :  { %3271 = vmatpush2.bf16.msra.mxu0 %v8400_v29  ;;  %v601_v29 = vrot.slane %v592_v25, %v8905_v24 }
 0x20d   :  { %3272 = vmatprep.subr.bf16.mxu0 %v8405_v30  ;;  %3524 = vmatpush2.bf16.msra.mxu1 %v8448_v61  ;;  %v597_v30 = vrot.slane %v592_v25, %v8907_v26 }
 0x20e   :  { %3525 = vmatprep.subr.bf16.mxu1 %v8453_v62  ;;  %v2565_v41 = vadd.f32 %v2564_v8, %v601_v29 }
 0x210   :  { %3273 = vmatpush2.bf16.msra.mxu0 %v8403_v31  ;;  %v2736_v31 = vpop.f32.mrf.mxu0  ;;  %v2608_v48 = vadd.f32 %v2607_v9, %v2565_v41 }
 0x211   :  { %3274 = vmatprep.subr.bf16.mxu0 %v8408_v32  ;;  %3526 = vmatpush2.bf16.msra.mxu1 %v8451_v1  ;;  %v2779_v32 = vpop.f32.mrf.mxu1 }
 0x212   :  { %3527 = vmatprep.subr.bf16.mxu1 %v8456_v2  ;;  %v2651_v51 = vadd.f32 %v2650_v16, %v2608_v48 }
 0x214   :  { %3275 = vmatpush2.bf16.msra.mxu0 %v8406_v33  ;;  %v2694_v60 = vadd.f32 %v2693_v17, %v2651_v51  ;;  %v8462_v51 = vld [vmem:[#allocation10 + $0x94] ss:$8 sps:$4 sm:$0xff]  }
 0x215   :  { %3276 = vmatprep.subr.bf16.mxu0 %v8411_v34  ;;  %3528 = vmatpush2.bf16.msra.mxu1 %v8454_v5 }
 0x218   :  { %3277 = vmatpush2.bf16.msra.mxu0 %v8409_v35  ;;  %v2561_v35 = vadd.f32 %v2560_v3, %v601_v29 }
 0x219   :  { %3278 = vmatprep.subr.bf16.mxu0 %v8414_v36  ;;  %v2559_v36 = vadd.f32 %v2558_v63, %v597_v30  ;;  %v2737_v63 = vadd.f32 %v2736_v31, %v2694_v60  ;;  %v8913_v60 = vld [vmem:[#allocation13 + $0x5a8] sm:$0xff] }
 0x21a   :  { %v2604_v40 = vadd.f32 %v2603_v4, %v2561_v35 }
 0x21b   :  { %v2602_v42 = vadd.f32 %v2601_v0, %v2559_v36 }
 0x21c   :  { %3279 = vmatpush2.bf16.msra.mxu0 %v8412_v37  ;;  %v2563_v37 = vadd.f32 %v2562_v6, %v597_v30  ;;  %v2647_v44 = vadd.f32 %v2646_v12, %v2604_v40  ;;  %v2780_v6 = vadd.f32 %v2779_v32, %v2737_v63 }
 0x21d   :  { %3280 = vmatprep.subr.bf16.mxu0 %v8417_v38  ;;  %v2645_v45 = vadd.f32 %v2644_v10, %v2602_v42 }
 0x21e   :  { %v2606_v43 = vadd.f32 %v2605_v7, %v2563_v37  ;;  %v2690_v50 = vadd.f32 %v2689_v13, %v2647_v44 }
 0x21f   :  { %v2688_v52 = vadd.f32 %v2687_v11, %v2645_v45 }
 0x220   :  { %3281 = vmatpush2.bf16.msra.mxu0 %v8415_v39  ;;  %v2649_v49 = vadd.f32 %v2648_v14, %v2606_v43  ;;  %v2733_v56 = vadd.f32 %v2732_v22, %v2690_v50  ;;  %v8457_v50 = vld [vmem:[#allocation10 + $0xa0] ss:$8 sps:$4 sm:$0xff]  }
 0x221   :  { %v2731_v57 = vadd.f32 %v2730_v19, %v2688_v52  ;;  %v8460_v52 = vld [vmem:[#allocation10 + $0x90] ss:$8 sps:$4 sm:$0xff]  }
 0x222   :  { %v2692_v55 = vadd.f32 %v2691_v15, %v2649_v49  ;;  %v2776_v62 = vadd.f32 %v2775_v23, %v2733_v56  ;;  %v8459_v49 = vld [vmem:[#allocation10 + $0xa4] ss:$8 sps:$4 sm:$0xff]  }
 0x223   :  { %v2816_v33 = vpop.f32.mrf.mxu0  ;;  %v2774_v0 = vadd.f32 %v2773_v20, %v2731_v57  ;;  %3529 = vmatprep.subr.bf16.mxu1 %v8459_v49  ;;  %v3567_v56 = vld [vmem:[#allocation13 + $0x5a0] sm:$0xff]  ;;  %v8911_v57 = vld [vmem:[#allocation13 + $0x548] sm:$0xff] }
 0x224   :  { %v2859_v34 = vpop.f32.mrf.mxu1  ;;  %v2735_v61 = vadd.f32 %v2734_v27, %v2692_v55  ;;  %3530 = vmatpush2.bf16.msra.mxu1 %v8457_v50  ;;  %v3566_v55 = vld [vmem:[#allocation13 + $0x540] sm:$0xff]  ;;  %v7397_v63 = vcombine.low %v8911_v57, %v8913_v60 }
 0x225   :  { %v2818_v38 = vpop.f32.mrf.mxu0  ;;  %v2817_v5 = vadd.f32 %v2816_v33, %v2774_v0  ;;  %3531 = vmatprep.subr.bf16.mxu1 %v8462_v51  ;;  %v7398_v0 = vcombine.high %v8911_v57, %v8913_v60  ;;  %v3841_v51 = vld [vmem:[#allocation13 + $0x488] sm:$0xff] }
 0x226   :  { %v2861_v39 = vpop.f32.mrf.mxu1  ;;  %v2778_v3 = vadd.f32 %v2777_v28, %v2735_v61  ;;  %v2819_v4 = vadd.f32 %v2818_v38, %v2776_v62  ;;  %v3564_v61 = vld [vmem:[#allocation13 + $0x480] sm:$0xff] }
 0x227   :  { %v2820_v46 = vpop.f32.mrf.mxu0  ;;  %v2860_v12 = vadd.f32 %v2859_v34, %v2817_v5  ;;  %v3565_v62 = vld [vmem:[#allocation13 + $0x4e0] sm:$0xff] }
 0x228   :  { %v2863_v47 = vpop.f32.mrf.mxu1  ;;  %v2821_v7 = vadd.f32 %v2820_v46, %v2778_v3  ;;  %v2862_v10 = vadd.f32 %v2861_v39, %v2819_v4  ;;  %3532 = vmatpush2.bf16.msra.mxu1 %v8460_v52  ;;  %v3562_v3 = vld [vmem:[#allocation13 + $0x3c0] sm:$0xff]  ;;  %v3842_v52 = vld [vmem:[#allocation13 + $0x4e8] sm:$0xff] }
 0x229   :  { %v2822_v53 = vpop.f32.mrf.mxu0  ;;  %v3563_v4 = vld [vmem:[#allocation13 + $0x420] sm:$0xff] }
 0x22a   :  { %v2865_v54 = vpop.f32.mrf.mxu1  ;;  %v2823_v11 = vadd.f32 %v2822_v53, %v2780_v6  ;;  %v2864_v13 = vadd.f32 %v2863_v47, %v2821_v7  ;;  %v8465_v53 = vld [vmem:[#allocation10 + $0x84] ss:$8 sps:$4 sm:$0xff]   ;;  %v7360_v5 = vcombine.high %v3562_v3, %v3563_v4  ;;  %v7359_v6 = vcombine.low %v3562_v3, %v3563_v4 }
 0x22b   :  { %3533 = vmatprep.subr.bf16.mxu1 %v8465_v53  ;;  %v3560_v7 = vld [vmem:[#allocation13 + $0x300] sm:$0xff]  ;;  %v3835_v4 = vld [vmem:[#allocation13 + $0x248] sm:$0xff] }
 0x22c   :  { %v2866_v18 = vadd.f32 %v2865_v54, %v2823_v11  ;;  %v8463_v54 = vld [vmem:[#allocation10 + $0x80] ss:$8 sps:$4 sm:$0xff]  }
 0x22d   :  { %3534 = vmatpush2.bf16.msra.mxu1 %v8463_v54  ;;  %v3558_v11 = vld [vmem:[#allocation13 + $0x240] sm:$0xff] }
 0x22e   :  { %4033 = vmatprep.subr.bf16.mxu1 %v7398_v0  ;;  %v3837_v0 = vld [vmem:[#allocation13 + $0x308] sm:$0xff] }
 0x263   :  { %v2902_v58 = vpop.f32.mrf.mxu0 }
 0x264   :  { %v2945_v59 = vpop.f32.mrf.mxu1  ;;  %v2903_v15 = vadd.f32 %v2902_v58, %v2860_v12  ;;  %v7363_v58 = vcombine.low %v3566_v55, %v3567_v56  ;;  %v3559_v12 = vld [vmem:[#allocation13 + $0x2a0] sm:$0xff] }
 0x265   :  { %v2904_v1 = vpop.f32.mrf.mxu0 }
 0x266   :  { %v2947_v2 = vpop.f32.mrf.mxu1  ;;  %v2905_v14 = vadd.f32 %v2904_v1, %v2862_v10  ;;  %v2946_v25 = vadd.f32 %v2945_v59, %v2903_v15  ;;  %v7364_v59 = vcombine.high %v3566_v55, %v3567_v56  ;;  %v7362_v1 = vcombine.high %v3564_v61, %v3565_v62  ;;  %v3556_v15 = vld [vmem:[#allocation13 + $0x180] sm:$0xff] }
 0x267   :  { %v2906_v8 = vpop.f32.mrf.mxu0  ;;  %v7396_v56 = vcombine.high %v3841_v51, %v3842_v52 }
 0x268   :  { %v2949_v9 = vpop.f32.mrf.mxu1  ;;  %v2907_v19 = vadd.f32 %v2906_v8, %v2864_v13  ;;  %v2948_v22 = vadd.f32 %v2947_v2, %v2905_v14  ;;  %3756 = vmatprep.subr.bf16.mxu0 %v7364_v59  ;;  %v7361_v2 = vcombine.low %v3564_v61, %v3565_v62  ;;  %v3561_v8 = vld [vmem:[#allocation13 + $0x360] sm:$0xff]  ;;  %v7356_v13 = vcombine.high %v3558_v11, %v3559_v12  ;;  %v3840_v59 = vld [vmem:[#allocation13 + $0x428] sm:$0xff] }
 0x269   :  { %v2908_v16 = vpop.f32.mrf.mxu0  ;;  %v7357_v10 = vcombine.low %v3560_v7, %v3561_v8  ;;  %v7355_v14 = vcombine.low %v3558_v11, %v3559_v12  ;;  %v7395_v61 = vcombine.low %v3841_v51, %v3842_v52  ;;  %v3572_v52 = vld [vmem:[#allocation13 + $0x780] sm:$0xff] }
 0x26a   :  { %v2951_v17 = vpop.f32.mrf.mxu1  ;;  %v2909_v23 = vadd.f32 %v2908_v16, %v2866_v18  ;;  %v2950_v29 = vadd.f32 %v2949_v9, %v2907_v19  ;;  %v7358_v9 = vcombine.high %v3560_v7, %v3561_v8  ;;  %v3557_v16 = vld [vmem:[#allocation13 + $0x1e0] sm:$0xff]  ;;  %v3833_v8 = vld [vmem:[#allocation13 + $0x188] sm:$0xff] }
 0x26b   :  { %v7353_v18 = vcombine.low %v3556_v15, %v3557_v16  ;;  %v3554_v19 = vld [vmem:[#allocation13 + $0xc0] sm:$0xff] }
 0x26c   :  { %v2952_v34 = vadd.f32 %v2951_v17, %v2909_v23  ;;  %v7354_v17 = vcombine.high %v3556_v15, %v3557_v16  ;;  %v3552_v23 = vld [vmem:[#allocation13] sm:$0xff] }
 0x2a3   :  { %v2988_v20 = vpop.f32.mrf.mxu0 }
 0x2a4   :  { %v3031_v21 = vpop.f32.mrf.mxu1  ;;  %v2989_v31 = vadd.f32 %v2988_v20, %v2946_v25  ;;  %v3555_v20 = vld [vmem:[#allocation13 + $0x120] sm:$0xff] }
 0x2a5   :  { %v2990_v27 = vpop.f32.mrf.mxu0  ;;  %v3553_v25 = vld [vmem:[#allocation13 + $0x60] sm:$0xff] }
 0x2a6   :  { %v3033_v28 = vpop.f32.mrf.mxu1  ;;  %v2991_v30 = vadd.f32 %v2990_v27, %v2948_v22  ;;  %v3032_v40 = vadd.f32 %v3031_v21, %v2989_v31  ;;  %v7352_v21 = vcombine.high %v3554_v19, %v3555_v20  ;;  %v7351_v22 = vcombine.low %v3554_v19, %v3555_v20 }
 0x2a7   :  { %v2992_v32 = vpop.f32.mrf.mxu0  ;;  %v7350_v27 = vcombine.high %v3552_v23, %v3553_v25 }
 0x2a8   :  { %v3035_v33 = vpop.f32.mrf.mxu1  ;;  %v2993_v35 = vadd.f32 %v2992_v32, %v2950_v29  ;;  %v3034_v37 = vadd.f32 %v3033_v28, %v2991_v30  ;;  %v3040_v46 = vmax.f32 %v3032_v40, 0.0  ;;  %v7349_v28 = vcombine.low %v3552_v23, %v3553_v25  ;;  %v3582_v29 = vld [vmem:[#allocation13 + $0xb40] sm:$0xff] }
 0x2a9   :  { %v2994_v36 = vpop.f32.mrf.mxu0  ;;  %v3583_v30 = vld [vmem:[#allocation13 + $0xba0] sm:$0xff] }
 0x2aa   :  { %v3036_v38 = vadd.f32 %v3035_v33, %v2993_v35  ;;  %v2995_v39 = vadd.f32 %v2994_v36, %v2952_v34  ;;  %v3037_v41 = vpop.f32.mrf.mxu1  ;;  %v3041_v44 = vmax.f32 %v3034_v37, 0.0  ;;  %v7380_v31 = vcombine.high %v3582_v29, %v3583_v30  ;;  %v3580_v33 = vld [vmem:[#allocation13 + $0xa80] sm:$0xff]  ;;  %v3078_v37 = vld [vmem:[#allocation8] sm:$0x3] }
 0x2ab   :  { %v7379_v32 = vcombine.low %v3582_v29, %v3583_v30  ;;  %v3581_v34 = vld [vmem:[#allocation13 + $0xae0] sm:$0xff]  ;;  %v3083_v40 = vrot.slane %v3078_v37, %v8907_v26  ;;  %v3855_v30 = vld [vmem:[#allocation13 + $0x9c8] sm:$0xff] }
 0x2ac   :  { %v3038_v42 = vadd.f32 %v3037_v41, %v2995_v39  ;;  %v3042_v43 = vmax.f32 %v3036_v38, 0.0  ;;  %v7378_v35 = vcombine.high %v3580_v33, %v3581_v34  ;;  %v7377_v36 = vcombine.low %v3580_v33, %v3581_v34  ;;  %v3579_v29 = vld [vmem:[#allocation13 + $0xa20] sm:$0xff] }
 0x2ad   :  { %v3087_v39 = vrot.slane %v3078_v37, %v8905_v24  ;;  %v3577_v37 = vld [vmem:[#allocation13 + $0x960] sm:$0xff] }
 0x2ae   :  { %v3043_v45 = vmax.f32 %v3038_v42, 0.0  ;;  %v3044_v48 = vpack.c.bf16 %v3042_v43, %v3040_v46 }
 0x2b0   :  { %v3045_v47 = vpack.c.bf16 %v3043_v45, %v3041_v44 }
 0x2b2   :  { %3282 = vmatprep.mubr.bf16.mxu0 %v3045_v47 }
 0x2b3   :  { %3283 = vmatmul.mubr.bf16.vlgmr.msra.gmra.mxu0 %v3044_v48 }
 0x2b4   :  { %3757 = vmatpush1.bf16.msra.mxu0 %v7363_v58  ;;  %v3839_v58 = vld [vmem:[#allocation13 + $0x3c8] sm:$0xff] }
 0x2b5   :  { %3758 = vmatprep.subr.bf16.mxu0 %v7362_v1  ;;  %v7394_v62 = vcombine.high %v3839_v58, %v3840_v59  ;;  %v3838_v1 = vld [vmem:[#allocation13 + $0x368] sm:$0xff] }
 0x2b6   :  { %v7392_v3 = vcombine.high %v3837_v0, %v3838_v1 }
 0x2b8   :  { %3759 = vmatpush1.bf16.msra.mxu0 %v7361_v2  ;;  %v7393_v2 = vcombine.low %v3839_v58, %v3840_v59 }
 0x2b9   :  { %3760 = vmatprep.subr.bf16.mxu0 %v7360_v5  ;;  %v3836_v5 = vld [vmem:[#allocation13 + $0x2a8] sm:$0xff] }
 0x2ba   :  { %v7390_v7 = vcombine.high %v3835_v4, %v3836_v5  ;;  %v7389_v57 = vcombine.low %v3835_v4, %v3836_v5 }
 0x2bc   :  { %3761 = vmatpush1.bf16.msra.mxu0 %v7359_v6  ;;  %v7391_v6 = vcombine.low %v3837_v0, %v3838_v1  ;;  %v3571_v0 = vld [vmem:[#allocation13 + $0x720] sm:$0xff]  ;;  %v3847_v1 = vld [vmem:[#allocation13 + $0x6c8] sm:$0xff] }
 0x2bd   :  { %3762 = vmatprep.subr.bf16.mxu0 %v7358_v9  ;;  %v3834_v9 = vld [vmem:[#allocation13 + $0x1e8] sm:$0xff] }
 0x2be   :  { %v7388_v60 = vcombine.high %v3833_v8, %v3834_v9  ;;  %v7387_v11 = vcombine.low %v3833_v8, %v3834_v9  ;;  %v3569_v8 = vld [vmem:[#allocation13 + $0x660] sm:$0xff]  ;;  %v3845_v9 = vld [vmem:[#allocation13 + $0x608] sm:$0xff] }
 0x2c0   :  { %3763 = vmatpush1.bf16.msra.mxu0 %v7357_v10  ;;  %v3832_v10 = vld [vmem:[#allocation13 + $0x128] sm:$0xff] }
 0x2c1   :  { %3764 = vmatprep.subr.bf16.mxu0 %v7356_v13  ;;  %v3829_v13 = vld [vmem:[#allocation13 + $0x8] sm:$0xff] }
 0x2c4   :  { %3765 = vmatpush1.bf16.msra.mxu0 %v7355_v14  ;;  %v3830_v14 = vld [vmem:[#allocation13 + $0x68] sm:$0xff] }
 0x2c5   :  { %3766 = vmatprep.subr.bf16.mxu0 %v7354_v17  ;;  %v7384_v16 = vcombine.high %v3829_v13, %v3830_v14  ;;  %v3859_v17 = vld [vmem:[#allocation13 + $0xb48] sm:$0xff]  ;;  %v7383_v19 = vcombine.low %v3829_v13, %v3830_v14  ;;  %v4121_v13 = vld [vmem:[#allocation13 + $0x5b0] sm:$0xff]  ;;  %v4397_v14 = vld [vmem:[#allocation13 + $0x558] sm:$0xff] }
 0x2c8   :  { %3767 = vmatpush1.bf16.msra.mxu0 %v7353_v18  ;;  %v3860_v18 = vld [vmem:[#allocation13 + $0xba8] sm:$0xff] }
 0x2c9   :  { %3768 = vmatprep.subr.bf16.mxu0 %v7352_v21  ;;  %v7414_v20 = vcombine.high %v3859_v17, %v3860_v18  ;;  %v3857_v21 = vld [vmem:[#allocation13 + $0xa88] sm:$0xff]  ;;  %v7413_v23 = vcombine.low %v3859_v17, %v3860_v18 }
 0x2cc   :  { %3769 = vmatpush1.bf16.msra.mxu0 %v7351_v22  ;;  %v3858_v22 = vld [vmem:[#allocation13 + $0xae8] sm:$0xff] }
 0x2cd   :  { %3770 = vmatprep.subr.bf16.mxu0 %v7350_v27  ;;  %v7412_v25 = vcombine.high %v3857_v21, %v3858_v22  ;;  %v7411_v27 = vcombine.low %v3857_v21, %v3858_v22 }
 0x2d0   :  { %3771 = vmatpush1.bf16.msra.mxu0 %v7349_v28  ;;  %v3578_v28 = vld [vmem:[#allocation13 + $0x9c0] sm:$0xff] }
 0x2d1   :  { %3772 = vmatprep.subr.bf16.mxu0 %v7380_v31  ;;  %v7376_v31 = vcombine.high %v3578_v28, %v3579_v29  ;;  %v7375_v33 = vcombine.low %v3578_v28, %v3579_v29 }
 0x2d4   :  { %3773 = vmatpush2.bf16.msra.mxu0 %v7379_v32  ;;  %v3856_v32 = vld [vmem:[#allocation13 + $0xa28] sm:$0xff] }
 0x2d5   :  { %3774 = vmatprep.subr.bf16.mxu0 %v7378_v35  ;;  %v7409_v34 = vcombine.low %v3855_v30, %v3856_v32  ;;  %v7410_v35 = vcombine.high %v3855_v30, %v3856_v32 }
 0x2d8   :  { %3775 = vmatpush2.bf16.msra.mxu0 %v7377_v36  ;;  %v3576_v36 = vld [vmem:[#allocation13 + $0x900] sm:$0xff] }
 0x2d9   :  { %3776 = vmatprep.subr.bf16.mxu0 %v7376_v31 }
 0x2dc   :  { %3777 = vmatpush2.bf16.msra.mxu0 %v7375_v33 }
 0x373   :  { %v3284_v38 = vpop.f32.mrf.mxu0 }
 0x374   :  { %v3285_v45 = vadd.f32 %v3284_v38, %v3083_v40  ;;  %v3853_v38 = vld [vmem:[#allocation13 + $0x908] sm:$0xff] }
 0x375   :  { %v3286_v41 = vpop.f32.mrf.mxu0 }
 0x376   :  { %v3287_v43 = vadd.f32 %v3286_v41, %v3087_v39  ;;  %v3293_v53 = vmax.f32 %v3285_v45, 0.0  ;;  %v7373_v41 = vcombine.low %v3576_v36, %v3577_v37  ;;  %v3575_v45 = vld [vmem:[#allocation13 + $0x8a0] sm:$0xff] }
 0x377   :  { %v3288_v42 = vpop.f32.mrf.mxu0 }
 0x378   :  { %v3289_v44 = vadd.f32 %v3288_v42, %v3083_v40  ;;  %v3294_v49 = vmax.f32 %v3287_v43, 0.0  ;;  %v3854_v40 = vld [vmem:[#allocation13 + $0x968] sm:$0xff] }
 0x379   :  { %v3290_v46 = vpop.f32.mrf.mxu0  ;;  %v7407_v42 = vcombine.low %v3853_v38, %v3854_v40  ;;  %v7408_v43 = vcombine.high %v3853_v38, %v3854_v40  ;;  %v4395_v38 = vld [vmem:[#allocation13 + $0x498] sm:$0xff] }
 0x37a   :  { %v3291_v47 = vadd.f32 %v3290_v46, %v3087_v39  ;;  %v3295_v48 = vmax.f32 %v3289_v44, 0.0  ;;  %v7374_v39 = vcombine.high %v3576_v36, %v3577_v37  ;;  %v3574_v44 = vld [vmem:[#allocation13 + $0x840] sm:$0xff]  ;;  %v3851_v46 = vld [vmem:[#allocation13 + $0x848] sm:$0xff]  ;;  %v4119_v37 = vld [vmem:[#allocation13 + $0x4f0] sm:$0xff] }
 0x37c   :  { %v3296_v50 = vmax.f32 %v3291_v47, 0.0  ;;  %v3297_v55 = vpack.c.bf16 %v3295_v48, %v3293_v53  ;;  %3778 = vmatprep.subr.bf16.mxu0 %v7374_v39  ;;  %v7372_v47 = vcombine.high %v3574_v44, %v3575_v45  ;;  %v3852_v48 = vld [vmem:[#allocation13 + $0x8a8] sm:$0xff]  ;;  %v3573_v53 = vld [vmem:[#allocation13 + $0x7e0] sm:$0xff]  ;;  %v4396_v39 = vld [vmem:[#allocation13 + $0x4f8] sm:$0xff] }
 0x37d   :  { %3779 = vmatpush2.bf16.msra.mxu0 %v7373_v41  ;;  %v7406_v51 = vcombine.high %v3851_v46, %v3852_v48  ;;  %v7369_v58 = vcombine.low %v3572_v52, %v3573_v53 }
 0x37e   :  { %v3298_v54 = vpack.c.bf16 %v3296_v50, %v3294_v49  ;;  %v7371_v49 = vcombine.low %v3574_v44, %v3575_v45  ;;  %v7405_v50 = vcombine.low %v3851_v46, %v3852_v48  ;;  %3780 = vmatprep.subr.bf16.mxu0 %v7372_v47  ;;  %v7464_v45 = vcombine.high %v4395_v38, %v4396_v39  ;;  %v4117_v46 = vld [vmem:[#allocation13 + $0x430] sm:$0xff]  ;;  %v4393_v47 = vld [vmem:[#allocation13 + $0x3d8] sm:$0xff] }
 0x37f   :  { %v4394_v48 = vld [vmem:[#allocation13 + $0x438] sm:$0xff] }
 0x380   :  { %3535 = vmatprep.mubr.bf16.mxu1 %v3298_v54  ;;  %v3849_v54 = vld [vmem:[#allocation13 + $0x788] sm:$0xff] }
 0x381   :  { %3536 = vmatmul.mubr.bf16.vlgmr.msra.gmra.mxu1 %v3297_v55  ;;  %3781 = vmatpush2.bf16.msra.mxu0 %v7371_v49  ;;  %v7370_v55 = vcombine.high %v3572_v52, %v3573_v53  ;;  %v7462_v52 = vcombine.high %v4393_v47, %v4394_v48  ;;  %v4114_v53 = vld [vmem:[#allocation13 + $0x310] sm:$0xff] }
 0x382   :  { %4034 = vmatpush1.bf16.msra.mxu1 %v7397_v63  ;;  %v3831_v63 = vld [vmem:[#allocation13 + $0xc8] sm:$0xff] }
 0x383   :  { %4035 = vmatprep.subr.bf16.mxu1 %v7396_v56  ;;  %v7386_v12 = vcombine.high %v3831_v63, %v3832_v10  ;;  %v7385_v15 = vcombine.low %v3831_v63, %v3832_v10  ;;  %v3850_v56 = vld [vmem:[#allocation13 + $0x7e8] sm:$0xff]  ;;  %3782 = vmatprep.subr.bf16.mxu0 %v7370_v55  ;;  %v4391_v55 = vld [vmem:[#allocation13 + $0x318] sm:$0xff] }
 0x384   :  { %v7403_v59 = vcombine.low %v3849_v54, %v3850_v56 }
 0x385   :  { %3783 = vmatpush2.bf16.msra.mxu0 %v7369_v58 }
 0x386   :  { %4036 = vmatpush1.bf16.msra.mxu1 %v7395_v61  ;;  %v7404_v61 = vcombine.high %v3849_v54, %v3850_v56  ;;  %v4115_v54 = vld [vmem:[#allocation13 + $0x370] sm:$0xff]  ;;  %v4392_v56 = vld [vmem:[#allocation13 + $0x378] sm:$0xff] }
 0x387   :  { %4037 = vmatprep.subr.bf16.mxu1 %v7394_v62  ;;  %v3570_v62 = vld [vmem:[#allocation13 + $0x6c0] sm:$0xff] }
 0x388   :  { %v7367_v4 = vcombine.low %v3570_v62, %v3571_v0 }
 0x38a   :  { %4038 = vmatpush1.bf16.msra.mxu1 %v7393_v2  ;;  %v7368_v2 = vcombine.high %v3570_v62, %v3571_v0  ;;  %v7460_v62 = vcombine.high %v4391_v55, %v4392_v56  ;;  %v4112_v0 = vld [vmem:[#allocation13 + $0x250] sm:$0xff] }
 0x38b   :  { %4039 = vmatprep.subr.bf16.mxu1 %v7392_v3  ;;  %v3848_v3 = vld [vmem:[#allocation13 + $0x728] sm:$0xff] }
 0x38c   :  { %v7401_v5 = vcombine.low %v3847_v1, %v3848_v3  ;;  %3784 = vmatprep.subr.bf16.mxu0 %v7368_v2  ;;  %v4389_v2 = vld [vmem:[#allocation13 + $0x258] sm:$0xff] }
 0x38d   :  { %3785 = vmatpush2.bf16.msra.mxu0 %v7367_v4  ;;  %v7425_v4 = vcombine.low %v4114_v53, %v4115_v54 }
 0x38e   :  { %4040 = vmatpush1.bf16.msra.mxu1 %v7391_v6  ;;  %v7402_v6 = vcombine.high %v3847_v1, %v3848_v3  ;;  %v4113_v1 = vld [vmem:[#allocation13 + $0x2b0] sm:$0xff]  ;;  %v4390_v3 = vld [vmem:[#allocation13 + $0x2b8] sm:$0xff] }
 0x38f   :  { %4041 = vmatprep.subr.bf16.mxu1 %v7390_v7  ;;  %v3568_v7 = vld [vmem:[#allocation13 + $0x600] sm:$0xff] }
 0x390   :  { %v7365_v63 = vcombine.low %v3568_v7, %v3569_v8 }
 0x392   :  { %4042 = vmatpush1.bf16.msra.mxu1 %v7389_v57  ;;  %v7366_v57 = vcombine.high %v3568_v7, %v3569_v8  ;;  %v7458_v7 = vcombine.high %v4389_v2, %v4390_v3  ;;  %v4110_v8 = vld [vmem:[#allocation13 + $0x190] sm:$0xff] }
 0x393   :  { %4043 = vmatprep.subr.bf16.mxu1 %v7388_v60  ;;  %v3846_v60 = vld [vmem:[#allocation13 + $0x668] sm:$0xff] }
 0x394   :  { %v7399_v10 = vcombine.low %v3845_v9, %v3846_v60  ;;  %3786 = vmatprep.subr.bf16.mxu0 %v7366_v57  ;;  %v4387_v57 = vld [vmem:[#allocation13 + $0x198] sm:$0xff] }
 0x395   :  { %3787 = vmatpush2.bf16.msra.mxu0 %v7365_v63  ;;  %v7423_v63 = vcombine.low %v4112_v0, %v4113_v1 }
 0x396   :  { %4044 = vmatpush1.bf16.msra.mxu1 %v7387_v11  ;;  %v7400_v11 = vcombine.high %v3845_v9, %v3846_v60  ;;  %v4111_v9 = vld [vmem:[#allocation13 + $0x1f0] sm:$0xff]  ;;  %v4388_v60 = vld [vmem:[#allocation13 + $0x1f8] sm:$0xff] }
 0x397   :  { %4045 = vmatprep.subr.bf16.mxu1 %v7386_v12  ;;  %v4120_v12 = vld [vmem:[#allocation13 + $0x550] sm:$0xff] }
 0x398   :  { %v7431_v17 = vcombine.low %v4120_v12, %v4121_v13 }
 0x39a   :  { %4046 = vmatpush1.bf16.msra.mxu1 %v7385_v15  ;;  %v7432_v15 = vcombine.high %v4120_v12, %v4121_v13  ;;  %v7456_v12 = vcombine.high %v4387_v57, %v4388_v60  ;;  %v4108_v13 = vld [vmem:[#allocation13 + $0xd0] sm:$0xff] }
 0x39b   :  { %4047 = vmatprep.subr.bf16.mxu1 %v7384_v16  ;;  %v4398_v16 = vld [vmem:[#allocation13 + $0x5b8] sm:$0xff] }
 0x39c   :  { %v7465_v18 = vcombine.low %v4397_v14, %v4398_v16  ;;  %4310 = vmatprep.subr.bf16.mxu0 %v7432_v15  ;;  %v4385_v15 = vld [vmem:[#allocation13 + $0xd8] sm:$0xff] }
 0x39e   :  { %4048 = vmatpush1.bf16.msra.mxu1 %v7383_v19  ;;  %v7466_v19 = vcombine.high %v4397_v14, %v4398_v16  ;;  %v4109_v14 = vld [vmem:[#allocation13 + $0x130] sm:$0xff]  ;;  %v4386_v16 = vld [vmem:[#allocation13 + $0x138] sm:$0xff] }
 0x39f   :  { %4049 = vmatprep.subr.bf16.mxu1 %v7414_v20  ;;  %v3331_v20 = vld [vmem:[#allocation11] sm:$0x3] }
 0x3a0   :  { %v3340_v21 = vrot.slane %v3331_v20, %v8905_v24 }
 0x3a2   :  { %4050 = vmatpush2.bf16.msra.mxu1 %v7413_v23  ;;  %v3336_v23 = vrot.slane %v3331_v20, %v8907_v26  ;;  %v7454_v20 = vcombine.high %v4385_v15, %v4386_v16 }
 0x3a3   :  { %4051 = vmatprep.subr.bf16.mxu1 %v7412_v25 }
 0x3a6   :  { %4052 = vmatpush2.bf16.msra.mxu1 %v7411_v27 }
 0x3a7   :  { %4053 = vmatprep.subr.bf16.mxu1 %v7410_v35  ;;  %v4118_v35 = vld [vmem:[#allocation13 + $0x490] sm:$0xff] }
 0x3a8   :  { %v7430_v44 = vcombine.high %v4118_v35, %v4119_v37  ;;  %v7429_v49 = vcombine.low %v4118_v35, %v4119_v37 }
 0x3aa   :  { %4054 = vmatpush2.bf16.msra.mxu1 %v7409_v34 }
 0x3ab   :  { %4055 = vmatprep.subr.bf16.mxu1 %v7408_v43  ;;  %v4116_v43 = vld [vmem:[#allocation13 + $0x3d0] sm:$0xff] }
 0x3ac   :  { %v7427_v58 = vcombine.low %v4116_v43, %v4117_v46 }
 0x3ae   :  { %4056 = vmatpush2.bf16.msra.mxu1 %v7407_v42 }
 0x3af   :  { %4057 = vmatprep.subr.bf16.mxu1 %v7406_v51  ;;  %v7428_v51 = vcombine.high %v4116_v43, %v4117_v46  ;;  %v4411_v43 = vld [vmem:[#allocation13 + $0xa98] sm:$0xff] }
 0x3b2   :  { %4058 = vmatpush2.bf16.msra.mxu1 %v7405_v50  ;;  %v7463_v50 = vcombine.low %v4395_v38, %v4396_v39  ;;  %v4134_v39 = vld [vmem:[#allocation13 + $0xa90] sm:$0xff] }
 0x3b3   :  { %4059 = vmatprep.subr.bf16.mxu1 %v7404_v61  ;;  %v7426_v61 = vcombine.high %v4114_v53, %v4115_v54 }
 0x3b6   :  { %4060 = vmatpush2.bf16.msra.mxu1 %v7403_v59  ;;  %v7461_v59 = vcombine.low %v4393_v47, %v4394_v48 }
 0x3b7   :  { %4061 = vmatprep.subr.bf16.mxu1 %v7402_v6  ;;  %v7424_v6 = vcombine.high %v4112_v0, %v4113_v1 }
 0x3ba   :  { %4062 = vmatpush2.bf16.msra.mxu1 %v7401_v5  ;;  %v7459_v5 = vcombine.low %v4391_v55, %v4392_v56 }
 0x3bb   :  { %4063 = vmatprep.subr.bf16.mxu1 %v7400_v11  ;;  %v7422_v11 = vcombine.high %v4110_v8, %v4111_v9 }
 0x3be   :  { %4064 = vmatpush2.bf16.msra.mxu1 %v7399_v10  ;;  %v7457_v10 = vcombine.low %v4389_v2, %v4390_v3 }
 0x3bf   :  { %4587 = vmatprep.subr.bf16.mxu1 %v7466_v19  ;;  %v7420_v19 = vcombine.high %v4108_v13, %v4109_v14 }
 0x441   :  { %v3537_v22 = vpop.f32.mrf.mxu1 }
 0x442   :  { %v3538_v30 = vadd.f32 %v3537_v22, %v3336_v23  ;;  %v4107_v22 = vld [vmem:[#allocation13 + $0x70] sm:$0xff] }
 0x443   :  { %v3539_v25 = vpop.f32.mrf.mxu1 }
 0x444   :  { %v3540_v27 = vadd.f32 %v3539_v25, %v3340_v21  ;;  %v4384_v25 = vld [vmem:[#allocation13 + $0x78] sm:$0xff] }
 0x445   :  { %v3541_v28 = vpop.f32.mrf.mxu1 }
 0x446   :  { %v3542_v29 = vadd.f32 %v3541_v28, %v3336_v23  ;;  %8466 = vtanh.f32 %v3540_v27  ;;  %v4383_v23 = vld [vmem:[#allocation13 + $0x18] sm:$0xff]  ;;  %v7419_v27 = vcombine.low %v4108_v13, %v4109_v14  ;;  %v7453_v28 = vcombine.low %v4385_v15, %v4386_v16 }
 0x447   :  { %v3543_v31 = vpop.f32.mrf.mxu1 }
 0x448   :  { %v3544_v32 = vadd.f32 %v3543_v31, %v3340_v21  ;;  %8468 = vtanh.f32 %v3542_v29  ;;  %v4106_v21 = vld [vmem:[#allocation13 + $0x10] sm:$0xff] }
 0x449   :  { %v7418_v29 = vcombine.high %v4106_v21, %v4107_v22  ;;  %v4136_v31 = vld [vmem:[#allocation13 + $0xb50] sm:$0xff]  ;;  %v7417_v35 = vcombine.low %v4106_v21, %v4107_v22 }
 0x44a   :  { %8470 = vtanh.f32 %v3544_v32  ;;  %v4137_v32 = vld [vmem:[#allocation13 + $0xbb0] sm:$0xff] }
 0x44b   :  { %8472 = vtanh.f32 %v3538_v30  ;;  %v7452_v30 = vcombine.high %v4383_v23, %v4384_v25  ;;  %v7448_v37 = vcombine.high %v4136_v31, %v4137_v32 }
 0x453   :  { %v8467_v33 = vpop.eup %8466 }
 0x455   :  { %v8469_v34 = vpop.eup %8468 }
 0x457   :  { %v8471_v36 = vpop.eup %8470 }
 0x458   :  { %v8473_v40 = vpop.eup %8472  ;;  %v8926_v41 = vpack.c.bf16 %v8471_v36, %v8467_v33  ;;  %v4413_v33 = vld [vmem:[#allocation13 + $0xb58] sm:$0xff]  ;;  %v7451_v36 = vcombine.low %v4383_v23, %v4384_v25 }
 0x459   :  { %v8928_v42 = vpack.c.bf16 %v8469_v34, %v8473_v40  ;;  %v4414_v34 = vld [vmem:[#allocation13 + $0xbb8] sm:$0xff]  ;;  %v4135_v40 = vld [vmem:[#allocation13 + $0xaf0] sm:$0xff] }
 0x45a   :  { %3788 = vmatprep.mubr.bf16.mxu0 %v8926_v41  ;;  %4065 = vmatprep.mubr.bf16.mxu1 %v8926_v41  ;;  %v7482_v38 = vcombine.high %v4413_v33, %v4414_v34  ;;  %v7481_v46 = vcombine.low %v4413_v33, %v4414_v34  ;;  %v7446_v47 = vcombine.high %v4134_v39, %v4135_v40 }
 0x45b   :  { %3789 = vmatmul.mubr.bf16.vlgmr.msra.gmra.mxu0 %v8928_v42  ;;  %4066 = vmatmul.mubr.bf16.vlgmr.msra.gmra.mxu1 %v8928_v42  ;;  %v7445_v53 = vcombine.low %v4134_v39, %v4135_v40 }
 0x45c   :  { %4311 = vmatpush1.bf16.msra.mxu0 %v7431_v17  ;;  %4588 = vmatpush1.bf16.msra.mxu1 %v7465_v18  ;;  %v7421_v17 = vcombine.low %v4110_v8, %v4111_v9  ;;  %v7455_v18 = vcombine.low %v4387_v57, %v4388_v60 }
 0x45d   :  { %4342 = vmatprep.mubr.bf16.mxu0 %v8926_v41  ;;  %4619 = vmatprep.mubr.bf16.mxu1 %v8926_v41 }
 0x45e   :  { %4312 = vmatprep.subr.bf16.mxu0 %v7430_v44  ;;  %4589 = vmatprep.subr.bf16.mxu1 %v7464_v45  ;;  %v4412_v44 = vld [vmem:[#allocation13 + $0xaf8] sm:$0xff]  ;;  %v7447_v45 = vcombine.low %v4136_v31, %v4137_v32 }
 0x45f   :  { %v7480_v48 = vcombine.high %v4411_v43, %v4412_v44  ;;  %v7479_v54 = vcombine.low %v4411_v43, %v4412_v44 }
 0x460   :  { %4313 = vmatpush1.bf16.msra.mxu0 %v7429_v49  ;;  %4590 = vmatpush1.bf16.msra.mxu1 %v7463_v50  ;;  %v4132_v49 = vld [vmem:[#allocation13 + $0x9d0] sm:$0xff] }
 0x461   :  { %4314 = vmatprep.subr.bf16.mxu0 %v7428_v51  ;;  %4591 = vmatprep.subr.bf16.mxu1 %v7462_v52  ;;  %v4133_v50 = vld [vmem:[#allocation13 + $0xa30] sm:$0xff]  ;;  %v4409_v51 = vld [vmem:[#allocation13 + $0x9d8] sm:$0xff] }
 0x462   :  { %v4410_v52 = vld [vmem:[#allocation13 + $0xa38] sm:$0xff]  ;;  %v7444_v55 = vcombine.high %v4132_v49, %v4133_v50  ;;  %v7443_v0 = vcombine.low %v4132_v49, %v4133_v50 }
 0x463   :  { %v7478_v56 = vcombine.high %v4409_v51, %v4410_v52  ;;  %v7477_v1 = vcombine.low %v4409_v51, %v4410_v52 }
 0x464   :  { %4315 = vmatpush1.bf16.msra.mxu0 %v7427_v58  ;;  %4592 = vmatpush1.bf16.msra.mxu1 %v7461_v59  ;;  %v4130_v58 = vld [vmem:[#allocation13 + $0x910] sm:$0xff] }
 0x465   :  { %4316 = vmatprep.subr.bf16.mxu0 %v7426_v61  ;;  %4593 = vmatprep.subr.bf16.mxu1 %v7460_v62  ;;  %v4131_v59 = vld [vmem:[#allocation13 + $0x970] sm:$0xff]  ;;  %v4407_v61 = vld [vmem:[#allocation13 + $0x918] sm:$0xff] }
 0x466   :  { %v4408_v62 = vld [vmem:[#allocation13 + $0x978] sm:$0xff]  ;;  %v7442_v2 = vcombine.high %v4130_v58, %v4131_v59  ;;  %v7441_v8 = vcombine.low %v4130_v58, %v4131_v59 }
 0x467   :  { %v7476_v3 = vcombine.high %v4407_v61, %v4408_v62  ;;  %v7475_v9 = vcombine.low %v4407_v61, %v4408_v62 }
 0x468   :  { %4317 = vmatpush1.bf16.msra.mxu0 %v7425_v4  ;;  %4594 = vmatpush1.bf16.msra.mxu1 %v7459_v5  ;;  %v4128_v4 = vld [vmem:[#allocation13 + $0x850] sm:$0xff] }
 0x469   :  { %4318 = vmatprep.subr.bf16.mxu0 %v7424_v6  ;;  %4595 = vmatprep.subr.bf16.mxu1 %v7458_v7  ;;  %v4129_v5 = vld [vmem:[#allocation13 + $0x8b0] sm:$0xff]  ;;  %v4405_v6 = vld [vmem:[#allocation13 + $0x858] sm:$0xff] }
 0x46a   :  { %v4406_v7 = vld [vmem:[#allocation13 + $0x8b8] sm:$0xff]  ;;  %v7440_v57 = vcombine.high %v4128_v4, %v4129_v5  ;;  %v7439_v13 = vcombine.low %v4128_v4, %v4129_v5 }
 0x46b   :  { %v7474_v60 = vcombine.high %v4405_v6, %v4406_v7  ;;  %v7473_v14 = vcombine.low %v4405_v6, %v4406_v7 }
 0x46c   :  { %4319 = vmatpush1.bf16.msra.mxu0 %v7423_v63  ;;  %4596 = vmatpush1.bf16.msra.mxu1 %v7457_v10  ;;  %v4126_v63 = vld [vmem:[#allocation13 + $0x790] sm:$0xff] }
 0x46d   :  { %4320 = vmatprep.subr.bf16.mxu0 %v7422_v11  ;;  %4597 = vmatprep.subr.bf16.mxu1 %v7456_v12  ;;  %v4127_v10 = vld [vmem:[#allocation13 + $0x7f0] sm:$0xff]  ;;  %v4403_v11 = vld [vmem:[#allocation13 + $0x798] sm:$0xff] }
 0x46e   :  { %v4404_v12 = vld [vmem:[#allocation13 + $0x7f8] sm:$0xff]  ;;  %v7438_v15 = vcombine.high %v4126_v63, %v4127_v10  ;;  %v7437_v21 = vcombine.low %v4126_v63, %v4127_v10 }
 0x46f   :  { %v7472_v16 = vcombine.high %v4403_v11, %v4404_v12  ;;  %v7471_v22 = vcombine.low %v4403_v11, %v4404_v12 }
 0x470   :  { %4321 = vmatpush1.bf16.msra.mxu0 %v7421_v17  ;;  %4598 = vmatpush1.bf16.msra.mxu1 %v7455_v18  ;;  %v4124_v17 = vld [vmem:[#allocation13 + $0x6d0] sm:$0xff] }
 0x471   :  { %4322 = vmatprep.subr.bf16.mxu0 %v7420_v19  ;;  %4599 = vmatprep.subr.bf16.mxu1 %v7454_v20  ;;  %v4125_v18 = vld [vmem:[#allocation13 + $0x730] sm:$0xff]  ;;  %v4401_v19 = vld [vmem:[#allocation13 + $0x6d8] sm:$0xff] }
 0x472   :  { %v4402_v20 = vld [vmem:[#allocation13 + $0x738] sm:$0xff]  ;;  %v7436_v23 = vcombine.high %v4124_v17, %v4125_v18  ;;  %v7435_v31 = vcombine.low %v4124_v17, %v4125_v18 }
 0x473   :  { %v7470_v25 = vcombine.high %v4401_v19, %v4402_v20  ;;  %v7469_v32 = vcombine.low %v4401_v19, %v4402_v20 }
 0x474   :  { %4323 = vmatpush1.bf16.msra.mxu0 %v7419_v27  ;;  %4600 = vmatpush1.bf16.msra.mxu1 %v7453_v28  ;;  %v4122_v27 = vld [vmem:[#allocation13 + $0x610] sm:$0xff] }
 0x475   :  { %4324 = vmatprep.subr.bf16.mxu0 %v7418_v29  ;;  %4601 = vmatprep.subr.bf16.mxu1 %v7452_v30  ;;  %v4123_v28 = vld [vmem:[#allocation13 + $0x670] sm:$0xff]  ;;  %v4399_v29 = vld [vmem:[#allocation13 + $0x618] sm:$0xff] }
 0x476   :  { %v4400_v30 = vld [vmem:[#allocation13 + $0x678] sm:$0xff]  ;;  %v7434_v33 = vcombine.high %v4122_v27, %v4123_v28  ;;  %v7433_v39 = vcombine.low %v4122_v27, %v4123_v28 }
 0x477   :  { %v7468_v34 = vcombine.high %v4399_v29, %v4400_v30  ;;  %v7467_v40 = vcombine.low %v4399_v29, %v4400_v30 }
 0x478   :  { %4325 = vmatpush1.bf16.msra.mxu0 %v7417_v35  ;;  %4602 = vmatpush1.bf16.msra.mxu1 %v7451_v36  ;;  %v4674_v35 = vld [vmem:[#allocation13 + $0x560] sm:$0xff] }
 0x479   :  { %4326 = vmatprep.subr.bf16.mxu0 %v7448_v37  ;;  %4603 = vmatprep.subr.bf16.mxu1 %v7482_v38  ;;  %v4675_v36 = vld [vmem:[#allocation13 + $0x5c0] sm:$0xff]  ;;  %v4951_v37 = vld [vmem:[#allocation13 + $0x568] sm:$0xff] }
 0x47a   :  { %v4952_v38 = vld [vmem:[#allocation13 + $0x5c8] sm:$0xff]  ;;  %v7500_v43 = vcombine.high %v4674_v35, %v4675_v36  ;;  %v7499_v49 = vcombine.low %v4674_v35, %v4675_v36 }
 0x47b   :  { %v7534_v44 = vcombine.high %v4951_v37, %v4952_v38  ;;  %v7533_v50 = vcombine.low %v4951_v37, %v4952_v38 }
 0x47c   :  { %4327 = vmatpush2.bf16.msra.mxu0 %v7447_v45  ;;  %4604 = vmatpush2.bf16.msra.mxu1 %v7481_v46  ;;  %v4672_v45 = vld [vmem:[#allocation13 + $0x4a0] sm:$0xff] }
 0x47d   :  { %4328 = vmatprep.subr.bf16.mxu0 %v7446_v47  ;;  %4605 = vmatprep.subr.bf16.mxu1 %v7480_v48  ;;  %v4673_v46 = vld [vmem:[#allocation13 + $0x500] sm:$0xff]  ;;  %v4949_v47 = vld [vmem:[#allocation13 + $0x4a8] sm:$0xff] }
 0x47e   :  { %v4950_v48 = vld [vmem:[#allocation13 + $0x508] sm:$0xff]  ;;  %v7498_v51 = vcombine.high %v4672_v45, %v4673_v46  ;;  %v7497_v58 = vcombine.low %v4672_v45, %v4673_v46 }
 0x47f   :  { %v7532_v52 = vcombine.high %v4949_v47, %v4950_v48  ;;  %v7531_v59 = vcombine.low %v4949_v47, %v4950_v48 }
 0x480   :  { %4329 = vmatpush2.bf16.msra.mxu0 %v7445_v53  ;;  %4606 = vmatpush2.bf16.msra.mxu1 %v7479_v54  ;;  %v4670_v53 = vld [vmem:[#allocation13 + $0x3e0] sm:$0xff] }
 0x481   :  { %4330 = vmatprep.subr.bf16.mxu0 %v7444_v55  ;;  %4607 = vmatprep.subr.bf16.mxu1 %v7478_v56  ;;  %v4671_v54 = vld [vmem:[#allocation13 + $0x440] sm:$0xff]  ;;  %v4947_v55 = vld [vmem:[#allocation13 + $0x3e8] sm:$0xff] }
 0x482   :  { %v4948_v56 = vld [vmem:[#allocation13 + $0x448] sm:$0xff]  ;;  %v7496_v61 = vcombine.high %v4670_v53, %v4671_v54  ;;  %v7495_v4 = vcombine.low %v4670_v53, %v4671_v54 }
 0x483   :  { %v7530_v62 = vcombine.high %v4947_v55, %v4948_v56  ;;  %v7529_v5 = vcombine.low %v4947_v55, %v4948_v56 }
 0x484   :  { %4331 = vmatpush2.bf16.msra.mxu0 %v7443_v0  ;;  %4608 = vmatpush2.bf16.msra.mxu1 %v7477_v1  ;;  %v4668_v0 = vld [vmem:[#allocation13 + $0x320] sm:$0xff] }
 0x485   :  { %4332 = vmatprep.subr.bf16.mxu0 %v7442_v2  ;;  %4609 = vmatprep.subr.bf16.mxu1 %v7476_v3  ;;  %v4669_v1 = vld [vmem:[#allocation13 + $0x380] sm:$0xff]  ;;  %v4945_v2 = vld [vmem:[#allocation13 + $0x328] sm:$0xff] }
 0x486   :  { %v4946_v3 = vld [vmem:[#allocation13 + $0x388] sm:$0xff]  ;;  %v7494_v6 = vcombine.high %v4668_v0, %v4669_v1  ;;  %v7493_v63 = vcombine.low %v4668_v0, %v4669_v1 }
 0x487   :  { %v7528_v7 = vcombine.high %v4945_v2, %v4946_v3  ;;  %v7527_v10 = vcombine.low %v4945_v2, %v4946_v3 }
 0x488   :  { %4333 = vmatpush2.bf16.msra.mxu0 %v7441_v8  ;;  %4610 = vmatpush2.bf16.msra.mxu1 %v7475_v9  ;;  %v4666_v8 = vld [vmem:[#allocation13 + $0x260] sm:$0xff] }
 0x489   :  { %4334 = vmatprep.subr.bf16.mxu0 %v7440_v57  ;;  %4611 = vmatprep.subr.bf16.mxu1 %v7474_v60  ;;  %v4667_v9 = vld [vmem:[#allocation13 + $0x2c0] sm:$0xff]  ;;  %v4943_v57 = vld [vmem:[#allocation13 + $0x268] sm:$0xff] }
 0x48a   :  { %v4944_v60 = vld [vmem:[#allocation13 + $0x2c8] sm:$0xff]  ;;  %v7492_v11 = vcombine.high %v4666_v8, %v4667_v9  ;;  %v7491_v17 = vcombine.low %v4666_v8, %v4667_v9 }
 0x48b   :  { %v7526_v12 = vcombine.high %v4943_v57, %v4944_v60  ;;  %v7525_v18 = vcombine.low %v4943_v57, %v4944_v60 }
 0x48c   :  { %4335 = vmatpush2.bf16.msra.mxu0 %v7439_v13  ;;  %4612 = vmatpush2.bf16.msra.mxu1 %v7473_v14  ;;  %v4664_v13 = vld [vmem:[#allocation13 + $0x1a0] sm:$0xff] }
 0x48d   :  { %4336 = vmatprep.subr.bf16.mxu0 %v7438_v15  ;;  %4613 = vmatprep.subr.bf16.mxu1 %v7472_v16  ;;  %v4665_v14 = vld [vmem:[#allocation13 + $0x200] sm:$0xff]  ;;  %v4941_v15 = vld [vmem:[#allocation13 + $0x1a8] sm:$0xff] }
 0x48e   :  { %v4942_v16 = vld [vmem:[#allocation13 + $0x208] sm:$0xff]  ;;  %v7490_v19 = vcombine.high %v4664_v13, %v4665_v14  ;;  %v7489_v27 = vcombine.low %v4664_v13, %v4665_v14 }
 0x48f   :  { %v7524_v20 = vcombine.high %v4941_v15, %v4942_v16  ;;  %v7523_v28 = vcombine.low %v4941_v15, %v4942_v16 }
 0x490   :  { %4337 = vmatpush2.bf16.msra.mxu0 %v7437_v21  ;;  %4614 = vmatpush2.bf16.msra.mxu1 %v7471_v22  ;;  %v4662_v21 = vld [vmem:[#allocation13 + $0xe0] sm:$0xff] }
 0x491   :  { %4338 = vmatprep.subr.bf16.mxu0 %v7436_v23  ;;  %4615 = vmatprep.subr.bf16.mxu1 %v7470_v25  ;;  %v4663_v22 = vld [vmem:[#allocation13 + $0x140] sm:$0xff]  ;;  %v4939_v23 = vld [vmem:[#allocation13 + $0xe8] sm:$0xff] }
 0x492   :  { %v4940_v25 = vld [vmem:[#allocation13 + $0x148] sm:$0xff]  ;;  %v7488_v29 = vcombine.high %v4662_v21, %v4663_v22  ;;  %v7487_v35 = vcombine.low %v4662_v21, %v4663_v22 }
 0x493   :  { %v7522_v30 = vcombine.high %v4939_v23, %v4940_v25  ;;  %v7521_v36 = vcombine.low %v4939_v23, %v4940_v25 }
 0x494   :  { %4339 = vmatpush2.bf16.msra.mxu0 %v7435_v31  ;;  %4616 = vmatpush2.bf16.msra.mxu1 %v7469_v32  ;;  %v4660_v31 = vld [vmem:[#allocation13 + $0x20] sm:$0xff] }
 0x495   :  { %4340 = vmatprep.subr.bf16.mxu0 %v7434_v33  ;;  %4617 = vmatprep.subr.bf16.mxu1 %v7468_v34  ;;  %v4661_v32 = vld [vmem:[#allocation13 + $0x80] sm:$0xff]  ;;  %v4937_v33 = vld [vmem:[#allocation13 + $0x28] sm:$0xff] }
 0x496   :  { %v4938_v34 = vld [vmem:[#allocation13 + $0x88] sm:$0xff]  ;;  %v7486_v37 = vcombine.high %v4660_v31, %v4661_v32  ;;  %v7485_v45 = vcombine.low %v4660_v31, %v4661_v32 }
 0x497   :  { %v7520_v38 = vcombine.high %v4937_v33, %v4938_v34  ;;  %v7519_v46 = vcombine.low %v4937_v33, %v4938_v34 }
 0x498   :  { %4341 = vmatpush2.bf16.msra.mxu0 %v7433_v39  ;;  %4618 = vmatpush2.bf16.msra.mxu1 %v7467_v40  ;;  %v4690_v39 = vld [vmem:[#allocation13 + $0xb60] sm:$0xff] }
 0x499   :  { %4864 = vmatprep.subr.bf16.mxu0 %v7500_v43  ;;  %5141 = vmatprep.subr.bf16.mxu1 %v7534_v44  ;;  %v4691_v40 = vld [vmem:[#allocation13 + $0xbc0] sm:$0xff]  ;;  %v4967_v43 = vld [vmem:[#allocation13 + $0xb68] sm:$0xff] }
 0x49a   :  { %v4968_v44 = vld [vmem:[#allocation13 + $0xbc8] sm:$0xff]  ;;  %v7516_v47 = vcombine.high %v4690_v39, %v4691_v40  ;;  %v7515_v53 = vcombine.low %v4690_v39, %v4691_v40 }
 0x49b   :  { %4343 = vmatmul.mubr.bf16.vlgmr.msra.gmra.mxu0 %v8928_v42  ;;  %4620 = vmatmul.mubr.bf16.vlgmr.msra.gmra.mxu1 %v8928_v42  ;;  %v7550_v48 = vcombine.high %v4967_v43, %v4968_v44  ;;  %v7549_v54 = vcombine.low %v4967_v43, %v4968_v44 }
 0x49c   :  { %4865 = vmatpush1.bf16.msra.mxu0 %v7499_v49  ;;  %4896 = vmatprep.mubr.bf16.mxu0 %v8926_v41  ;;  %v4688_v49 = vld [vmem:[#allocation13 + $0xaa0] sm:$0xff] }
 0x49d   :  { %5142 = vmatpush1.bf16.msra.mxu1 %v7533_v50  ;;  %5173 = vmatprep.mubr.bf16.mxu1 %v8926_v41  ;;  %v4689_v50 = vld [vmem:[#allocation13 + $0xb00] sm:$0xff] }
 0x49e   :  { %4866 = vmatprep.subr.bf16.mxu0 %v7498_v51  ;;  %5143 = vmatprep.subr.bf16.mxu1 %v7532_v52  ;;  %v4965_v51 = vld [vmem:[#allocation13 + $0xaa8] sm:$0xff]  ;;  %v7514_v55 = vcombine.high %v4688_v49, %v4689_v50  ;;  %v7513_v0 = vcombine.low %v4688_v49, %v4689_v50 }
 0x49f   :  { %v4966_v52 = vld [vmem:[#allocation13 + $0xb08] sm:$0xff] }
 0x4a0   :  { %4867 = vmatpush1.bf16.msra.mxu0 %v7497_v58  ;;  %v7548_v56 = vcombine.high %v4965_v51, %v4966_v52  ;;  %v4686_v58 = vld [vmem:[#allocation13 + $0x9e0] sm:$0xff]  ;;  %v7547_v1 = vcombine.low %v4965_v51, %v4966_v52 }
 0x4a1   :  { %5144 = vmatpush1.bf16.msra.mxu1 %v7531_v59  ;;  %4868 = vmatprep.subr.bf16.mxu0 %v7496_v61  ;;  %v4687_v59 = vld [vmem:[#allocation13 + $0xa40] sm:$0xff]  ;;  %v4963_v61 = vld [vmem:[#allocation13 + $0x9e8] sm:$0xff] }
 0x4a2   :  { %5145 = vmatprep.subr.bf16.mxu1 %v7530_v62  ;;  %v4964_v62 = vld [vmem:[#allocation13 + $0xa48] sm:$0xff]  ;;  %v7512_v2 = vcombine.high %v4686_v58, %v4687_v59  ;;  %v7511_v8 = vcombine.low %v4686_v58, %v4687_v59  ;;  %v5504_v58 = vld [vmem:[#allocation13 + $0x518] sm:$0xff] }
 0x4a3   :  { %v7546_v3 = vcombine.high %v4963_v61, %v4964_v62  ;;  %v7545_v9 = vcombine.low %v4963_v61, %v4964_v62  ;;  %v5224_v62 = vld [vmem:[#allocation13 + $0x3f0] sm:$0xff] }
 0x4a4   :  { %4869 = vmatpush1.bf16.msra.mxu0 %v7495_v4  ;;  %v4684_v4 = vld [vmem:[#allocation13 + $0x920] sm:$0xff] }
 0x4a5   :  { %5146 = vmatpush1.bf16.msra.mxu1 %v7529_v5  ;;  %4870 = vmatprep.subr.bf16.mxu0 %v7494_v6  ;;  %v4685_v5 = vld [vmem:[#allocation13 + $0x980] sm:$0xff]  ;;  %v4961_v6 = vld [vmem:[#allocation13 + $0x928] sm:$0xff] }
 0x4a6   :  { %5147 = vmatprep.subr.bf16.mxu1 %v7528_v7  ;;  %v4962_v7 = vld [vmem:[#allocation13 + $0x988] sm:$0xff]  ;;  %v7510_v57 = vcombine.high %v4684_v4, %v4685_v5  ;;  %v7509_v13 = vcombine.low %v4684_v4, %v4685_v5 }
 0x4a7   :  { %v7544_v60 = vcombine.high %v4961_v6, %v4962_v7  ;;  %v7543_v14 = vcombine.low %v4961_v6, %v4962_v7 }
 0x4a8   :  { %4871 = vmatpush1.bf16.msra.mxu0 %v7493_v63  ;;  %v4682_v63 = vld [vmem:[#allocation13 + $0x860] sm:$0xff] }
 0x4a9   :  { %5148 = vmatpush1.bf16.msra.mxu1 %v7527_v10  ;;  %4872 = vmatprep.subr.bf16.mxu0 %v7492_v11  ;;  %v4683_v10 = vld [vmem:[#allocation13 + $0x8c0] sm:$0xff]  ;;  %v4959_v11 = vld [vmem:[#allocation13 + $0x868] sm:$0xff] }
 0x4aa   :  { %5149 = vmatprep.subr.bf16.mxu1 %v7526_v12  ;;  %v4960_v12 = vld [vmem:[#allocation13 + $0x8c8] sm:$0xff]  ;;  %v7508_v15 = vcombine.high %v4682_v63, %v4683_v10  ;;  %v7507_v21 = vcombine.low %v4682_v63, %v4683_v10 }
 0x4ab   :  { %v7542_v16 = vcombine.high %v4959_v11, %v4960_v12  ;;  %v7541_v22 = vcombine.low %v4959_v11, %v4960_v12 }
 0x4ac   :  { %4873 = vmatpush1.bf16.msra.mxu0 %v7491_v17  ;;  %v4680_v17 = vld [vmem:[#allocation13 + $0x7a0] sm:$0xff] }
 0x4ad   :  { %5150 = vmatpush1.bf16.msra.mxu1 %v7525_v18  ;;  %4874 = vmatprep.subr.bf16.mxu0 %v7490_v19  ;;  %v4681_v18 = vld [vmem:[#allocation13 + $0x800] sm:$0xff]  ;;  %v4957_v19 = vld [vmem:[#allocation13 + $0x7a8] sm:$0xff] }
 0x4ae   :  { %5151 = vmatprep.subr.bf16.mxu1 %v7524_v20  ;;  %v4958_v20 = vld [vmem:[#allocation13 + $0x808] sm:$0xff]  ;;  %v7506_v23 = vcombine.high %v4680_v17, %v4681_v18  ;;  %v7505_v31 = vcombine.low %v4680_v17, %v4681_v18 }
 0x4af   :  { %v7540_v25 = vcombine.high %v4957_v19, %v4958_v20  ;;  %v7539_v32 = vcombine.low %v4957_v19, %v4958_v20 }
 0x4b0   :  { %4875 = vmatpush1.bf16.msra.mxu0 %v7489_v27  ;;  %v4678_v27 = vld [vmem:[#allocation13 + $0x6e0] sm:$0xff] }
 0x4b1   :  { %5152 = vmatpush1.bf16.msra.mxu1 %v7523_v28  ;;  %4876 = vmatprep.subr.bf16.mxu0 %v7488_v29  ;;  %v4679_v28 = vld [vmem:[#allocation13 + $0x740] sm:$0xff]  ;;  %v4955_v29 = vld [vmem:[#allocation13 + $0x6e8] sm:$0xff] }
 0x4b2   :  { %5153 = vmatprep.subr.bf16.mxu1 %v7522_v30  ;;  %v4956_v30 = vld [vmem:[#allocation13 + $0x748] sm:$0xff]  ;;  %v7504_v33 = vcombine.high %v4678_v27, %v4679_v28  ;;  %v7503_v39 = vcombine.low %v4678_v27, %v4679_v28 }
 0x4b3   :  { %v7538_v34 = vcombine.high %v4955_v29, %v4956_v30  ;;  %v7537_v40 = vcombine.low %v4955_v29, %v4956_v30 }
 0x4b4   :  { %4877 = vmatpush1.bf16.msra.mxu0 %v7487_v35  ;;  %v4676_v35 = vld [vmem:[#allocation13 + $0x620] sm:$0xff] }
 0x4b5   :  { %5154 = vmatpush1.bf16.msra.mxu1 %v7521_v36  ;;  %4878 = vmatprep.subr.bf16.mxu0 %v7486_v37  ;;  %v4677_v36 = vld [vmem:[#allocation13 + $0x680] sm:$0xff]  ;;  %v4953_v37 = vld [vmem:[#allocation13 + $0x628] sm:$0xff] }
 0x4b6   :  { %5155 = vmatprep.subr.bf16.mxu1 %v7520_v38  ;;  %v4954_v38 = vld [vmem:[#allocation13 + $0x688] sm:$0xff]  ;;  %v7502_v43 = vcombine.high %v4676_v35, %v4677_v36  ;;  %v7501_v49 = vcombine.low %v4676_v35, %v4677_v36 }
 0x4b7   :  { %v7536_v44 = vcombine.high %v4953_v37, %v4954_v38  ;;  %v7535_v50 = vcombine.low %v4953_v37, %v4954_v38 }
 0x4b8   :  { %4879 = vmatpush1.bf16.msra.mxu0 %v7485_v45  ;;  %v5228_v45 = vld [vmem:[#allocation13 + $0x570] sm:$0xff] }
 0x4b9   :  { %5156 = vmatpush1.bf16.msra.mxu1 %v7519_v46  ;;  %4880 = vmatprep.subr.bf16.mxu0 %v7516_v47  ;;  %v5229_v46 = vld [vmem:[#allocation13 + $0x5d0] sm:$0xff]  ;;  %v5505_v47 = vld [vmem:[#allocation13 + $0x578] sm:$0xff] }
 0x4ba   :  { %5157 = vmatprep.subr.bf16.mxu1 %v7550_v48  ;;  %v5506_v48 = vld [vmem:[#allocation13 + $0x5d8] sm:$0xff]  ;;  %v7568_v51 = vcombine.high %v5228_v45, %v5229_v46 }
 0x4bb   :  { %v7602_v52 = vcombine.high %v5505_v47, %v5506_v48  ;;  %v7601_v59 = vcombine.low %v5505_v47, %v5506_v48 }
 0x4bc   :  { %4881 = vmatpush2.bf16.msra.mxu0 %v7515_v53  ;;  %v5226_v53 = vld [vmem:[#allocation13 + $0x4b0] sm:$0xff] }
 0x4bd   :  { %5158 = vmatpush2.bf16.msra.mxu1 %v7549_v54  ;;  %4882 = vmatprep.subr.bf16.mxu0 %v7514_v55  ;;  %v5227_v54 = vld [vmem:[#allocation13 + $0x510] sm:$0xff]  ;;  %v7567_v55 = vcombine.low %v5228_v45, %v5229_v46 }
 0x4be   :  { %5159 = vmatprep.subr.bf16.mxu1 %v7548_v56  ;;  %v5503_v56 = vld [vmem:[#allocation13 + $0x4b8] sm:$0xff]  ;;  %v7566_v61 = vcombine.high %v5226_v53, %v5227_v54  ;;  %v7565_v4 = vcombine.low %v5226_v53, %v5227_v54 }
 0x4bf   :  { %v7599_v5 = vcombine.low %v5503_v56, %v5504_v58 }
 0x4c0   :  { %4883 = vmatpush2.bf16.msra.mxu0 %v7513_v0  ;;  %v5225_v0 = vld [vmem:[#allocation13 + $0x450] sm:$0xff] }
 0x4c1   :  { %5160 = vmatpush2.bf16.msra.mxu1 %v7547_v1  ;;  %4884 = vmatprep.subr.bf16.mxu0 %v7512_v2  ;;  %v7600_v1 = vcombine.high %v5503_v56, %v5504_v58  ;;  %v5501_v2 = vld [vmem:[#allocation13 + $0x3f8] sm:$0xff]  ;;  %v7564_v6 = vcombine.high %v5224_v62, %v5225_v0  ;;  %v7563_v63 = vcombine.low %v5224_v62, %v5225_v0  ;;  %v5242_v58 = vld [vmem:[#allocation13 + $0xab0] sm:$0xff] }
 0x4c2   :  { %5161 = vmatprep.subr.bf16.mxu1 %v7546_v3  ;;  %v5502_v3 = vld [vmem:[#allocation13 + $0x458] sm:$0xff] }
 0x4c3   :  { %v7598_v7 = vcombine.high %v5501_v2, %v5502_v3  ;;  %v7597_v10 = vcombine.low %v5501_v2, %v5502_v3  ;;  %v5520_v62 = vld [vmem:[#allocation13 + $0xb18] sm:$0xff] }
 0x4c4   :  { %4885 = vmatpush2.bf16.msra.mxu0 %v7511_v8  ;;  %v5222_v8 = vld [vmem:[#allocation13 + $0x330] sm:$0xff] }
 0x4c5   :  { %5162 = vmatpush2.bf16.msra.mxu1 %v7545_v9  ;;  %4886 = vmatprep.subr.bf16.mxu0 %v7510_v57  ;;  %v5223_v9 = vld [vmem:[#allocation13 + $0x390] sm:$0xff]  ;;  %v5499_v57 = vld [vmem:[#allocation13 + $0x338] sm:$0xff] }
 0x4c6   :  { %5163 = vmatprep.subr.bf16.mxu1 %v7544_v60  ;;  %v5500_v60 = vld [vmem:[#allocation13 + $0x398] sm:$0xff]  ;;  %v7562_v11 = vcombine.high %v5222_v8, %v5223_v9  ;;  %v7561_v17 = vcombine.low %v5222_v8, %v5223_v9 }
 0x4c7   :  { %v7596_v12 = vcombine.high %v5499_v57, %v5500_v60  ;;  %v7595_v18 = vcombine.low %v5499_v57, %v5500_v60 }
 0x4c8   :  { %4887 = vmatpush2.bf16.msra.mxu0 %v7509_v13  ;;  %v5220_v13 = vld [vmem:[#allocation13 + $0x270] sm:$0xff] }
 0x4c9   :  { %5164 = vmatpush2.bf16.msra.mxu1 %v7543_v14  ;;  %4888 = vmatprep.subr.bf16.mxu0 %v7508_v15  ;;  %v5221_v14 = vld [vmem:[#allocation13 + $0x2d0] sm:$0xff]  ;;  %v5497_v15 = vld [vmem:[#allocation13 + $0x278] sm:$0xff] }
 0x4ca   :  { %5165 = vmatprep.subr.bf16.mxu1 %v7542_v16  ;;  %v5498_v16 = vld [vmem:[#allocation13 + $0x2d8] sm:$0xff]  ;;  %v7560_v19 = vcombine.high %v5220_v13, %v5221_v14  ;;  %v7559_v27 = vcombine.low %v5220_v13, %v5221_v14 }
 0x4cb   :  { %v7594_v20 = vcombine.high %v5497_v15, %v5498_v16  ;;  %v7593_v28 = vcombine.low %v5497_v15, %v5498_v16 }
 0x4cc   :  { %4889 = vmatpush2.bf16.msra.mxu0 %v7507_v21  ;;  %v5218_v21 = vld [vmem:[#allocation13 + $0x1b0] sm:$0xff] }
 0x4cd   :  { %5166 = vmatpush2.bf16.msra.mxu1 %v7541_v22  ;;  %4890 = vmatprep.subr.bf16.mxu0 %v7506_v23  ;;  %v5219_v22 = vld [vmem:[#allocation13 + $0x210] sm:$0xff]  ;;  %v5495_v23 = vld [vmem:[#allocation13 + $0x1b8] sm:$0xff] }
 0x4ce   :  { %5167 = vmatprep.subr.bf16.mxu1 %v7540_v25  ;;  %v5496_v25 = vld [vmem:[#allocation13 + $0x218] sm:$0xff]  ;;  %v7558_v29 = vcombine.high %v5218_v21, %v5219_v22  ;;  %v7557_v35 = vcombine.low %v5218_v21, %v5219_v22 }
 0x4cf   :  { %v7592_v30 = vcombine.high %v5495_v23, %v5496_v25  ;;  %v7591_v36 = vcombine.low %v5495_v23, %v5496_v25 }
 0x4d0   :  { %4891 = vmatpush2.bf16.msra.mxu0 %v7505_v31  ;;  %v5216_v31 = vld [vmem:[#allocation13 + $0xf0] sm:$0xff] }
 0x4d1   :  { %5168 = vmatpush2.bf16.msra.mxu1 %v7539_v32  ;;  %4892 = vmatprep.subr.bf16.mxu0 %v7504_v33  ;;  %v5217_v32 = vld [vmem:[#allocation13 + $0x150] sm:$0xff]  ;;  %v5493_v33 = vld [vmem:[#allocation13 + $0xf8] sm:$0xff] }
 0x4d2   :  { %5169 = vmatprep.subr.bf16.mxu1 %v7538_v34  ;;  %v5494_v34 = vld [vmem:[#allocation13 + $0x158] sm:$0xff]  ;;  %v7556_v37 = vcombine.high %v5216_v31, %v5217_v32  ;;  %v7555_v45 = vcombine.low %v5216_v31, %v5217_v32 }
 0x4d3   :  { %v7590_v38 = vcombine.high %v5493_v33, %v5494_v34  ;;  %v7589_v46 = vcombine.low %v5493_v33, %v5494_v34 }
 0x4d4   :  { %4893 = vmatpush2.bf16.msra.mxu0 %v7503_v39  ;;  %v5214_v39 = vld [vmem:[#allocation13 + $0x30] sm:$0xff] }
 0x4d5   :  { %5170 = vmatpush2.bf16.msra.mxu1 %v7537_v40  ;;  %4894 = vmatprep.subr.bf16.mxu0 %v7502_v43  ;;  %v5215_v40 = vld [vmem:[#allocation13 + $0x90] sm:$0xff]  ;;  %v5491_v43 = vld [vmem:[#allocation13 + $0x38] sm:$0xff] }
 0x4d6   :  { %5171 = vmatprep.subr.bf16.mxu1 %v7536_v44  ;;  %v5492_v44 = vld [vmem:[#allocation13 + $0x98] sm:$0xff]  ;;  %v7554_v47 = vcombine.high %v5214_v39, %v5215_v40  ;;  %v7553_v53 = vcombine.low %v5214_v39, %v5215_v40 }
 0x4d7   :  { %v7588_v48 = vcombine.high %v5491_v43, %v5492_v44  ;;  %v7587_v54 = vcombine.low %v5491_v43, %v5492_v44 }
 0x4d8   :  { %4895 = vmatpush2.bf16.msra.mxu0 %v7501_v49  ;;  %v5244_v49 = vld [vmem:[#allocation13 + $0xb70] sm:$0xff] }
 0x4d9   :  { %5172 = vmatpush2.bf16.msra.mxu1 %v7535_v50  ;;  %5418 = vmatprep.subr.bf16.mxu0 %v7568_v51  ;;  %v5245_v50 = vld [vmem:[#allocation13 + $0xbd0] sm:$0xff]  ;;  %v5521_v51 = vld [vmem:[#allocation13 + $0xb78] sm:$0xff] }
 0x4da   :  { %5695 = vmatprep.subr.bf16.mxu1 %v7602_v52  ;;  %v5522_v52 = vld [vmem:[#allocation13 + $0xbd8] sm:$0xff]  ;;  %v7583_v0 = vcombine.low %v5244_v49, %v5245_v50 }
 0x4db   :  { %4897 = vmatmul.mubr.bf16.vlgmr.msra.gmra.mxu0 %v8928_v42  ;;  %v7618_v56 = vcombine.high %v5521_v51, %v5522_v52 }
 0x4dc   :  { %5174 = vmatmul.mubr.bf16.vlgmr.msra.gmra.mxu1 %v8928_v42  ;;  %5419 = vmatpush1.bf16.msra.mxu0 %v7567_v55  ;;  %v7584_v55 = vcombine.high %v5244_v49, %v5245_v50 }
 0x4dd   :  { %5450 = vmatprep.mubr.bf16.mxu0 %v8926_v41  ;;  %5696 = vmatpush1.bf16.msra.mxu1 %v7601_v59  ;;  %v5243_v59 = vld [vmem:[#allocation13 + $0xb10] sm:$0xff] }
 0x4de   :  { %5727 = vmatprep.mubr.bf16.mxu1 %v8926_v41  ;;  %5420 = vmatprep.subr.bf16.mxu0 %v7566_v61  ;;  %v5519_v61 = vld [vmem:[#allocation13 + $0xab8] sm:$0xff]  ;;  %v7582_v2 = vcombine.high %v5242_v58, %v5243_v59  ;;  %v7581_v8 = vcombine.low %v5242_v58, %v5243_v59 }
 0x4df   :  { %5697 = vmatprep.subr.bf16.mxu1 %v7600_v1  ;;  %v7617_v1 = vcombine.low %v5521_v51, %v5522_v52  ;;  %v7616_v3 = vcombine.high %v5519_v61, %v5520_v62  ;;  %v7615_v9 = vcombine.low %v5519_v61, %v5520_v62  ;;  %v3584_v62 = vld [vmem:[#allocation14] sm:$0x3] }
 0x4e0   :  { %5421 = vmatpush1.bf16.msra.mxu0 %v7565_v4  ;;  %v5240_v4 = vld [vmem:[#allocation13 + $0x9f0] sm:$0xff] }
 0x4e1   :  { %5698 = vmatpush1.bf16.msra.mxu1 %v7599_v5  ;;  %5422 = vmatprep.subr.bf16.mxu0 %v7564_v6  ;;  %v5241_v5 = vld [vmem:[#allocation13 + $0xa50] sm:$0xff]  ;;  %v5517_v6 = vld [vmem:[#allocation13 + $0x9f8] sm:$0xff] }
 0x4e2   :  { %5699 = vmatprep.subr.bf16.mxu1 %v7598_v7  ;;  %v5518_v7 = vld [vmem:[#allocation13 + $0xa58] sm:$0xff]  ;;  %v7580_v57 = vcombine.high %v5240_v4, %v5241_v5  ;;  %v7579_v13 = vcombine.low %v5240_v4, %v5241_v5  ;;  %v3589_v5 = vrot.slane %v3584_v62, %v8907_v26 }
 0x4e3   :  { %v7614_v60 = vcombine.high %v5517_v6, %v5518_v7  ;;  %v7613_v14 = vcombine.low %v5517_v6, %v5518_v7  ;;  %v6057_v7 = vld [vmem:[#allocation13 + $0x4c8] sm:$0xff] }
 0x4e4   :  { %5423 = vmatpush1.bf16.msra.mxu0 %v7563_v63  ;;  %v5238_v63 = vld [vmem:[#allocation13 + $0x930] sm:$0xff] }
 0x4e5   :  { %5700 = vmatpush1.bf16.msra.mxu1 %v7597_v10  ;;  %5424 = vmatprep.subr.bf16.mxu0 %v7562_v11  ;;  %v5239_v10 = vld [vmem:[#allocation13 + $0x990] sm:$0xff]  ;;  %v5515_v11 = vld [vmem:[#allocation13 + $0x938] sm:$0xff] }
 0x4e6   :  { %5701 = vmatprep.subr.bf16.mxu1 %v7596_v12  ;;  %v5516_v12 = vld [vmem:[#allocation13 + $0x998] sm:$0xff]  ;;  %v7578_v15 = vcombine.high %v5238_v63, %v5239_v10  ;;  %v7577_v21 = vcombine.low %v5238_v63, %v5239_v10 }
 0x4e7   :  { %v7612_v16 = vcombine.high %v5515_v11, %v5516_v12  ;;  %v7611_v22 = vcombine.low %v5515_v11, %v5516_v12  ;;  %v8954_v11 = vld [vmem:[#allocation13 + $0x460] sm:$0xff]  ;;  %v8956_v12 = vld [vmem:[#allocation13 + $0x408] sm:$0xff] }
 0x4e8   :  { %5425 = vmatpush1.bf16.msra.mxu0 %v7561_v17  ;;  %v5236_v17 = vld [vmem:[#allocation13 + $0x870] sm:$0xff] }
 0x4e9   :  { %5702 = vmatpush1.bf16.msra.mxu1 %v7595_v18  ;;  %5426 = vmatprep.subr.bf16.mxu0 %v7560_v19  ;;  %v5237_v18 = vld [vmem:[#allocation13 + $0x8d0] sm:$0xff]  ;;  %v5513_v19 = vld [vmem:[#allocation13 + $0x878] sm:$0xff] }
 0x4ea   :  { %5703 = vmatprep.subr.bf16.mxu1 %v7594_v20  ;;  %v5514_v20 = vld [vmem:[#allocation13 + $0x8d8] sm:$0xff]  ;;  %v7576_v23 = vcombine.high %v5236_v17, %v5237_v18  ;;  %v7575_v31 = vcombine.low %v5236_v17, %v5237_v18 }
 0x4eb   :  { %v7610_v25 = vcombine.high %v5513_v19, %v5514_v20  ;;  %v7609_v32 = vcombine.low %v5513_v19, %v5514_v20  ;;  %v8962_v20 = vld [vmem:[#allocation13 + $0x340] sm:$0xff] }
 0x4ec   :  { %5427 = vmatpush1.bf16.msra.mxu0 %v7559_v27  ;;  %v5234_v27 = vld [vmem:[#allocation13 + $0x7b0] sm:$0xff] }
 0x4ed   :  { %5704 = vmatpush1.bf16.msra.mxu1 %v7593_v28  ;;  %5428 = vmatprep.subr.bf16.mxu0 %v7558_v29  ;;  %v5235_v28 = vld [vmem:[#allocation13 + $0x810] sm:$0xff]  ;;  %v5511_v29 = vld [vmem:[#allocation13 + $0x7b8] sm:$0xff] }
 0x4ee   :  { %5705 = vmatprep.subr.bf16.mxu1 %v7592_v30  ;;  %v5512_v30 = vld [vmem:[#allocation13 + $0x818] sm:$0xff]  ;;  %v7574_v33 = vcombine.high %v5234_v27, %v5235_v28  ;;  %v7573_v39 = vcombine.low %v5234_v27, %v5235_v28 }
 0x4ef   :  { %v7608_v34 = vcombine.high %v5511_v29, %v5512_v30  ;;  %v7607_v40 = vcombine.low %v5511_v29, %v5512_v30 }
 0x4f0   :  { %5429 = vmatpush1.bf16.msra.mxu0 %v7557_v35  ;;  %v5232_v35 = vld [vmem:[#allocation13 + $0x6f0] sm:$0xff] }
 0x4f1   :  { %5706 = vmatpush1.bf16.msra.mxu1 %v7591_v36  ;;  %5430 = vmatprep.subr.bf16.mxu0 %v7556_v37  ;;  %v5233_v36 = vld [vmem:[#allocation13 + $0x750] sm:$0xff]  ;;  %v5509_v37 = vld [vmem:[#allocation13 + $0x6f8] sm:$0xff] }
 0x4f2   :  { %5707 = vmatprep.subr.bf16.mxu1 %v7590_v38  ;;  %v5510_v38 = vld [vmem:[#allocation13 + $0x758] sm:$0xff]  ;;  %v7572_v43 = vcombine.high %v5232_v35, %v5233_v36  ;;  %v7571_v49 = vcombine.low %v5232_v35, %v5233_v36  ;;  %v8980_v35 = vld [vmem:[#allocation13 + $0x348] sm:$0xff] }
 0x4f3   :  { %v7606_v44 = vcombine.high %v5509_v37, %v5510_v38  ;;  %v7605_v50 = vcombine.low %v5509_v37, %v5510_v38  ;;  %v8982_v36 = vld [vmem:[#allocation13 + $0x3a8] sm:$0xff]  ;;  %v4095_v38 = vld [vmem:[%s9352_s0 + $0x18] sm:$0xff] }
 0x4f4   :  { %5431 = vmatpush1.bf16.msra.mxu0 %v7555_v45  ;;  %v5230_v45 = vld [vmem:[#allocation13 + $0x630] sm:$0xff]  ;;  %v3818_v37 = vld [vmem:[%s9352_s0 + $0x8] sm:$0xff] }
 0x4f5   :  { %5708 = vmatpush1.bf16.msra.mxu1 %v7589_v46  ;;  %5432 = vmatprep.subr.bf16.mxu0 %v7554_v47  ;;  %v5231_v46 = vld [vmem:[#allocation13 + $0x690] sm:$0xff]  ;;  %v5507_v47 = vld [vmem:[#allocation13 + $0x638] sm:$0xff] }
 0x4f6   :  { %5709 = vmatprep.subr.bf16.mxu1 %v7588_v48  ;;  %v5508_v48 = vld [vmem:[#allocation13 + $0x698] sm:$0xff]  ;;  %v7570_v51 = vcombine.high %v5230_v45, %v5231_v46  ;;  %v7569_v58 = vcombine.low %v5230_v45, %v5231_v46 }
 0x4f7   :  { %v7604_v52 = vcombine.high %v5507_v47, %v5508_v48  ;;  %v7603_v59 = vcombine.low %v5507_v47, %v5508_v48 }
 0x4f8   :  { %5433 = vmatpush1.bf16.msra.mxu0 %v7553_v53  ;;  %v5782_v53 = vld [vmem:[#allocation13 + $0x580] sm:$0xff] }
 0x4f9   :  { %5710 = vmatpush1.bf16.msra.mxu1 %v7587_v54  ;;  %5434 = vmatprep.subr.bf16.mxu0 %v7584_v55  ;;  %v5783_v54 = vld [vmem:[#allocation13 + $0x5e0] sm:$0xff]  ;;  %v6059_v55 = vld [vmem:[#allocation13 + $0x588] sm:$0xff] }
 0x4fa   :  { %5711 = vmatprep.subr.bf16.mxu1 %v7618_v56  ;;  %v6060_v56 = vld [vmem:[#allocation13 + $0x5e8] sm:$0xff]  ;;  %v7636_v61 = vcombine.high %v5782_v53, %v5783_v54  ;;  %v7635_v4 = vcombine.low %v5782_v53, %v5783_v54  ;;  %v7664_v54 = vcombine.high %v8980_v35, %v8982_v36 }
 0x4fc   :  { %5435 = vmatpush2.bf16.msra.mxu0 %v7583_v0  ;;  %v3861_v0 = vld [vmem:[#allocation14 + $0x2] sm:$0x3] }
 0x4fd   :  { %5712 = vmatpush2.bf16.msra.mxu1 %v7617_v1  ;;  %5436 = vmatprep.subr.bf16.mxu0 %v7582_v2  ;;  %v7670_v1 = vcombine.high %v6059_v55, %v6060_v56  ;;  %v5780_v2 = vld [vmem:[#allocation13 + $0x4c0] sm:$0xff]  ;;  %v3866_v6 = vrot.slane %v3861_v0, %v8907_v26  ;;  %v8952_v63 = vrot.slane %v3861_v0, %v8905_v24 }
 0x4fe   :  { %5713 = vmatprep.subr.bf16.mxu1 %v7616_v3  ;;  %v5781_v3 = vld [vmem:[#allocation13 + $0x520] sm:$0xff] }
 0x4ff   :  { %v7634_v10 = vcombine.high %v5780_v2, %v5781_v3  ;;  %v7633_v19 = vcombine.low %v5780_v2, %v5781_v3  ;;  %v3819_v0 = vld [vmem:[%s9352_s0 + $0xc0] sm:$0xff] }
 0x500   :  { %5437 = vmatpush2.bf16.msra.mxu0 %v7581_v8  ;;  %v6058_v8 = vld [vmem:[#allocation13 + $0x528] sm:$0xff] }
 0x501   :  { %5714 = vmatpush2.bf16.msra.mxu1 %v7615_v9  ;;  %5438 = vmatprep.subr.bf16.mxu0 %v7580_v57  ;;  %v7669_v9 = vcombine.low %v6059_v55, %v6060_v56  ;;  %v8946_v57 = vld [vmem:[#allocation13 + $0x400] sm:$0xff]  ;;  %v7667_v28 = vcombine.low %v6057_v7, %v6058_v8 }
 0x502   :  { %5715 = vmatprep.subr.bf16.mxu1 %v7614_v60  ;;  %v8949_v60 = vrot.slane %v3584_v62, %v8905_v24  ;;  %v7632_v29 = vcombine.high %v8946_v57, %v8954_v11  ;;  %v5774_v55 = vld [vmem:[#allocation13 + $0x280] sm:$0xff] }
 0x503   :  { %v5775_v56 = vld [vmem:[#allocation13 + $0x2e0] sm:$0xff] }
 0x504   :  { %5439 = vmatpush2.bf16.msra.mxu0 %v7579_v13  ;;  %v8958_v13 = vld [vmem:[#allocation13 + $0x468] sm:$0xff] }
 0x505   :  { %5716 = vmatpush2.bf16.msra.mxu1 %v7613_v14  ;;  %5440 = vmatprep.subr.bf16.mxu0 %v7578_v15  ;;  %v7666_v30 = vcombine.high %v8956_v12, %v8958_v13 }
 0x506   :  { %5717 = vmatprep.subr.bf16.mxu1 %v7612_v16  ;;  %v7668_v16 = vcombine.high %v6057_v7, %v6058_v8  ;;  %v6052_v7 = vld [vmem:[#allocation13 + $0x2e8] sm:$0xff] }
 0x507   :  { %v3820_v8 = vld [vmem:[%s9352_s0 + $0xc8] sm:$0xff] }
 0x508   :  { %5441 = vmatpush2.bf16.msra.mxu0 %v7577_v21  ;;  %v8964_v21 = vld [vmem:[#allocation13 + $0x3a0] sm:$0xff] }
 0x509   :  { %5718 = vmatpush2.bf16.msra.mxu1 %v7611_v22  ;;  %5442 = vmatprep.subr.bf16.mxu0 %v7576_v23  ;;  %v3817_v22 = vld [vmem:[%s9352_s0] sm:$0xff]  ;;  %v4094_v23 = vld [vmem:[%s9352_s0 + $0x10] sm:$0xff]  ;;  %v7630_v45 = vcombine.high %v8962_v20, %v8964_v21 }
 0x50a   :  { %5719 = vmatprep.subr.bf16.mxu1 %v7610_v25 }
 0x50c   :  { %5443 = vmatpush2.bf16.msra.mxu0 %v7575_v31 }
 0x50d   :  { %5720 = vmatpush2.bf16.msra.mxu1 %v7609_v32  ;;  %5444 = vmatprep.subr.bf16.mxu0 %v7574_v33 }
 0x50e   :  { %5721 = vmatprep.subr.bf16.mxu1 %v7608_v34 }
 0x510   :  { %5445 = vmatpush2.bf16.msra.mxu0 %v7573_v39 }
 0x511   :  { %5722 = vmatpush2.bf16.msra.mxu1 %v7607_v40  ;;  %5446 = vmatprep.subr.bf16.mxu0 %v7572_v43  ;;  %v7631_v43 = vcombine.low %v8946_v57, %v8954_v11  ;;  %v7629_v57 = vcombine.low %v8962_v20, %v8964_v21  ;;  %v6049_v21 = vld [vmem:[#allocation13 + $0x1c8] sm:$0xff] }
 0x512   :  { %5723 = vmatprep.subr.bf16.mxu1 %v7606_v44  ;;  %v7665_v44 = vcombine.low %v8956_v12, %v8958_v13 }
 0x514   :  { %5447 = vmatpush2.bf16.msra.mxu0 %v7571_v49 }
 0x515   :  { %5724 = vmatpush2.bf16.msra.mxu1 %v7605_v50  ;;  %5448 = vmatprep.subr.bf16.mxu0 %v7570_v51 }
 0x516   :  { %5725 = vmatprep.subr.bf16.mxu1 %v7604_v52 }
 0x518   :  { %5449 = vmatpush2.bf16.msra.mxu0 %v7569_v58 }
 0x519   :  { %5726 = vmatpush2.bf16.msra.mxu1 %v7603_v59  ;;  %5972 = vmatprep.subr.bf16.mxu0 %v7636_v61 }
 0x51a   :  { %6249 = vmatprep.subr.bf16.mxu1 %v7670_v1  ;;  %v4096_v1 = vld [vmem:[%s9352_s0 + $0xd0] sm:$0xff] }
 0x51b   :  { %5451 = vmatmul.mubr.bf16.vlgmr.msra.gmra.mxu0 %v8928_v42  ;;  %v3790_v14 = vpop.f32.mrf.mxu0  ;;  %v4067_v15 = vpop.f32.mrf.mxu1 }
 0x51c   :  { %5728 = vmatmul.mubr.bf16.vlgmr.msra.gmra.mxu1 %v8928_v42  ;;  %v3791_v17 = vadd.f32 %v3790_v14, %v3589_v5  ;;  %v4068_v18 = vadd.f32 %v4067_v15, %v3866_v6  ;;  %5973 = vmatpush1.bf16.msra.mxu0 %v7635_v4  ;;  %v5772_v15 = vld [vmem:[#allocation13 + $0x1c0] sm:$0xff] }
 0x51d   :  { %6004 = vmatprep.mubr.bf16.mxu0 %v8926_v41  ;;  %6250 = vmatpush1.bf16.msra.mxu1 %v7669_v9  ;;  %v3792_v25 = vpop.f32.mrf.mxu0  ;;  %v4069_v27 = vpop.f32.mrf.mxu1  ;;  %v4097_v9 = vld [vmem:[%s9352_s0 + $0xd8] sm:$0xff] }
 0x51e   :  { %v3799_v31 = vmax.f32 %v3791_v17, 0.0  ;;  %v4076_v32 = vmax.f32 %v4068_v18, 0.0  ;;  %6281 = vmatprep.mubr.bf16.mxu1 %v8926_v41  ;;  %v3793_v33 = vadd.f32 %v3792_v25, %v8949_v60  ;;  %v4070_v34 = vadd.f32 %v4069_v27, %v8952_v63  ;;  %5974 = vmatprep.subr.bf16.mxu0 %v7634_v10 }
 0x51f   :  { %6251 = vmatprep.subr.bf16.mxu1 %v7668_v16  ;;  %v3794_v39 = vpop.f32.mrf.mxu0  ;;  %v4071_v40 = vpop.f32.mrf.mxu1  ;;  %v5773_v16 = vld [vmem:[#allocation13 + $0x220] sm:$0xff] }
 0x520   :  { %v3821_v46 = vmul.f32 %v3817_v22, %v3799_v31  ;;  %v4098_v47 = vmul.f32 %v4094_v23, %v4076_v32  ;;  %v3800_v48 = vmax.f32 %v3793_v33, 0.0  ;;  %v4077_v49 = vmax.f32 %v4070_v34, 0.0  ;;  %5975 = vmatpush1.bf16.msra.mxu0 %v7633_v19  ;;  %v6050_v22 = vld [vmem:[#allocation13 + $0x228] sm:$0xff] }
 0x521   :  { %v3795_v50 = vadd.f32 %v3794_v39, %v3589_v5  ;;  %v4072_v51 = vadd.f32 %v4071_v40, %v3866_v6  ;;  %6252 = vmatpush1.bf16.msra.mxu1 %v7667_v28  ;;  %v3796_v52 = vpop.f32.mrf.mxu0  ;;  %v4073_v53 = vpop.f32.mrf.mxu1  ;;  %5976 = vmatprep.subr.bf16.mxu0 %v7632_v29  ;;  %v6051_v6 = vld [vmem:[#allocation13 + $0x288] sm:$0xff]  ;;  %v7627_v23 = vcombine.low %v5774_v55, %v5775_v56  ;;  %v5770_v29 = vld [vmem:[#allocation13 + $0x100] sm:$0xff] }
 0x522   :  { %3825 = vst [vmem:[%s9361_s9] sm:$0xff] %v3821_v46  ;;  %4102 = vst [vmem:[%s9361_s9 + $0x10] sm:$0xff] %v4098_v47  ;;  %v7757_v58 = vpack.c.bf16 %v3800_v48, %v3799_v31  ;;  %v3822_v59 = vmul.f32 %v3818_v37, %v3800_v48  ;;  %v7759_v61 = vpack.c.bf16 %v4077_v49, %v4076_v32  ;;  %6253 = vmatprep.subr.bf16.mxu1 %v7666_v30  ;;  %v5771_v30 = vld [vmem:[#allocation13 + $0x160] sm:$0xff]  ;;  %v6047_v31 = vld [vmem:[#allocation13 + $0x108] sm:$0xff] }
 0x523   :  { %v4099_v62 = vmul.f32 %v4095_v38, %v4077_v49  ;;  %v3801_v2 = vmax.f32 %v3795_v50, 0.0  ;;  %v4078_v3 = vmax.f32 %v4072_v51, 0.0  ;;  %v3797_v4 = vadd.f32 %v3796_v52, %v8949_v60  ;;  %v6048_v32 = vld [vmem:[#allocation13 + $0x168] sm:$0xff]  ;;  %v5768_v37 = vld [vmem:[#allocation13 + $0x40] sm:$0xff] }
 0x524   :  { %v4074_v5 = vadd.f32 %v4073_v53, %v8952_v63  ;;  %3815 = vst [vmem:[#allocation16] sm:$0xff] %v7757_v58  ;;  %3826 = vst [vmem:[%s9361_s9 + $0x8] sm:$0xff] %v3822_v59  ;;  %5977 = vmatpush1.bf16.msra.mxu0 %v7631_v43  ;;  %v7663_v60 = vcombine.low %v8980_v35, %v8982_v36  ;;  %v7628_v63 = vcombine.high %v5774_v55, %v5775_v56  ;;  %v5769_v38 = vld [vmem:[#allocation13 + $0xa0] sm:$0xff]  ;;  %v6045_v39 = vld [vmem:[#allocation13 + $0x48] sm:$0xff] }
 0x525   :  { %4092 = vst [vmem:[#allocation16 + $0x8] sm:$0xff] %v7759_v61  ;;  %4103 = vst [vmem:[%s9361_s9 + $0x18] sm:$0xff] %v4099_v62  ;;  %v3823_v10 = vmul.f32 %v3819_v0, %v3801_v2  ;;  %v4100_v11 = vmul.f32 %v4096_v1, %v4078_v3  ;;  %v3802_v12 = vmax.f32 %v3797_v4, 0.0  ;;  %6254 = vmatpush1.bf16.msra.mxu1 %v7665_v44  ;;  %5978 = vmatprep.subr.bf16.mxu0 %v7630_v45  ;;  %v6046_v40 = vld [vmem:[#allocation13 + $0xa8] sm:$0xff]  ;;  %v5798_v47 = vld [vmem:[#allocation13 + $0xb80] sm:$0xff] }
 0x526   :  { %v4079_v13 = vmax.f32 %v4074_v5, 0.0  ;;  %6255 = vmatprep.subr.bf16.mxu1 %v7664_v54  ;;  %v7662_v14 = vcombine.high %v6051_v6, %v6052_v7  ;;  %v7661_v25 = vcombine.low %v6051_v6, %v6052_v7  ;;  %v7626_v27 = vcombine.high %v5772_v15, %v5773_v16  ;;  %v5799_v48 = vld [vmem:[#allocation13 + $0xbe0] sm:$0xff]  ;;  %v6075_v49 = vld [vmem:[#allocation13 + $0xb88] sm:$0xff] }
 0x527   :  { %3827 = vst [vmem:[%s9361_s9 + $0xc0] sm:$0xff] %v3823_v10  ;;  %4104 = vst [vmem:[%s9361_s9 + $0xd0] sm:$0xff] %v4100_v11  ;;  %v7758_v17 = vpack.c.bf16 %v3802_v12, %v3801_v2  ;;  %v3824_v18 = vmul.f32 %v3820_v8, %v3802_v12  ;;  %v7660_v28 = vcombine.high %v6049_v21, %v6050_v22  ;;  %v6076_v50 = vld [vmem:[#allocation13 + $0xbe8] sm:$0xff]  ;;  %v5796_v55 = vld [vmem:[#allocation13 + $0xac0] sm:$0xff] }
 0x528   :  { %v7760_v19 = vpack.c.bf16 %v4079_v13, %v4078_v3  ;;  %v4101_v20 = vmul.f32 %v4097_v9, %v4079_v13  ;;  %5979 = vmatpush1.bf16.msra.mxu0 %v7629_v57  ;;  %v7625_v33 = vcombine.low %v5772_v15, %v5773_v16  ;;  %v7659_v34 = vcombine.low %v6049_v21, %v6050_v22  ;;  %v5797_v56 = vld [vmem:[#allocation13 + $0xb20] sm:$0xff]  ;;  %v6073_v58 = vld [vmem:[#allocation13 + $0xac8] sm:$0xff] }
 0x529   :  { %3816 = vst [vmem:[#allocation16 + $0x60] sm:$0xff] %v7758_v17  ;;  %3828 = vst [vmem:[%s9361_s9 + $0xc8] sm:$0xff] %v3824_v18  ;;  %6256 = vmatpush1.bf16.msra.mxu1 %v7663_v60  ;;  %5980 = vmatprep.subr.bf16.mxu0 %v7628_v63  ;;  %v7624_v35 = vcombine.high %v5770_v29, %v5771_v30  ;;  %v7658_v36 = vcombine.high %v6047_v31, %v6048_v32  ;;  %v6074_v59 = vld [vmem:[#allocation13 + $0xb28] sm:$0xff]  ;;  %v5794_v2 = vld [vmem:[#allocation13 + $0xa00] sm:$0xff] }
 0x52a   :  { %4093 = vst [vmem:[#allocation16 + $0x68] sm:$0xff] %v7760_v19  ;;  %4105 = vst [vmem:[%s9361_s9 + $0xd8] sm:$0xff] %v4101_v20  ;;  %6257 = vmatprep.subr.bf16.mxu1 %v7662_v14  ;;  %v7623_v43 = vcombine.low %v5770_v29, %v5771_v30  ;;  %v7657_v44 = vcombine.low %v6047_v31, %v6048_v32  ;;  %v7622_v45 = vcombine.high %v5768_v37, %v5769_v38  ;;  %v5795_v3 = vld [vmem:[#allocation13 + $0xa60] sm:$0xff]  ;;  %v6071_v4 = vld [vmem:[#allocation13 + $0xa08] sm:$0xff] }
 0x52b   :  { %v7656_v46 = vcombine.high %v6045_v39, %v6046_v40  ;;  %v7621_v51 = vcombine.low %v5768_v37, %v5769_v38  ;;  %v7655_v52 = vcombine.low %v6045_v39, %v6046_v40  ;;  %v7652_v53 = vcombine.high %v5798_v47, %v5799_v48  ;;  %v6072_v5 = vld [vmem:[#allocation13 + $0xa68] sm:$0xff]  ;;  %v5792_v57 = vld [vmem:[#allocation13 + $0x940] sm:$0xff] }
 0x52c   :  { %5981 = vmatpush1.bf16.msra.mxu0 %v7627_v23  ;;  %v7686_v54 = vcombine.high %v6075_v49, %v6076_v50  ;;  %v7651_v61 = vcombine.low %v5798_v47, %v5799_v48  ;;  %v7685_v62 = vcombine.low %v6075_v49, %v6076_v50  ;;  %v7650_v0 = vcombine.high %v5796_v55, %v5797_v56  ;;  %v5793_v60 = vld [vmem:[#allocation13 + $0x9a0] sm:$0xff]  ;;  %v6069_v63 = vld [vmem:[#allocation13 + $0x948] sm:$0xff] }
 0x52d   :  { %6258 = vmatpush1.bf16.msra.mxu1 %v7661_v25  ;;  %5982 = vmatprep.subr.bf16.mxu0 %v7626_v27  ;;  %v7684_v1 = vcombine.high %v6073_v58, %v6074_v59  ;;  %v7649_v6 = vcombine.low %v5796_v55, %v5797_v56  ;;  %v7683_v7 = vcombine.low %v6073_v58, %v6074_v59  ;;  %v6070_v10 = vld [vmem:[#allocation13 + $0x9a8] sm:$0xff]  ;;  %v5790_v15 = vld [vmem:[#allocation13 + $0x880] sm:$0xff] }
 0x52e   :  { %6259 = vmatprep.subr.bf16.mxu1 %v7660_v28  ;;  %v7648_v8 = vcombine.high %v5794_v2, %v5795_v3  ;;  %v7682_v9 = vcombine.high %v6071_v4, %v6072_v5  ;;  %v7647_v11 = vcombine.low %v5794_v2, %v5795_v3  ;;  %v7681_v12 = vcombine.low %v6071_v4, %v6072_v5  ;;  %v5791_v16 = vld [vmem:[#allocation13 + $0x8e0] sm:$0xff]  ;;  %v6067_v17 = vld [vmem:[#allocation13 + $0x888] sm:$0xff]  ;;  %v6611_v5 = vld [vmem:[#allocation13 + $0x4d8] sm:$0xff] }
 0x52f   :  { %v7646_v13 = vcombine.high %v5792_v57, %v5793_v60  ;;  %v7680_v14 = vcombine.high %v6069_v63, %v6070_v10  ;;  %v6068_v18 = vld [vmem:[#allocation13 + $0x8e8] sm:$0xff]  ;;  %v7645_v19 = vcombine.low %v5792_v57, %v5793_v60  ;;  %v7679_v20 = vcombine.low %v6069_v63, %v6070_v10  ;;  %v5788_v23 = vld [vmem:[#allocation13 + $0x7c0] sm:$0xff]  ;;  %v9050_v63 = vld [vmem:[#allocation13 + $0x470] sm:$0xff] }
 0x530   :  { %5983 = vmatpush1.bf16.msra.mxu0 %v7625_v33  ;;  %v7644_v21 = vcombine.high %v5790_v15, %v5791_v16  ;;  %v7678_v22 = vcombine.high %v6067_v17, %v6068_v18  ;;  %v5789_v25 = vld [vmem:[#allocation13 + $0x820] sm:$0xff]  ;;  %v6065_v27 = vld [vmem:[#allocation13 + $0x7c8] sm:$0xff]  ;;  %v7643_v29 = vcombine.low %v5790_v15, %v5791_v16  ;;  %v7677_v30 = vcombine.low %v6067_v17, %v6068_v18  ;;  %v9052_v10 = vld [vmem:[#allocation13 + $0x418] sm:$0xff] }
 0x531   :  { %6260 = vmatpush1.bf16.msra.mxu1 %v7659_v34  ;;  %5984 = vmatprep.subr.bf16.mxu0 %v7624_v35  ;;  %v6066_v28 = vld [vmem:[#allocation13 + $0x828] sm:$0xff]  ;;  %v7642_v31 = vcombine.high %v5788_v23, %v5789_v25  ;;  %v5786_v33 = vld [vmem:[#allocation13 + $0x700] sm:$0xff]  ;;  %v7641_v37 = vcombine.low %v5788_v23, %v5789_v25  ;;  %v9058_v18 = vld [vmem:[#allocation13 + $0x350] sm:$0xff] }
 0x532   :  { %6261 = vmatprep.subr.bf16.mxu1 %v7658_v36  ;;  %v7676_v32 = vcombine.high %v6065_v27, %v6066_v28  ;;  %v5787_v34 = vld [vmem:[#allocation13 + $0x760] sm:$0xff]  ;;  %v6063_v35 = vld [vmem:[#allocation13 + $0x708] sm:$0xff]  ;;  %v7675_v38 = vcombine.low %v6065_v27, %v6066_v28 }
 0x533   :  { %v6064_v36 = vld [vmem:[#allocation13 + $0x768] sm:$0xff]  ;;  %v7640_v39 = vcombine.high %v5786_v33, %v5787_v34  ;;  %v7639_v47 = vcombine.low %v5786_v33, %v5787_v34  ;;  %v4138_v58 = vld [vmem:[#allocation14 + $0x4] sm:$0x3]  ;;  %v4415_v59 = vld [vmem:[#allocation14 + $0x6] sm:$0x3] }
 0x534   :  { %5985 = vmatpush1.bf16.msra.mxu0 %v7623_v43  ;;  %v7674_v40 = vcombine.high %v6063_v35, %v6064_v36  ;;  %v5784_v43 = vld [vmem:[#allocation13 + $0x640] sm:$0xff]  ;;  %v7673_v48 = vcombine.low %v6063_v35, %v6064_v36  ;;  %v4143_v2 = vrot.slane %v4138_v58, %v8907_v26  ;;  %v4420_v3 = vrot.slane %v4415_v59, %v8907_v26  ;;  %v9076_v33 = vld [vmem:[#allocation13 + $0x358] sm:$0xff] }
 0x535   :  { %6262 = vmatpush1.bf16.msra.mxu1 %v7657_v44  ;;  %5986 = vmatprep.subr.bf16.mxu0 %v7622_v45  ;;  %v5785_v44 = vld [vmem:[#allocation13 + $0x6a0] sm:$0xff]  ;;  %v6061_v45 = vld [vmem:[#allocation13 + $0x648] sm:$0xff]  ;;  %v9048_v57 = vrot.slane %v4415_v59, %v8905_v24  ;;  %v9078_v34 = vld [vmem:[#allocation13 + $0x3b8] sm:$0xff] }
 0x536   :  { %6263 = vmatprep.subr.bf16.mxu1 %v7656_v46  ;;  %v6062_v46 = vld [vmem:[#allocation13 + $0x6a8] sm:$0xff]  ;;  %v7638_v49 = vcombine.high %v5784_v43, %v5785_v44  ;;  %v7637_v55 = vcombine.low %v5784_v43, %v5785_v44  ;;  %v4649_v36 = vld [vmem:[%s9352_s0 + $0x38] sm:$0xff]  ;;  %v4373_v59 = vld [vmem:[%s9352_s0 + $0xe0] sm:$0xff] }
 0x537   :  { %v7672_v50 = vcombine.high %v6061_v45, %v6062_v46  ;;  %v7671_v56 = vcombine.low %v6061_v45, %v6062_v46  ;;  %v4372_v35 = vld [vmem:[%s9352_s0 + $0x28] sm:$0xff] }
 0x538   :  { %5987 = vmatpush1.bf16.msra.mxu0 %v7621_v51  ;;  %v6336_v51 = vld [vmem:[#allocation13 + $0x590] sm:$0xff] }
 0x539   :  { %6264 = vmatpush1.bf16.msra.mxu1 %v7655_v52  ;;  %5988 = vmatprep.subr.bf16.mxu0 %v7652_v53  ;;  %v6337_v52 = vld [vmem:[#allocation13 + $0x5f0] sm:$0xff]  ;;  %v6613_v53 = vld [vmem:[#allocation13 + $0x598] sm:$0xff] }
 0x53a   :  { %6265 = vmatprep.subr.bf16.mxu1 %v7686_v54  ;;  %v6614_v54 = vld [vmem:[#allocation13 + $0x5f8] sm:$0xff]  ;;  %v7703_v4 = vcombine.low %v6336_v51, %v6337_v52 }
 0x53c   :  { %5989 = vmatpush2.bf16.msra.mxu0 %v7651_v61  ;;  %v7704_v61 = vcombine.high %v6336_v51, %v6337_v52  ;;  %v7732_v51 = vcombine.high %v9076_v33, %v9078_v34  ;;  %v6328_v52 = vld [vmem:[#allocation13 + $0x290] sm:$0xff] }
 0x53d   :  { %6266 = vmatpush2.bf16.msra.mxu1 %v7685_v62  ;;  %5990 = vmatprep.subr.bf16.mxu0 %v7650_v0  ;;  %v7738_v62 = vcombine.high %v6613_v53, %v6614_v54  ;;  %v6334_v0 = vld [vmem:[#allocation13 + $0x4d0] sm:$0xff] }
 0x53e   :  { %6267 = vmatprep.subr.bf16.mxu1 %v7684_v1  ;;  %v6335_v1 = vld [vmem:[#allocation13 + $0x530] sm:$0xff] }
 0x53f   :  { %v7702_v60 = vcombine.high %v6334_v0, %v6335_v1  ;;  %v7701_v17 = vcombine.low %v6334_v0, %v6335_v1 }
 0x540   :  { %5991 = vmatpush2.bf16.msra.mxu0 %v7649_v6  ;;  %v6612_v6 = vld [vmem:[#allocation13 + $0x538] sm:$0xff] }
 0x541   :  { %6268 = vmatpush2.bf16.msra.mxu1 %v7683_v7  ;;  %5992 = vmatprep.subr.bf16.mxu0 %v7648_v8  ;;  %v7737_v7 = vcombine.low %v6613_v53, %v6614_v54  ;;  %v9042_v8 = vld [vmem:[#allocation13 + $0x410] sm:$0xff]  ;;  %v7735_v25 = vcombine.low %v6611_v5, %v6612_v6 }
 0x542   :  { %6269 = vmatprep.subr.bf16.mxu1 %v7682_v9  ;;  %v9045_v9 = vrot.slane %v4138_v58, %v8905_v24  ;;  %v7700_v27 = vcombine.high %v9042_v8, %v9050_v63  ;;  %v6329_v53 = vld [vmem:[#allocation13 + $0x2f0] sm:$0xff] }
 0x544   :  { %5993 = vmatpush2.bf16.msra.mxu0 %v7647_v11  ;;  %v9054_v11 = vld [vmem:[#allocation13 + $0x478] sm:$0xff] }
 0x545   :  { %6270 = vmatpush2.bf16.msra.mxu1 %v7681_v12  ;;  %5994 = vmatprep.subr.bf16.mxu0 %v7646_v13  ;;  %v7734_v28 = vcombine.high %v9052_v10, %v9054_v11 }
 0x546   :  { %6271 = vmatprep.subr.bf16.mxu1 %v7680_v14  ;;  %v7736_v14 = vcombine.high %v6611_v5, %v6612_v6  ;;  %v4374_v5 = vld [vmem:[%s9352_s0 + $0xe8] sm:$0xff]  ;;  %v4651_v6 = vld [vmem:[%s9352_s0 + $0xf8] sm:$0xff] }
 0x548   :  { %5995 = vmatpush2.bf16.msra.mxu0 %v7645_v19  ;;  %v9060_v19 = vld [vmem:[#allocation13 + $0x3b0] sm:$0xff] }
 0x549   :  { %6272 = vmatpush2.bf16.msra.mxu1 %v7679_v20  ;;  %5996 = vmatprep.subr.bf16.mxu0 %v7644_v21  ;;  %v4371_v20 = vld [vmem:[%s9352_s0 + $0x20] sm:$0xff]  ;;  %v4648_v21 = vld [vmem:[%s9352_s0 + $0x30] sm:$0xff] }
 0x54a   :  { %6273 = vmatprep.subr.bf16.mxu1 %v7678_v22 }
 0x54c   :  { %5997 = vmatpush2.bf16.msra.mxu0 %v7643_v29 }
 0x54d   :  { %6274 = vmatpush2.bf16.msra.mxu1 %v7677_v30  ;;  %5998 = vmatprep.subr.bf16.mxu0 %v7642_v31 }
 0x54e   :  { %6275 = vmatprep.subr.bf16.mxu1 %v7676_v32 }
 0x550   :  { %5999 = vmatpush2.bf16.msra.mxu0 %v7641_v37 }
 0x551   :  { %6276 = vmatpush2.bf16.msra.mxu1 %v7675_v38  ;;  %6000 = vmatprep.subr.bf16.mxu0 %v7640_v39  ;;  %v7733_v39 = vcombine.low %v9052_v10, %v9054_v11 }
 0x552   :  { %6277 = vmatprep.subr.bf16.mxu1 %v7674_v40  ;;  %v7698_v40 = vcombine.high %v9058_v18, %v9060_v19 }
 0x554   :  { %6001 = vmatpush2.bf16.msra.mxu0 %v7639_v47 }
 0x555   :  { %6278 = vmatpush2.bf16.msra.mxu1 %v7673_v48  ;;  %6002 = vmatprep.subr.bf16.mxu0 %v7638_v49 }
 0x556   :  { %6279 = vmatprep.subr.bf16.mxu1 %v7672_v50 }
 0x558   :  { %6003 = vmatpush2.bf16.msra.mxu0 %v7637_v55 }
 0x559   :  { %6280 = vmatpush2.bf16.msra.mxu1 %v7671_v56  ;;  %6526 = vmatprep.subr.bf16.mxu0 %v7704_v61  ;;  %v4650_v61 = vld [vmem:[%s9352_s0 + $0xf0] sm:$0xff] }
 0x55a   :  { %6803 = vmatprep.subr.bf16.mxu1 %v7738_v62 }
 0x55b   :  { %v4344_v12 = vpop.f32.mrf.mxu0  ;;  %v4621_v13 = vpop.f32.mrf.mxu1  ;;  %6005 = vmatmul.mubr.bf16.vlgmr.msra.gmra.mxu0 %v8928_v42 }
 0x55c   :  { %v4345_v15 = vadd.f32 %v4344_v12, %v4143_v2  ;;  %v4622_v16 = vadd.f32 %v4621_v13, %v4420_v3  ;;  %6282 = vmatmul.mubr.bf16.vlgmr.msra.gmra.mxu1 %v8928_v42  ;;  %6527 = vmatpush1.bf16.msra.mxu0 %v7703_v4  ;;  %v6606_v4 = vld [vmem:[#allocation13 + $0x2f8] sm:$0xff]  ;;  %v6326_v12 = vld [vmem:[#allocation13 + $0x1d0] sm:$0xff] }
 0x55d   :  { %6558 = vmatprep.mubr.bf16.mxu0 %v8926_v41  ;;  %6804 = vmatpush1.bf16.msra.mxu1 %v7737_v7  ;;  %v4346_v22 = vpop.f32.mrf.mxu0  ;;  %v4623_v23 = vpop.f32.mrf.mxu1  ;;  %v7697_v7 = vcombine.low %v9058_v18, %v9060_v19  ;;  %v6327_v13 = vld [vmem:[#allocation13 + $0x230] sm:$0xff]  ;;  %v6603_v18 = vld [vmem:[#allocation13 + $0x1d8] sm:$0xff] }
 0x55e   :  { %v4353_v29 = vmax.f32 %v4345_v15, 0.0  ;;  %v4630_v30 = vmax.f32 %v4622_v16, 0.0  ;;  %6835 = vmatprep.mubr.bf16.mxu1 %v8926_v41  ;;  %v4347_v31 = vadd.f32 %v4346_v22, %v9045_v9  ;;  %v4624_v32 = vadd.f32 %v4623_v23, %v9048_v57  ;;  %6528 = vmatprep.subr.bf16.mxu0 %v7702_v60  ;;  %v6604_v19 = vld [vmem:[#allocation13 + $0x238] sm:$0xff] }
 0x55f   :  { %v4348_v37 = vpop.f32.mrf.mxu0  ;;  %v4625_v38 = vpop.f32.mrf.mxu1  ;;  %6805 = vmatprep.subr.bf16.mxu1 %v7736_v14  ;;  %v7699_v41 = vcombine.low %v9042_v8, %v9050_v63  ;;  %v7731_v8 = vcombine.low %v9076_v33, %v9078_v34  ;;  %v7694_v22 = vcombine.high %v6326_v12, %v6327_v13  ;;  %v7728_v23 = vcombine.high %v6603_v18, %v6604_v19  ;;  %v6322_v34 = vld [vmem:[#allocation13 + $0x50] sm:$0xff] }
 0x560   :  { %v4375_v43 = vmul.f32 %v4371_v20, %v4353_v29  ;;  %v4652_v44 = vmul.f32 %v4648_v21, %v4630_v30  ;;  %v4354_v45 = vmax.f32 %v4347_v31, 0.0  ;;  %v4631_v46 = vmax.f32 %v4624_v32, 0.0  ;;  %6529 = vmatpush1.bf16.msra.mxu0 %v7701_v17 }
 0x561   :  { %v4349_v47 = vadd.f32 %v4348_v37, %v4143_v2  ;;  %v4626_v48 = vadd.f32 %v4625_v38, %v4420_v3  ;;  %6806 = vmatpush1.bf16.msra.mxu1 %v7735_v25  ;;  %v4350_v49 = vpop.f32.mrf.mxu0  ;;  %v4627_v50 = vpop.f32.mrf.mxu1  ;;  %6530 = vmatprep.subr.bf16.mxu0 %v7700_v27  ;;  %v6605_v3 = vld [vmem:[#allocation13 + $0x298] sm:$0xff]  ;;  %v7695_v20 = vcombine.low %v6328_v52, %v6329_v53  ;;  %v6324_v25 = vld [vmem:[#allocation13 + $0x110] sm:$0xff] }
 0x562   :  { %4379 = vst [vmem:[%s9361_s9 + $0x20] sm:$0xff] %v4375_v43  ;;  %4656 = vst [vmem:[%s9361_s9 + $0x30] sm:$0xff] %v4652_v44  ;;  %v7761_v54 = vpack.c.bf16 %v4354_v45, %v4353_v29  ;;  %v4376_v55 = vmul.f32 %v4372_v35, %v4354_v45  ;;  %v7763_v56 = vpack.c.bf16 %v4631_v46, %v4630_v30  ;;  %6807 = vmatprep.subr.bf16.mxu1 %v7734_v28  ;;  %v6325_v27 = vld [vmem:[#allocation13 + $0x170] sm:$0xff]  ;;  %v6601_v28 = vld [vmem:[#allocation13 + $0x118] sm:$0xff] }
 0x563   :  { %v4653_v58 = vmul.f32 %v4649_v36, %v4631_v46  ;;  %v4355_v62 = vmax.f32 %v4349_v47, 0.0  ;;  %v4632_v0 = vmax.f32 %v4626_v48, 0.0  ;;  %v4351_v1 = vadd.f32 %v4350_v49, %v9045_v9  ;;  %v6602_v29 = vld [vmem:[#allocation13 + $0x178] sm:$0xff]  ;;  %v6323_v35 = vld [vmem:[#allocation13 + $0xb0] sm:$0xff] }
 0x564   :  { %v4628_v2 = vadd.f32 %v4627_v50, %v9048_v57  ;;  %4369 = vst [vmem:[#allocation16 + $0x10] sm:$0xff] %v7761_v54  ;;  %4380 = vst [vmem:[%s9361_s9 + $0x28] sm:$0xff] %v4376_v55  ;;  %6531 = vmatpush1.bf16.msra.mxu0 %v7699_v41  ;;  %v7696_v9 = vcombine.high %v6328_v52, %v6329_v53  ;;  %v7730_v11 = vcombine.high %v6605_v3, %v6606_v4  ;;  %v6599_v36 = vld [vmem:[#allocation13 + $0x58] sm:$0xff]  ;;  %v6352_v43 = vld [vmem:[#allocation13 + $0xb90] sm:$0xff] }
 0x565   :  { %4646 = vst [vmem:[#allocation16 + $0x18] sm:$0xff] %v7763_v56  ;;  %4657 = vst [vmem:[%s9361_s9 + $0x38] sm:$0xff] %v4653_v58  ;;  %v4377_v57 = vmul.f32 %v4373_v59, %v4355_v62  ;;  %v4654_v60 = vmul.f32 %v4650_v61, %v4632_v0  ;;  %v4356_v63 = vmax.f32 %v4351_v1, 0.0  ;;  %6808 = vmatpush1.bf16.msra.mxu1 %v7733_v39  ;;  %6532 = vmatprep.subr.bf16.mxu0 %v7698_v40  ;;  %v6600_v37 = vld [vmem:[#allocation13 + $0xb8] sm:$0xff]  ;;  %v6353_v44 = vld [vmem:[#allocation13 + $0xbf0] sm:$0xff] }
 0x566   :  { %v4633_v10 = vmax.f32 %v4628_v2, 0.0  ;;  %6809 = vmatprep.subr.bf16.mxu1 %v7732_v51  ;;  %v7729_v21 = vcombine.low %v6605_v3, %v6606_v4  ;;  %v7693_v30 = vcombine.low %v6326_v12, %v6327_v13  ;;  %v7727_v31 = vcombine.low %v6603_v18, %v6604_v19  ;;  %v6629_v45 = vld [vmem:[#allocation13 + $0xb98] sm:$0xff]  ;;  %v6350_v51 = vld [vmem:[#allocation13 + $0xad0] sm:$0xff] }
 0x567   :  { %4381 = vst [vmem:[%s9361_s9 + $0xe0] sm:$0xff] %v4377_v57  ;;  %4658 = vst [vmem:[%s9361_s9 + $0xf0] sm:$0xff] %v4654_v60  ;;  %v7762_v14 = vpack.c.bf16 %v4356_v63, %v4355_v62  ;;  %v4378_v15 = vmul.f32 %v4374_v5, %v4356_v63  ;;  %v7692_v32 = vcombine.high %v6324_v25, %v6325_v27  ;;  %v6630_v46 = vld [vmem:[#allocation13 + $0xbf8] sm:$0xff]  ;;  %v6351_v52 = vld [vmem:[#allocation13 + $0xb30] sm:$0xff] }
 0x568   :  { %v7764_v16 = vpack.c.bf16 %v4633_v10, %v4632_v0  ;;  %v4655_v17 = vmul.f32 %v4651_v6, %v4633_v10  ;;  %6533 = vmatpush1.bf16.msra.mxu0 %v7697_v7  ;;  %v7726_v33 = vcombine.high %v6601_v28, %v6602_v29  ;;  %v7691_v38 = vcombine.low %v6324_v25, %v6325_v27  ;;  %v6627_v53 = vld [vmem:[#allocation13 + $0xad8] sm:$0xff]  ;;  %v6348_v61 = vld [vmem:[#allocation13 + $0xa10] sm:$0xff] }
 0x569   :  { %4370 = vst [vmem:[#allocation16 + $0x70] sm:$0xff] %v7762_v14  ;;  %4382 = vst [vmem:[%s9361_s9 + $0xe8] sm:$0xff] %v4378_v15  ;;  %6810 = vmatpush1.bf16.msra.mxu1 %v7731_v8  ;;  %6534 = vmatprep.subr.bf16.mxu0 %v7696_v9  ;;  %v7725_v41 = vcombine.low %v6601_v28, %v6602_v29  ;;  %v7690_v39 = vcombine.high %v6322_v34, %v6323_v35  ;;  %v6628_v54 = vld [vmem:[#allocation13 + $0xb38] sm:$0xff]  ;;  %v6349_v62 = vld [vmem:[#allocation13 + $0xa70] sm:$0xff] }
 0x56a   :  { %4647 = vst [vmem:[#allocation16 + $0x78] sm:$0xff] %v7764_v16  ;;  %4659 = vst [vmem:[%s9361_s9 + $0xf8] sm:$0xff] %v4655_v17  ;;  %6811 = vmatprep.subr.bf16.mxu1 %v7730_v11  ;;  %v7724_v40 = vcombine.high %v6599_v36, %v6600_v37  ;;  %v7689_v47 = vcombine.low %v6322_v34, %v6323_v35  ;;  %v7723_v48 = vcombine.low %v6599_v36, %v6600_v37  ;;  %v6625_v0 = vld [vmem:[#allocation13 + $0xa18] sm:$0xff]  ;;  %v6346_v6 = vld [vmem:[#allocation13 + $0x950] sm:$0xff] }
 0x56b   :  { %v7720_v49 = vcombine.high %v6352_v43, %v6353_v44  ;;  %v7754_v50 = vcombine.high %v6629_v45, %v6630_v46  ;;  %v7719_v55 = vcombine.low %v6352_v43, %v6353_v44  ;;  %v7753_v56 = vcombine.low %v6629_v45, %v6630_v46  ;;  %v6626_v1 = vld [vmem:[#allocation13 + $0xa78] sm:$0xff]  ;;  %v6347_v7 = vld [vmem:[#allocation13 + $0x9b0] sm:$0xff] }
 0x56c   :  { %6535 = vmatpush1.bf16.msra.mxu0 %v7695_v20  ;;  %v7718_v58 = vcombine.high %v6350_v51, %v6351_v52  ;;  %v7752_v59 = vcombine.high %v6627_v53, %v6628_v54  ;;  %v7717_v2 = vcombine.low %v6350_v51, %v6351_v52  ;;  %v7751_v3 = vcombine.low %v6627_v53, %v6628_v54  ;;  %v6623_v8 = vld [vmem:[#allocation13 + $0x958] sm:$0xff]  ;;  %v6344_v11 = vld [vmem:[#allocation13 + $0x890] sm:$0xff] }
 0x56d   :  { %6812 = vmatpush1.bf16.msra.mxu1 %v7729_v21  ;;  %6536 = vmatprep.subr.bf16.mxu0 %v7694_v22  ;;  %v7716_v4 = vcombine.high %v6348_v61, %v6349_v62  ;;  %v7750_v5 = vcombine.high %v6625_v0, %v6626_v1  ;;  %v6624_v9 = vld [vmem:[#allocation13 + $0x9b8] sm:$0xff]  ;;  %v7715_v57 = vcombine.low %v6348_v61, %v6349_v62  ;;  %v6345_v12 = vld [vmem:[#allocation13 + $0x8f0] sm:$0xff] }
 0x56e   :  { %6813 = vmatprep.subr.bf16.mxu1 %v7728_v23  ;;  %v7749_v60 = vcombine.low %v6625_v0, %v6626_v1  ;;  %v7714_v63 = vcombine.high %v6346_v6, %v6347_v7  ;;  %v7748_v10 = vcombine.high %v6623_v8, %v6624_v9  ;;  %v6621_v13 = vld [vmem:[#allocation13 + $0x898] sm:$0xff]  ;;  %v7713_v15 = vcombine.low %v6346_v6, %v6347_v7  ;;  %v6342_v19 = vld [vmem:[#allocation13 + $0x7d0] sm:$0xff] }
 0x56f   :  { %v6622_v14 = vld [vmem:[#allocation13 + $0x8f8] sm:$0xff]  ;;  %v7747_v16 = vcombine.low %v6623_v8, %v6624_v9  ;;  %v7712_v17 = vcombine.high %v6344_v11, %v6345_v12  ;;  %v6343_v20 = vld [vmem:[#allocation13 + $0x830] sm:$0xff]  ;;  %v7711_v23 = vcombine.low %v6344_v11, %v6345_v12 }
 0x570   :  { %6537 = vmatpush1.bf16.msra.mxu0 %v7693_v30  ;;  %v7746_v18 = vcombine.high %v6621_v13, %v6622_v14  ;;  %v6619_v21 = vld [vmem:[#allocation13 + $0x7d8] sm:$0xff]  ;;  %v7745_v25 = vcombine.low %v6621_v13, %v6622_v14  ;;  %v7710_v27 = vcombine.high %v6342_v19, %v6343_v20  ;;  %v6340_v29 = vld [vmem:[#allocation13 + $0x710] sm:$0xff] }
 0x571   :  { %6814 = vmatpush1.bf16.msra.mxu1 %v7727_v31  ;;  %6538 = vmatprep.subr.bf16.mxu0 %v7692_v32  ;;  %v6620_v22 = vld [vmem:[#allocation13 + $0x838] sm:$0xff]  ;;  %v6341_v30 = vld [vmem:[#allocation13 + $0x770] sm:$0xff] }
 0x572   :  { %6815 = vmatprep.subr.bf16.mxu1 %v7726_v33  ;;  %v7744_v28 = vcombine.high %v6619_v21, %v6620_v22  ;;  %v6617_v31 = vld [vmem:[#allocation13 + $0x718] sm:$0xff]  ;;  %v7709_v33 = vcombine.low %v6342_v19, %v6343_v20  ;;  %v7743_v34 = vcombine.low %v6619_v21, %v6620_v22  ;;  %v7708_v35 = vcombine.high %v6340_v29, %v6341_v30  ;;  %v6338_v37 = vld [vmem:[#allocation13 + $0x650] sm:$0xff]  ;;  %v4928_v22 = vld [vmem:[%s9352_s0 + $0x108] sm:$0xff] }
 0x573   :  { %v6618_v32 = vld [vmem:[#allocation13 + $0x778] sm:$0xff]  ;;  %v5202_v0 = vld [vmem:[%s9352_s0 + $0x50] sm:$0xff] }
 0x574   :  { %6539 = vmatpush1.bf16.msra.mxu0 %v7691_v38  ;;  %v7742_v36 = vcombine.high %v6617_v31, %v6618_v32  ;;  %v6339_v38 = vld [vmem:[#allocation13 + $0x6b0] sm:$0xff]  ;;  %v7741_v43 = vcombine.low %v6617_v31, %v6618_v32 }
 0x575   :  { %6816 = vmatpush1.bf16.msra.mxu1 %v7725_v41  ;;  %6540 = vmatprep.subr.bf16.mxu0 %v7690_v39  ;;  %v6615_v41 = vld [vmem:[#allocation13 + $0x658] sm:$0xff]  ;;  %v7706_v44 = vcombine.high %v6338_v37, %v6339_v38  ;;  %v7705_v46 = vcombine.low %v6338_v37, %v6339_v38 }
 0x576   :  { %6817 = vmatprep.subr.bf16.mxu1 %v7724_v40  ;;  %v6616_v39 = vld [vmem:[#allocation13 + $0x6b8] sm:$0xff]  ;;  %v7707_v40 = vcombine.low %v6340_v29, %v6341_v30 }
 0x577   :  { %v7740_v45 = vcombine.high %v6615_v41, %v6616_v39  ;;  %v5203_v8 = vld [vmem:[%s9352_s0 + $0x58] sm:$0xff] }
 0x578   :  { %6541 = vmatpush1.bf16.msra.mxu0 %v7689_v47  ;;  %v7739_v47 = vcombine.low %v6615_v41, %v6616_v39 }
 0x579   :  { %6818 = vmatpush1.bf16.msra.mxu1 %v7723_v48  ;;  %6542 = vmatprep.subr.bf16.mxu0 %v7720_v49  ;;  %v4692_v48 = vld [vmem:[#allocation14 + $0x8] sm:$0x3]  ;;  %v4969_v49 = vld [vmem:[#allocation14 + $0xa] sm:$0x3] }
 0x57a   :  { %6819 = vmatprep.subr.bf16.mxu1 %v7754_v50  ;;  %v4697_v50 = vrot.slane %v4692_v48, %v8907_v26  ;;  %v4974_v51 = vrot.slane %v4969_v49, %v8907_v26  ;;  %v4701_v52 = vrot.slane %v4692_v48, %v8905_v24  ;;  %v4978_v54 = vrot.slane %v4969_v49, %v8905_v24  ;;  %v5756_v49 = vld [vmem:[%s9352_s0 + $0x70] sm:$0xff] }
 0x57c   :  { %6543 = vmatpush2.bf16.msra.mxu0 %v7719_v55 }
 0x57d   :  { %6820 = vmatpush2.bf16.msra.mxu1 %v7753_v56  ;;  %6544 = vmatprep.subr.bf16.mxu0 %v7718_v58  ;;  %v4925_v58 = vld [vmem:[%s9352_s0 + $0x40] sm:$0xff] }
 0x57e   :  { %6821 = vmatprep.subr.bf16.mxu1 %v7752_v59 }
 0x580   :  { %6545 = vmatpush2.bf16.msra.mxu0 %v7717_v2 }
 0x581   :  { %6822 = vmatpush2.bf16.msra.mxu1 %v7751_v3  ;;  %6546 = vmatprep.subr.bf16.mxu0 %v7716_v4  ;;  %v4926_v4 = vld [vmem:[%s9352_s0 + $0x48] sm:$0xff] }
 0x582   :  { %6823 = vmatprep.subr.bf16.mxu1 %v7750_v5 }
 0x584   :  { %6547 = vmatpush2.bf16.msra.mxu0 %v7715_v57 }
 0x585   :  { %6824 = vmatpush2.bf16.msra.mxu1 %v7749_v60  ;;  %6548 = vmatprep.subr.bf16.mxu0 %v7714_v63 }
 0x586   :  { %6825 = vmatprep.subr.bf16.mxu1 %v7748_v10  ;;  %v4927_v10 = vld [vmem:[%s9352_s0 + $0x100] sm:$0xff] }
 0x588   :  { %6549 = vmatpush2.bf16.msra.mxu0 %v7713_v15 }
 0x589   :  { %6826 = vmatpush2.bf16.msra.mxu1 %v7747_v16  ;;  %6550 = vmatprep.subr.bf16.mxu0 %v7712_v17  ;;  %v5204_v16 = vld [vmem:[%s9352_s0 + $0x110] sm:$0xff] }
 0x58a   :  { %6827 = vmatprep.subr.bf16.mxu1 %v7746_v18 }
 0x58c   :  { %6551 = vmatpush2.bf16.msra.mxu0 %v7711_v23 }
 0x58d   :  { %6828 = vmatpush2.bf16.msra.mxu1 %v7745_v25  ;;  %6552 = vmatprep.subr.bf16.mxu0 %v7710_v27 }
 0x58e   :  { %6829 = vmatprep.subr.bf16.mxu1 %v7744_v28  ;;  %v5205_v28 = vld [vmem:[%s9352_s0 + $0x118] sm:$0xff] }
 0x590   :  { %6553 = vmatpush2.bf16.msra.mxu0 %v7709_v33 }
 0x591   :  { %6830 = vmatpush2.bf16.msra.mxu1 %v7743_v34  ;;  %6554 = vmatprep.subr.bf16.mxu0 %v7708_v35  ;;  %v5246_v35 = vld [vmem:[#allocation14 + $0xc] sm:$0x3] }
 0x592   :  { %6831 = vmatprep.subr.bf16.mxu1 %v7742_v36  ;;  %v5523_v36 = vld [vmem:[#allocation14 + $0xe] sm:$0x3]  ;;  %v5251_v37 = vrot.slane %v5246_v35, %v8907_v26  ;;  %v5255_v41 = vrot.slane %v5246_v35, %v8905_v24 }
 0x593   :  { %v5528_v38 = vrot.slane %v5523_v36, %v8907_v26 }
 0x594   :  { %6555 = vmatpush2.bf16.msra.mxu0 %v7707_v40  ;;  %v5532_v40 = vrot.slane %v5523_v36, %v8905_v24  ;;  %v6310_v36 = vld [vmem:[%s9352_s0 + $0x90] sm:$0xff] }
 0x595   :  { %6832 = vmatpush2.bf16.msra.mxu1 %v7741_v43  ;;  %6556 = vmatprep.subr.bf16.mxu0 %v7706_v44 }
 0x596   :  { %6833 = vmatprep.subr.bf16.mxu1 %v7740_v45  ;;  %v5479_v45 = vld [vmem:[%s9352_s0 + $0x60] sm:$0xff] }
 0x598   :  { %6557 = vmatpush2.bf16.msra.mxu0 %v7705_v46 }
 0x599   :  { %6834 = vmatpush2.bf16.msra.mxu1 %v7739_v47 }
 0x59b   :  { %v4898_v53 = vpop.f32.mrf.mxu0  ;;  %6559 = vmatmul.mubr.bf16.vlgmr.msra.gmra.mxu0 %v8928_v42 }
 0x59c   :  { %v4899_v55 = vadd.f32 %v4898_v53, %v4697_v50  ;;  %v5175_v56 = vpop.f32.mrf.mxu1  ;;  %6836 = vmatmul.mubr.bf16.vlgmr.msra.gmra.mxu1 %v8928_v42  ;;  %v5480_v53 = vld [vmem:[%s9352_s0 + $0x68] sm:$0xff] }
 0x59d   :  { %v5176_v59 = vadd.f32 %v5175_v56, %v4974_v51  ;;  %v4900_v61 = vpop.f32.mrf.mxu0 }
 0x59e   :  { %v4907_v62 = vmax.f32 %v4899_v55, 0.0  ;;  %v4901_v1 = vadd.f32 %v4900_v61, %v4701_v52  ;;  %v5177_v2 = vpop.f32.mrf.mxu1 }
 0x59f   :  { %v5184_v3 = vmax.f32 %v5176_v59, 0.0  ;;  %v5178_v5 = vadd.f32 %v5177_v2, %v4978_v54  ;;  %v4902_v42 = vpop.f32.mrf.mxu0  ;;  %v5757_v59 = vld [vmem:[%s9352_s0 + $0x78] sm:$0xff]  ;;  %v5481_v2 = vld [vmem:[%s9352_s0 + $0x120] sm:$0xff] }
 0x5a0   :  { %v4929_v6 = vmul.f32 %v4925_v58, %v4907_v62  ;;  %v4908_v7 = vmax.f32 %v4901_v1, 0.0  ;;  %v4903_v9 = vadd.f32 %v4902_v42, %v4697_v50  ;;  %v5179_v57 = vpop.f32.mrf.mxu1 }
 0x5a1   :  { %v5206_v60 = vmul.f32 %v5202_v0, %v5184_v3  ;;  %v5185_v63 = vmax.f32 %v5178_v5, 0.0  ;;  %v5180_v11 = vadd.f32 %v5179_v57, %v4974_v51  ;;  %v4904_v12 = vpop.f32.mrf.mxu0 }
 0x5a2   :  { %4933 = vst [vmem:[%s9361_s9 + $0x40] sm:$0xff] %v4929_v6  ;;  %v7765_v13 = vpack.c.bf16 %v4908_v7, %v4907_v62  ;;  %v4930_v14 = vmul.f32 %v4926_v4, %v4908_v7  ;;  %v4909_v15 = vmax.f32 %v4903_v9, 0.0  ;;  %v4905_v17 = vadd.f32 %v4904_v12, %v4701_v52  ;;  %v5181_v18 = vpop.f32.mrf.mxu1  ;;  %v5758_v7 = vld [vmem:[%s9352_s0 + $0x130] sm:$0xff] }
 0x5a3   :  { %5210 = vst [vmem:[%s9361_s9 + $0x50] sm:$0xff] %v5206_v60  ;;  %v7767_v19 = vpack.c.bf16 %v5185_v63, %v5184_v3  ;;  %v5207_v20 = vmul.f32 %v5203_v8, %v5185_v63  ;;  %v5186_v21 = vmax.f32 %v5180_v11, 0.0  ;;  %v5182_v23 = vadd.f32 %v5181_v18, %v4978_v54 }
 0x5a4   :  { %4923 = vst [vmem:[#allocation16 + $0x20] sm:$0xff] %v7765_v13  ;;  %4934 = vst [vmem:[%s9361_s9 + $0x48] sm:$0xff] %v4930_v14  ;;  %v4931_v25 = vmul.f32 %v4927_v10, %v4909_v15  ;;  %v4910_v27 = vmax.f32 %v4905_v17, 0.0  ;;  %v5482_v10 = vld [vmem:[%s9352_s0 + $0x128] sm:$0xff]  ;;  %v5759_v14 = vld [vmem:[%s9352_s0 + $0x138] sm:$0xff] }
 0x5a5   :  { %5200 = vst [vmem:[#allocation16 + $0x28] sm:$0xff] %v7767_v19  ;;  %5211 = vst [vmem:[%s9361_s9 + $0x58] sm:$0xff] %v5207_v20  ;;  %v5208_v29 = vmul.f32 %v5204_v16, %v5186_v21  ;;  %v5187_v30 = vmax.f32 %v5182_v23, 0.0 }
 0x5a6   :  { %4935 = vst [vmem:[%s9361_s9 + $0x100] sm:$0xff] %v4931_v25  ;;  %v7766_v31 = vpack.c.bf16 %v4910_v27, %v4909_v15  ;;  %v4932_v32 = vmul.f32 %v4928_v22, %v4910_v27  ;;  %v6077_v22 = vld [vmem:[#allocation14 + $0x12] sm:$0x3] }
 0x5a7   :  { %5212 = vst [vmem:[%s9361_s9 + $0x110] sm:$0xff] %v5208_v29  ;;  %v7768_v33 = vpack.c.bf16 %v5187_v30, %v5186_v21  ;;  %v5209_v34 = vmul.f32 %v5205_v28, %v5187_v30  ;;  %v5800_v21 = vld [vmem:[#allocation14 + $0x10] sm:$0x3]  ;;  %v6082_v25 = vrot.slane %v6077_v22, %v8907_v26  ;;  %v6086_v29 = vrot.slane %v6077_v22, %v8905_v24 }
 0x5a8   :  { %4924 = vst [vmem:[#allocation16 + $0x80] sm:$0xff] %v7766_v31  ;;  %4936 = vst [vmem:[%s9361_s9 + $0x108] sm:$0xff] %v4932_v32  ;;  %v5805_v23 = vrot.slane %v5800_v21, %v8907_v26  ;;  %v5809_v27 = vrot.slane %v5800_v21, %v8905_v24  ;;  %v6033_v32 = vld [vmem:[%s9352_s0 + $0x80] sm:$0xff]  ;;  %v6864_v22 = vld [vmem:[%s9352_s0 + $0xb0] sm:$0xff] }
 0x5a9   :  { %5201 = vst [vmem:[#allocation16 + $0x88] sm:$0xff] %v7768_v33  ;;  %5213 = vst [vmem:[%s9361_s9 + $0x118] sm:$0xff] %v5209_v34 }
 0x5db   :  { %v5452_v39 = vpop.f32.mrf.mxu0 }
 0x5dc   :  { %v5453_v43 = vadd.f32 %v5452_v39, %v5251_v37  ;;  %v5729_v44 = vpop.f32.mrf.mxu1  ;;  %v6034_v39 = vld [vmem:[%s9352_s0 + $0x88] sm:$0xff] }
 0x5dd   :  { %v5730_v46 = vadd.f32 %v5729_v44, %v5528_v38  ;;  %v5454_v47 = vpop.f32.mrf.mxu0 }
 0x5de   :  { %v5461_v48 = vmax.f32 %v5453_v43, 0.0  ;;  %v5455_v50 = vadd.f32 %v5454_v47, %v5255_v41  ;;  %v5731_v51 = vpop.f32.mrf.mxu1 }
 0x5df   :  { %v5738_v52 = vmax.f32 %v5730_v46, 0.0  ;;  %v5732_v54 = vadd.f32 %v5731_v51, %v5532_v40  ;;  %v5456_v55 = vpop.f32.mrf.mxu0  ;;  %v6311_v46 = vld [vmem:[%s9352_s0 + $0x98] sm:$0xff]  ;;  %v6035_v51 = vld [vmem:[%s9352_s0 + $0x140] sm:$0xff] }
 0x5e0   :  { %v5483_v56 = vmul.f32 %v5479_v45, %v5461_v48  ;;  %v5462_v58 = vmax.f32 %v5455_v50, 0.0  ;;  %v5457_v61 = vadd.f32 %v5456_v55, %v5251_v37  ;;  %v5733_v62 = vpop.f32.mrf.mxu1 }
 0x5e1   :  { %v5760_v0 = vmul.f32 %v5756_v49, %v5738_v52  ;;  %v5739_v1 = vmax.f32 %v5732_v54, 0.0  ;;  %v5734_v3 = vadd.f32 %v5733_v62, %v5528_v38  ;;  %v5458_v4 = vpop.f32.mrf.mxu0 }
 0x5e2   :  { %5487 = vst [vmem:[%s9361_s9 + $0x60] sm:$0xff] %v5483_v56  ;;  %v7769_v5 = vpack.c.bf16 %v5462_v58, %v5461_v48  ;;  %v5484_v42 = vmul.f32 %v5480_v53, %v5462_v58  ;;  %v5463_v6 = vmax.f32 %v5457_v61, 0.0  ;;  %v5459_v8 = vadd.f32 %v5458_v4, %v5255_v41  ;;  %v5735_v9 = vpop.f32.mrf.mxu1  ;;  %v6312_v58 = vld [vmem:[%s9352_s0 + $0x150] sm:$0xff] }
 0x5e3   :  { %5764 = vst [vmem:[%s9361_s9 + $0x70] sm:$0xff] %v5760_v0  ;;  %v7771_v57 = vpack.c.bf16 %v5739_v1, %v5738_v52  ;;  %v5761_v60 = vmul.f32 %v5757_v59, %v5739_v1  ;;  %v5740_v63 = vmax.f32 %v5734_v3, 0.0  ;;  %v5736_v11 = vadd.f32 %v5735_v9, %v5532_v40 }
 0x5e4   :  { %5477 = vst [vmem:[#allocation16 + $0x30] sm:$0xff] %v7769_v5  ;;  %5488 = vst [vmem:[%s9361_s9 + $0x68] sm:$0xff] %v5484_v42  ;;  %v5485_v12 = vmul.f32 %v5481_v2, %v5463_v6  ;;  %v5464_v13 = vmax.f32 %v5459_v8, 0.0  ;;  %v6036_v2 = vld [vmem:[%s9352_s0 + $0x148] sm:$0xff]  ;;  %v6313_v42 = vld [vmem:[%s9352_s0 + $0x158] sm:$0xff] }
 0x5e5   :  { %5754 = vst [vmem:[#allocation16 + $0x38] sm:$0xff] %v7771_v57  ;;  %5765 = vst [vmem:[%s9361_s9 + $0x78] sm:$0xff] %v5761_v60  ;;  %v5762_v15 = vmul.f32 %v5758_v7, %v5740_v63  ;;  %v5741_v16 = vmax.f32 %v5736_v11, 0.0 }
 0x5e6   :  { %5489 = vst [vmem:[%s9361_s9 + $0x120] sm:$0xff] %v5485_v12  ;;  %v7770_v17 = vpack.c.bf16 %v5464_v13, %v5463_v6  ;;  %v5486_v18 = vmul.f32 %v5482_v10, %v5464_v13  ;;  %v6631_v10 = vld [vmem:[#allocation14 + $0x16] sm:$0x3] }
 0x5e7   :  { %5766 = vst [vmem:[%s9361_s9 + $0x130] sm:$0xff] %v5762_v15  ;;  %v7772_v19 = vpack.c.bf16 %v5741_v16, %v5740_v63  ;;  %v5763_v20 = vmul.f32 %v5759_v14, %v5741_v16  ;;  %v6354_v63 = vld [vmem:[#allocation14 + $0x14] sm:$0x3]  ;;  %v6636_v12 = vrot.slane %v6631_v10, %v8907_v26  ;;  %v6640_v15 = vrot.slane %v6631_v10, %v8905_v24 }
 0x5e8   :  { %5478 = vst [vmem:[#allocation16 + $0x90] sm:$0xff] %v7770_v17  ;;  %5490 = vst [vmem:[%s9361_s9 + $0x128] sm:$0xff] %v5486_v18  ;;  %v6359_v11 = vrot.slane %v6354_v63, %v8907_v26  ;;  %v6363_v13 = vrot.slane %v6354_v63, %v8905_v24  ;;  %v6587_v18 = vld [vmem:[%s9352_s0 + $0xa0] sm:$0xff]  ;;  %v6588_v24 = vld [vmem:[%s9352_s0 + $0xa8] sm:$0xff] }
 0x5e9   :  { %5755 = vst [vmem:[#allocation16 + $0x98] sm:$0xff] %v7772_v19  ;;  %5767 = vst [vmem:[%s9361_s9 + $0x138] sm:$0xff] %v5763_v20 }
 0x61b   :  { %v6006_v28 = vpop.f32.mrf.mxu0 }
 0x61c   :  { %v6007_v30 = vadd.f32 %v6006_v28, %v5805_v23  ;;  %v6283_v31 = vpop.f32.mrf.mxu1 }
 0x61d   :  { %v6284_v33 = vadd.f32 %v6283_v31, %v6082_v25  ;;  %v6008_v34 = vpop.f32.mrf.mxu0  ;;  %v6865_v31 = vld [vmem:[%s9352_s0 + $0xb8] sm:$0xff] }
 0x61e   :  { %v6015_v35 = vmax.f32 %v6007_v30, 0.0  ;;  %v6009_v37 = vadd.f32 %v6008_v34, %v5809_v27  ;;  %v6285_v38 = vpop.f32.mrf.mxu1 }
 0x61f   :  { %v6292_v41 = vmax.f32 %v6284_v33, 0.0  ;;  %v6286_v40 = vadd.f32 %v6285_v38, %v6086_v29  ;;  %v6010_v43 = vpop.f32.mrf.mxu0 }
 0x620   :  { %v6037_v44 = vmul.f32 %v6033_v32, %v6015_v35  ;;  %v6016_v45 = vmax.f32 %v6009_v37, 0.0  ;;  %v6011_v47 = vadd.f32 %v6010_v43, %v5805_v23  ;;  %v6287_v48 = vpop.f32.mrf.mxu1  ;;  %v6866_v43 = vld [vmem:[%s9352_s0 + $0x170] sm:$0xff] }
 0x621   :  { %v6314_v49 = vmul.f32 %v6310_v36, %v6292_v41  ;;  %v6293_v50 = vmax.f32 %v6286_v40, 0.0  ;;  %v6288_v52 = vadd.f32 %v6287_v48, %v6082_v25  ;;  %v6012_v53 = vpop.f32.mrf.mxu0  ;;  %v6589_v36 = vld [vmem:[%s9352_s0 + $0x160] sm:$0xff] }
 0x622   :  { %6041 = vst [vmem:[%s9361_s9 + $0x80] sm:$0xff] %v6037_v44  ;;  %v7773_v54 = vpack.c.bf16 %v6016_v45, %v6015_v35  ;;  %v6038_v55 = vmul.f32 %v6034_v39, %v6016_v45  ;;  %v6017_v56 = vmax.f32 %v6011_v47, 0.0  ;;  %v6013_v59 = vadd.f32 %v6012_v53, %v5809_v27  ;;  %v6289_v61 = vpop.f32.mrf.mxu1  ;;  %v6867_v53 = vld [vmem:[%s9352_s0 + $0x178] sm:$0xff] }
 0x623   :  { %6318 = vst [vmem:[%s9361_s9 + $0x90] sm:$0xff] %v6314_v49  ;;  %v7775_v62 = vpack.c.bf16 %v6293_v50, %v6292_v41  ;;  %v6315_v0 = vmul.f32 %v6311_v46, %v6293_v50  ;;  %v6294_v1 = vmax.f32 %v6288_v52, 0.0  ;;  %v6290_v3 = vadd.f32 %v6289_v61, %v6086_v29  ;;  %v6590_v49 = vld [vmem:[%s9352_s0 + $0x168] sm:$0xff] }
 0x624   :  { %6031 = vst [vmem:[#allocation16 + $0x40] sm:$0xff] %v7773_v54  ;;  %6042 = vst [vmem:[%s9361_s9 + $0x88] sm:$0xff] %v6038_v55  ;;  %v6039_v4 = vmul.f32 %v6035_v51, %v6017_v56  ;;  %v6018_v5 = vmax.f32 %v6013_v59, 0.0 }
 0x625   :  { %6308 = vst [vmem:[#allocation16 + $0x48] sm:$0xff] %v7775_v62  ;;  %6319 = vst [vmem:[%s9361_s9 + $0x98] sm:$0xff] %v6315_v0  ;;  %v6316_v6 = vmul.f32 %v6312_v58, %v6294_v1  ;;  %v6295_v7 = vmax.f32 %v6290_v3, 0.0 }
 0x626   :  { %6043 = vst [vmem:[%s9361_s9 + $0x140] sm:$0xff] %v6039_v4  ;;  %v7774_v8 = vpack.c.bf16 %v6018_v5, %v6017_v56  ;;  %v6040_v9 = vmul.f32 %v6036_v2, %v6018_v5 }
 0x627   :  { %6320 = vst [vmem:[%s9361_s9 + $0x150] sm:$0xff] %v6316_v6  ;;  %v7776_v57 = vpack.c.bf16 %v6295_v7, %v6294_v1  ;;  %v6317_v60 = vmul.f32 %v6313_v42, %v6295_v7 }
 0x628   :  { %6032 = vst [vmem:[#allocation16 + $0xa0] sm:$0xff] %v7774_v8  ;;  %6044 = vst [vmem:[%s9361_s9 + $0x148] sm:$0xff] %v6040_v9 }
 0x629   :  { %6309 = vst [vmem:[#allocation16 + $0xa8] sm:$0xff] %v7776_v57  ;;  %6321 = vst [vmem:[%s9361_s9 + $0x158] sm:$0xff] %v6317_v60 }
 0x65b   :  { %v6560_v14 = vpop.f32.mrf.mxu0 }
 0x65c   :  { %v6561_v16 = vadd.f32 %v6560_v14, %v6359_v11  ;;  %v6837_v17 = vpop.f32.mrf.mxu1 }
 0x65d   :  { %v6838_v19 = vadd.f32 %v6837_v17, %v6636_v12  ;;  %v6562_v20 = vpop.f32.mrf.mxu0 }
 0x65e   :  { %v6569_v21 = vmax.f32 %v6561_v16, 0.0  ;;  %v6563_v23 = vadd.f32 %v6562_v20, %v6363_v13  ;;  %v6839_v26 = vpop.f32.mrf.mxu1 }
 0x65f   :  { %v6846_v25 = vmax.f32 %v6838_v19, 0.0  ;;  %v6840_v27 = vadd.f32 %v6839_v26, %v6640_v15  ;;  %v6564_v28 = vpop.f32.mrf.mxu0 }
 0x660   :  { %v6591_v29 = vmul.f32 %v6587_v18, %v6569_v21  ;;  %v6570_v30 = vmax.f32 %v6563_v23, 0.0  ;;  %v6565_v32 = vadd.f32 %v6564_v28, %v6359_v11  ;;  %v6841_v33 = vpop.f32.mrf.mxu1 }
 0x661   :  { %v6868_v34 = vmul.f32 %v6864_v22, %v6846_v25  ;;  %v6847_v35 = vmax.f32 %v6840_v27, 0.0  ;;  %v6842_v37 = vadd.f32 %v6841_v33, %v6636_v12  ;;  %v6566_v38 = vpop.f32.mrf.mxu0 }
 0x662   :  { %6595 = vst [vmem:[%s9361_s9 + $0xa0] sm:$0xff] %v6591_v29  ;;  %v7777_v41 = vpack.c.bf16 %v6570_v30, %v6569_v21  ;;  %v6592_v39 = vmul.f32 %v6588_v24, %v6570_v30  ;;  %v6571_v40 = vmax.f32 %v6565_v32, 0.0  ;;  %v6567_v44 = vadd.f32 %v6566_v38, %v6363_v13  ;;  %v6843_v45 = vpop.f32.mrf.mxu1 }
 0x663   :  { %6872 = vst [vmem:[%s9361_s9 + $0xb0] sm:$0xff] %v6868_v34  ;;  %v7779_v46 = vpack.c.bf16 %v6847_v35, %v6846_v25  ;;  %v6869_v47 = vmul.f32 %v6865_v31, %v6847_v35  ;;  %v6848_v48 = vmax.f32 %v6842_v37, 0.0  ;;  %v6844_v50 = vadd.f32 %v6843_v45, %v6640_v15 }
 0x664   :  { %6585 = vst [vmem:[#allocation16 + $0x50] sm:$0xff] %v7777_v41  ;;  %6596 = vst [vmem:[%s9361_s9 + $0xa8] sm:$0xff] %v6592_v39  ;;  %v6593_v51 = vmul.f32 %v6589_v36, %v6571_v40  ;;  %v6572_v52 = vmax.f32 %v6567_v44, 0.0 }
 0x665   :  { %6862 = vst [vmem:[#allocation16 + $0x58] sm:$0xff] %v7779_v46  ;;  %6873 = vst [vmem:[%s9361_s9 + $0xb8] sm:$0xff] %v6869_v47  ;;  %v6870_v54 = vmul.f32 %v6866_v43, %v6848_v48  ;;  %v6849_v55 = vmax.f32 %v6844_v50, 0.0 }
 0x666   :  { %6597 = vst [vmem:[%s9361_s9 + $0x160] sm:$0xff] %v6593_v51  ;;  %v7778_v56 = vpack.c.bf16 %v6572_v52, %v6571_v40  ;;  %v6594_v58 = vmul.f32 %v6590_v49, %v6572_v52 }
 0x667   :  { %6874 = vst [vmem:[%s9361_s9 + $0x170] sm:$0xff] %v6870_v54  ;;  %v7780_v59 = vpack.c.bf16 %v6849_v55, %v6848_v48  ;;  %v6871_v61 = vmul.f32 %v6867_v53, %v6849_v55 }
 0x668   :  { %6586 = vst [vmem:[#allocation16 + $0xb0] sm:$0xff] %v7778_v56  ;;  %6598 = vst [vmem:[%s9361_s9 + $0x168] sm:$0xff] %v6594_v58 }
 0x669   :  { %6863 = vst [vmem:[#allocation16 + $0xb8] sm:$0xff] %v7780_v59  ;;  %6875 = vst [vmem:[%s9361_s9 + $0x178] sm:$0xff] %v6871_v61 }
 0x66a   :  { %8645 = shalt.err (!%p8642_p2)
}
 0x66b   :  { %6889 = dma.vmem_to_hbm [thread:$0]  %s6884_s25, 3072, %s9362_s10, [#allocation4], %s8675_s3, %s8675_s3, %s8676_s24  }
 0x66c   :  { %8664 = dma.done.wait [#allocation4], 3072  }
 0x66d   :  { %8665 = vsyncadd [#allocation4], 4294964224 }
 0x66e   :  { %6895 = vsyncpa [#allocation3], 1 }
 0x66f   :  { %6896 = vsyncpa [#allocation6], 1 }
 0x670   :  { %6897 = vsyncpa [#allocation9], 1 }
 0x671   :  { %6898 = vsyncpa [#allocation12], 1 }
 0x672   :  { %6899 = vsyncpa [#allocation15], 1 }
 0x673   :  { %6900 = vsyncpa [#allocation4], 1 }

</bundles_post_ra>
